<compile_context>
chip_gen: v5e
topology: v5e:2x2
jax: 0.10.0
libtpu: 0.0.40
codegen_flags: <defaults>
</compile_context>

<pallas_src>
import math
import jax
import jax.numpy as jnp
from jax import lax
from jax.experimental import pallas as pl
from jax.experimental.pallas import tpu as pltpu

# ----- small stand-in dimensions (roles match the module; sizes shrunk) -----
B = 8              # batch
CIN = 4            # image input channels
CIN_PAD = 8        # channels padded to a sublane multiple
H = W = 16         # image spatial
P = H * W
CFEAT = 128        # stands for efficientnet final_in_features (~1792)
VOCAB = 64         # synthetic text vocab
S = 8              # sequence length
E = 32             # token embedding dim
TXT = 128          # stands for BERT hidden 768
D = 128            # stands for head hidden 2048
K = 256            # stands for 11014 classes
TILE_K = 128       # class tile (use 1024-2048 at real K; re-derive for v7x VMEM)
K_PAD = ((K + TILE_K - 1) // TILE_K) * TILE_K   # pad classes so no tail tile is dropped

SCALE = 30.0
MARGIN = 0.5
COS_M = math.cos(MARGIN)
SIN_M = math.sin(MARGIN)
TH = math.cos(math.pi - MARGIN)
MM = math.sin(math.pi - MARGIN) * MARGIN
BN_EPS = 1e-5
NORM_EPS = 1e-12   # F.normalize eps


# ---------------------------------------------------------------------------
# Kernel 1: backbones (once, into scratch) + per-head fc/bn/residual stack.
# grid=(3,) streams one head's fc weights per step; output is the
# F.normalize'd head feature for that head: feat[(head), B, D] in bf16.
# ---------------------------------------------------------------------------
def features_kernel(img_ref, wc_ref, bc_ref, emb_ref, mask_ref, wp_ref, bp_ref,
                    w1x_ref, w1y_ref, b1_ref, w2_ref, b2_ref,
                    feat_ref, x_sc, y_sc):
    head = pl.program_id(0)

    @pl.when(head == 0)
    def _():
        # ---- image backbone stand-in: 1x1 conv (flat bf16 matmul) + ReLU + avgpool
        # TODO(synk): depth-8 contraction wastes MXU depth; use VPU FMAs or the
        #             real extractor at production sizes.
        h = jnp.dot(img_ref[...], wc_ref[...],
                    preferred_element_type=jnp.float32) + bc_ref[...]   # (B*P, CFEAT)
        h = jnp.maximum(h, 0.0)
        x = jnp.mean(h.reshape(B, P, CFEAT), axis=1)                    # (B, CFEAT) f32
        x_sc[...] = x.astype(jnp.bfloat16)

        # ---- text backbone stand-in: masked mean + tanh(Linear) pooler
        emb = emb_ref[...]                                              # (B, S, E)
        mask = mask_ref[...]                                            # (B, S)
        summed = jnp.sum(emb * mask[:, :, None], axis=1)                # (B, E)
        cnt = jnp.maximum(jnp.sum(mask, axis=1, keepdims=True), 1.0)
        pooled = summed / cnt
        y = jnp.tanh(jnp.dot(pooled.astype(jnp.bfloat16), wp_ref[...],
                             preferred_element_type=jnp.float32) + bp_ref[...])  # (B, TXT)
        y_sc[...] = y.astype(jnp.bfloat16)

    # ---- head `head`: Dropout(eval)=id -> fc1(+BN folded) -> residual
    #      -> fc2(+BN folded) -> += residual -> F.normalize
    # concat head realized as x @ w1x + y @ w1y (w1x/w1y zero-padded for the
    # single-branch heads) so every head has an identical streamed block shape.
    h1 = (jnp.dot(x_sc[...], w1x_ref[0], preferred_element_type=jnp.float32)
          + jnp.dot(y_sc[...], w1y_ref[0], preferred_element_type=jnp.float32)
          + b1_ref[0])                                                  # (B, D) f32
    h2 = jnp.dot(h1.astype(jnp.bfloat16), w2_ref[0],
                 preferred_element_type=jnp.float32) + b2_ref[0]        # (B, D) f32
    hs = h2 + h1
    norm = jnp.sqrt(jnp.sum(hs * hs, axis=-1, keepdims=True))
    feat_ref[0] = (hs / jnp.maximum(norm, NORM_EPS)).astype(feat_ref.dtype)


# ---------------------------------------------------------------------------
# Kernel 2: ArcMarginProduct, grid=(head, class-tile), both axes parallel.
#   cosine = feat_n @ wa_n         (weight columns pre-normalized in f32 offline)
#   margin math applied only to the gathered label-column value.
# ---------------------------------------------------------------------------
def arcface_kernel(label_ref, feat_ref, wa_ref, out_ref):
    k0 = pl.program_id(1) * TILE_K
    col = lax.broadcasted_iota(jnp.int32, (B, TILE_K), 1) + k0
    one_hot = (col == label_ref[...]).astype(jnp.float32)               # (B, TILE_K)

    cosine = jnp.dot(feat_ref[0], wa_ref[0],
                     preferred_element_type=jnp.float32)                # (B, TILE_K)
    # cosine at the label column (0 if the label is not inside this class tile)
    target = jnp.sum(one_hot * cosine, axis=-1, keepdims=True)          # (B, 1)
    sine = jnp.sqrt(jnp.maximum(1.0 - target * target, 0.0))
    phi = target * COS_M - sine * SIN_M
    phi = jnp.where(target > TH, phi, target - MM)                      # easy_margin=False
    out_ref[0] = (cosine + one_hot * (phi - target)) * SCALE


# ---------------------------------------------------------------------------
# Forward
# ---------------------------------------------------------------------------
def bert_efficientnet_forward(params, image, sent_id, mask, label):
    # --- XLA glue: layout change + zero-pad channels + embedding lookup ---
    img = jnp.transpose(image, (0, 2, 3, 1)).reshape(B, P, CIN)
    img = jnp.pad(img, ((0, 0), (0, 0), (0, CIN_PAD - CIN)))
    img = img.reshape(B * P, CIN_PAD).astype(jnp.bfloat16)
    emb = jnp.take(params["emb"], sent_id, axis=0)                      # (B, S, E)
    maskf = mask.astype(jnp.float32)
    label2d = label.reshape(B, 1).astype(jnp.int32)

    feats = pl.pallas_call(
        features_kernel,
        out_shape=jax.ShapeDtypeStruct((3, B, D), jnp.bfloat16),
        grid=(3,),
        in_specs=[
            pl.BlockSpec((B * P, CIN_PAD), lambda i: (0, 0)),           # img (resident)
            pl.BlockSpec((CIN_PAD, CFEAT), lambda i: (0, 0)),           # conv_w
            pl.BlockSpec((1, CFEAT), lambda i: (0, 0)),                 # conv_b
            pl.BlockSpec((B, S, E), lambda i: (0, 0, 0)),               # emb
            pl.BlockSpec((B, S), lambda i: (0, 0)),                     # mask
            pl.BlockSpec((E, TXT), lambda i: (0, 0)),                   # pool_w
            pl.BlockSpec((1, TXT), lambda i: (0, 0)),                   # pool_b
            pl.BlockSpec((1, CFEAT, D), lambda i: (i, 0, 0)),           # per-head fc1 (image part)
            pl.BlockSpec((1, TXT, D), lambda i: (i, 0, 0)),             # per-head fc1 (text part)
            pl.BlockSpec((1, 1, D), lambda i: (i, 0, 0)),               # per-head b1 (BN folded)
            pl.BlockSpec((1, D, D), lambda i: (i, 0, 0)),               # per-head fc2
            pl.BlockSpec((1, 1, D), lambda i: (i, 0, 0)),               # per-head b2 (BN folded)
        ],
        out_specs=pl.BlockSpec((1, B, D), lambda i: (i, 0, 0)),
        scratch_shapes=[pltpu.VMEM((B, CFEAT), jnp.bfloat16),           # pooled image feature
                        pltpu.VMEM((B, TXT), jnp.bfloat16)],            # pooled text feature
        compiler_params=pltpu.CompilerParams(
            # head 0 fills the backbone scratch used by heads 1/2 -> sequential
            dimension_semantics=("arbitrary",)),
    )(img, params["conv_w"], params["conv_b"], emb, maskf,
      params["pool_w"], params["pool_b"],
      params["head_w1x"], params["head_w1y"], params["head_b1"],
      params["head_w2"], params["head_b2"])

    logits = pl.pallas_call(
        arcface_kernel,
        out_shape=jax.ShapeDtypeStruct((3, B, K_PAD), jnp.float32),
        grid=(3, K_PAD // TILE_K),
        in_specs=[
            pl.BlockSpec((B, 1), lambda i, k: (0, 0)),                  # labels (VMEM, vector compare)
            pl.BlockSpec((1, B, D), lambda i, k: (i, 0, 0)),            # normalized head feature
            pl.BlockSpec((1, D, TILE_K), lambda i, k: (i, 0, k)),       # streamed class-weight tile
        ],
        out_specs=pl.BlockSpec((1, B, TILE_K), lambda i, k: (i, 0, k)),
        compiler_params=pltpu.CompilerParams(
            dimension_semantics=("parallel", "parallel")),
    )(label2d, feats, params["arc_w"])

    logits = logits[:, :, :K]                                           # drop class padding
    return logits[0], logits[1], logits[2]


# ---------------------------------------------------------------------------
# Deterministic parameter init + offline folding
#   * eval-mode BatchNorm folded into the Linear weights/biases with the real
#     running stats: W' = W*g/sqrt(var+eps), b' = (b-mean)*g/sqrt(var+eps)+beta
#   * ArcFace weight columns F.normalize'd in f32, then cast to bf16
# ---------------------------------------------------------------------------
def fold_linear_bn(w, b, bn):
    gamma, beta, mean, var = bn
    s = gamma / jnp.sqrt(var + BN_EPS)
    return (w * s).astype(jnp.bfloat16), (b - mean) * s + beta


def make_head(key, d_in):
    k1, k2, k3 = jax.random.split(key, 3)
    w1 = jax.random.normal(k1, (d_in, D), jnp.float32) / math.sqrt(d_in)   # Linear(d_in, D).T
    b1 = jnp.zeros((1, D), jnp.float32)
    w2 = jax.random.normal(k2, (D, D), jnp.float32) / math.sqrt(D)         # Linear(D, D).T
    b2 = jnp.zeros((1, D), jnp.float32)
    wa = jax.random.normal(k3, (D, K), jnp.float32) / math.sqrt(D)         # ArcMargin weight.T
    bn_ident = (jnp.ones((1, D), jnp.float32), jnp.zeros((1, D), jnp.float32),
                jnp.zeros((1, D), jnp.float32), jnp.ones((1, D), jnp.float32))
    w1f, b1f = fold_linear_bn(w1, b1, bn_ident)
    w2f, b2f = fold_linear_bn(w2, b2, bn_ident)
    # F.normalize(weight) along in_features == column-normalize weight.T, in f32
    wn = wa / jnp.maximum(jnp.sqrt(jnp.sum(wa * wa, axis=0, keepdims=True)), NORM_EPS)
    return w1f, b1f, w2f, b2f, wn.astype(jnp.bfloat16)


def make_params(key):
    ks = jax.random.split(key, 6)
    conv_w = jax.random.normal(ks[0], (CIN, CFEAT), jnp.float32) / math.sqrt(CIN)
    conv_w = jnp.pad(conv_w, ((0, CIN_PAD - CIN), (0, 0))).astype(jnp.bfloat16)

    img = make_head(ks[3], CFEAT)
    txt = make_head(ks[4], TXT)
    cat = make_head(ks[5], CFEAT + TXT)
    w1c = cat[0]                                                        # (CFEAT+TXT, D) bf16
    zx = jnp.zeros((CFEAT, D), jnp.bfloat16)
    zy = jnp.zeros((TXT, D), jnp.bfloat16)

    arc_w = jnp.stack([img[4], txt[4], cat[4]])                         # (3, D, K) bf16, columns unit-norm
    arc_w = jnp.pad(arc_w, ((0, 0), (0, 0), (0, K_PAD - K)))            # pad classes to TILE_K multiple

    return {
        "conv_w": conv_w,                                               # (CIN_PAD, CFEAT) bf16
        "conv_b": jnp.zeros((1, CFEAT), jnp.float32),
        "emb": jax.random.normal(ks[1], (VOCAB, E), jnp.float32) * 0.02,
        "pool_w": (jax.random.normal(ks[2], (E, TXT), jnp.float32)
                   / math.sqrt(E)).astype(jnp.bfloat16),
        "pool_b": jnp.zeros((1, TXT), jnp.float32),
        # per-head fc1 weight split so image/text/concat all share one block shape
        "head_w1x": jnp.stack([img[0], zx, w1c[:CFEAT]]),               # (3, CFEAT, D) bf16
        "head_w1y": jnp.stack([zy, txt[0], w1c[CFEAT:]]),               # (3, TXT, D) bf16
        "head_b1": jnp.stack([img[1], txt[1], cat[1]]),                 # (3, 1, D) f32
        "head_w2": jnp.stack([img[2], txt[2], cat[2]]),                 # (3, D, D) bf16
        "head_b2": jnp.stack([img[3], txt[3], cat[3]]),                 # (3, 1, D) f32
        "arc_w": arc_w,                                                 # (3, D, K_PAD) bf16
    }


if __name__ == "__main__":
    key = jax.random.PRNGKey(0)
    k_img, k_ids, k_lab, k_par = jax.random.split(key, 4)

    image = jax.random.normal(k_img, (B, CIN, H, W), jnp.float32)       # NCHW like PyTorch
    sent_id = jax.random.randint(k_ids, (B, S), 0, VOCAB, dtype=jnp.int32)
    mask = jnp.ones((B, S), jnp.int32)
    label = jax.random.randint(k_lab, (B,), 0, K, dtype=jnp.int32)
    params = make_params(k_par)

    fwd = jax.jit(bert_efficientnet_forward)
    out_x, out_y, out_z = fwd(params, image, sent_id, mask, label)
    jax.block_until_ready((out_x, out_y, out_z))

    assert out_x.shape == (B, K) and out_y.shape == (B, K) and out_z.shape == (B, K)
    assert bool(jnp.all(jnp.isfinite(out_x)) & jnp.all(jnp.isfinite(out_y))
                & jnp.all(jnp.isfinite(out_z)))
    print("KERNEL_OK")
</pallas_src>

<mosaic_0001>
module attributes {stable_mosaic.version = 11 : i64} {
  func.func @arcface_kernel(%arg0: i32, %arg1: i32, %arg2: memref<8x1xi32, #tpu.memory_space<vmem>>, %arg3: memref<1x8x128xbf16, #tpu.memory_space<vmem>>, %arg4: memref<1x128x128xbf16, #tpu.memory_space<vmem>>, %arg5: memref<1x8x128xf32, #tpu.memory_space<vmem>>) attributes {dimension_semantics = [#tpu.dimension_semantics<parallel>, #tpu.dimension_semantics<parallel>], iteration_bounds = array<i64: 3, 2>, scalar_prefetch = 0 : i64, scratch_operands = 0 : i64, tpu.core_type = #tpu.core_type<tc>, window_params = [{pipeline_mode = #tpu.pipeline_mode<synchronous>, transform_indices = @transform_0, window_bounds = array<i64: 8, 1>}, {transform_indices = @transform_1, window_bounds = array<i64: 1, 8, 128>}, {transform_indices = @transform_2, window_bounds = array<i64: 1, 128, 128>}, {transform_indices = @transform_3, window_bounds = array<i64: 1, 8, 128>}]} {
    %c128_i32 = arith.constant 128 : i32
    %0 = arith.muli %arg1, %c128_i32 : i32
    %1 = tpu.iota {dimensions = array<i32: 1>} : vector<8x128xi32>
    %2 = vector.broadcast %0 : i32 to vector<8x128xi32>
    %3 = arith.addi %1, %2 : vector<8x128xi32>
    %c0 = arith.constant 0 : index
    %c0_0 = arith.constant 0 : index
    %4 = vector.load %arg2[%c0, %c0_0] : memref<8x1xi32, #tpu.memory_space<vmem>>, vector<8x1xi32>
    %5 = vector.broadcast %4 : vector<8x1xi32> to vector<8x128xi32>
    %6 = arith.cmpi eq, %3, %5 : vector<8x128xi32>
    %7 = arith.extui %6 : vector<8x128xi1> to vector<8x128xi32>
    %8 = arith.sitofp %7 : vector<8x128xi32> to vector<8x128xf32>
    %c0_1 = arith.constant 0 : index
    %c0_2 = arith.constant 0 : index
    %c0_3 = arith.constant 0 : index
    %9 = vector.load %arg3[%c0_1, %c0_2, %c0_3] : memref<1x8x128xbf16, #tpu.memory_space<vmem>>, vector<1x8x128xbf16>
    %10 = vector.shape_cast %9 : vector<1x8x128xbf16> to vector<8x128xbf16>
    %c0_4 = arith.constant 0 : index
    %c0_5 = arith.constant 0 : index
    %c0_6 = arith.constant 0 : index
    %11 = vector.load %arg4[%c0_4, %c0_5, %c0_6] : memref<1x128x128xbf16, #tpu.memory_space<vmem>>, vector<1x128x128xbf16>
    %12 = vector.shape_cast %11 : vector<1x128x128xbf16> to vector<128x128xbf16>
    %cst = arith.constant dense<0.000000e+00> : vector<8x128xf32>
    %13 = tpu.matmul %10, %12, %cst {dimension_numbers = #tpu.dot_dimension_numbers<[1], [0], [0], [1], [0, 0, 1, 1], [], []>} : vector<8x128xbf16>, vector<128x128xbf16>, vector<8x128xf32> -> vector<8x128xf32>
    %14 = arith.mulf %8, %13 : vector<8x128xf32>
    %cst_7 = arith.constant dense<0.000000e+00> : vector<8xf32>
    %15 = vector.multi_reduction <add>, %14, %cst_7 [1] : vector<8x128xf32> to vector<8xf32>
    %16 = vector.shape_cast %15 : vector<8xf32> to vector<8x1xf32>
    %17 = arith.mulf %16, %16 : vector<8x1xf32>
    %cst_8 = arith.constant 1.000000e+00 : f32
    %18 = vector.broadcast %cst_8 : f32 to vector<8x1xf32>
    %19 = arith.subf %18, %17 : vector<8x1xf32>
    %cst_9 = arith.constant 0.000000e+00 : f32
    %20 = vector.broadcast %cst_9 : f32 to vector<8x1xf32>
    %21 = arith.maximumf %19, %20 : vector<8x1xf32>
    %22 = math.sqrt %21 : vector<8x1xf32>
    %cst_10 = arith.constant 0.87758255 : f32
    %23 = vector.broadcast %cst_10 : f32 to vector<8x1xf32>
    %24 = arith.mulf %16, %23 : vector<8x1xf32>
    %cst_11 = arith.constant 0.47942555 : f32
    %25 = vector.broadcast %cst_11 : f32 to vector<8x1xf32>
    %26 = arith.mulf %22, %25 : vector<8x1xf32>
    %27 = arith.subf %24, %26 : vector<8x1xf32>
    %cst_12 = arith.constant -0.87758255 : f32
    %28 = vector.broadcast %cst_12 : f32 to vector<8x1xf32>
    %29 = arith.cmpf ogt, %16, %28 : vector<8x1xf32>
    %cst_13 = arith.constant 0.239712775 : f32
    %30 = vector.broadcast %cst_13 : f32 to vector<8x1xf32>
    %31 = arith.subf %16, %30 : vector<8x1xf32>
    %32 = arith.select %29, %27, %31 : vector<8x1xi1>, vector<8x1xf32>
    %33 = arith.subf %32, %16 : vector<8x1xf32>
    %34 = vector.broadcast %33 : vector<8x1xf32> to vector<8x128xf32>
    %35 = arith.mulf %8, %34 : vector<8x128xf32>
    %36 = arith.addf %13, %35 : vector<8x128xf32>
    %cst_14 = arith.constant 3.000000e+01 : f32
    %37 = vector.broadcast %cst_14 : f32 to vector<8x128xf32>
    %38 = arith.mulf %36, %37 : vector<8x128xf32>
    %c0_15 = arith.constant 0 : index
    %c0_16 = arith.constant 0 : index
    %c0_17 = arith.constant 0 : index
    %39 = vector.load %arg5[%c0_15, %c0_16, %c0_17] : memref<1x8x128xf32, #tpu.memory_space<vmem>>, vector<1x8x128xf32>
    %40 = vector.shape_cast %39 : vector<1x8x128xf32> to vector<8x128xf32>
    %41 = vector.shape_cast %38 : vector<8x128xf32> to vector<1x8x128xf32>
    tpu.vector_store %arg5[%c0_15, %c0_16, %c0_17], %41 {strides = array<i32>} : memref<1x8x128xf32, #tpu.memory_space<vmem>>, vector<1x8x128xf32>,
    return
  }
  func.func @transform_0(%arg0: i32, %arg1: i32) -> (i32, i32) {
    %c0_i32 = arith.constant 0 : i32
    %c0_i32_0 = arith.constant 0 : i32
    %c0_i32_1 = arith.constant 0 : i32
    return %c0_i32, %c0_i32_0 : i32, i32
  }
  func.func @transform_1(%arg0: i32, %arg1: i32) -> (i32, i32, i32) {
    %c0_i32 = arith.constant 0 : i32
    %c0_i32_0 = arith.constant 0 : i32
    %c0_i32_1 = arith.constant 0 : i32
    return %arg0, %c0_i32, %c0_i32_0 : i32, i32, i32
  }
  func.func @transform_2(%arg0: i32, %arg1: i32) -> (i32, i32, i32) {
    %c0_i32 = arith.constant 0 : i32
    %c0_i32_0 = arith.constant 0 : i32
    return %arg0, %c0_i32, %arg1 : i32, i32, i32
  }
  func.func @transform_3(%arg0: i32, %arg1: i32) -> (i32, i32, i32) {
    %c0_i32 = arith.constant 0 : i32
    %c0_i32_0 = arith.constant 0 : i32
    return %arg0, %c0_i32, %arg1 : i32, i32, i32
  }
}

module attributes {stable_mosaic.version = 11 : i64} {
  func.func @features_kernel(%arg0: i32, %arg1: memref<2048x8xbf16, #tpu.memory_space<vmem>>, %arg2: memref<8x128xbf16, #tpu.memory_space<vmem>>, %arg3: memref<1x128xf32, #tpu.memory_space<vmem>>, %arg4: memref<8x8x32xf32, #tpu.memory_space<vmem>>, %arg5: memref<8x8xf32, #tpu.memory_space<vmem>>, %arg6: memref<32x128xbf16, #tpu.memory_space<vmem>>, %arg7: memref<1x128xf32, #tpu.memory_space<vmem>>, %arg8: memref<1x128x128xbf16, #tpu.memory_space<vmem>>, %arg9: memref<1x128x128xbf16, #tpu.memory_space<vmem>>, %arg10: memref<1x1x128xf32, #tpu.memory_space<vmem>>, %arg11: memref<1x128x128xbf16, #tpu.memory_space<vmem>>, %arg12: memref<1x1x128xf32, #tpu.memory_space<vmem>>, %arg13: memref<1x8x128xbf16, #tpu.memory_space<vmem>>, %arg14: memref<8x128xbf16, #tpu.memory_space<vmem>>, %arg15: memref<8x128xbf16, #tpu.memory_space<vmem>>) attributes {dimension_semantics = [#tpu.dimension_semantics<arbitrary>], iteration_bounds = array<i64: 3>, scalar_prefetch = 0 : i64, scratch_operands = 2 : i64, tpu.core_type = #tpu.core_type<tc>, window_params = [{pipeline_mode = #tpu.pipeline_mode<synchronous>, transform_indices = @transform_0, window_bounds = array<i64: 2048, 8>}, {pipeline_mode = #tpu.pipeline_mode<synchronous>, transform_indices = @transform_1, window_bounds = array<i64: 8, 128>}, {pipeline_mode = #tpu.pipeline_mode<synchronous>, transform_indices = @transform_2, window_bounds = array<i64: 1, 128>}, {pipeline_mode = #tpu.pipeline_mode<synchronous>, transform_indices = @transform_3, window_bounds = array<i64: 8, 8, 32>}, {pipeline_mode = #tpu.pipeline_mode<synchronous>, transform_indices = @transform_4, window_bounds = array<i64: 8, 8>}, {pipeline_mode = #tpu.pipeline_mode<synchronous>, transform_indices = @transform_5, window_bounds = array<i64: 32, 128>}, {pipeline_mode = #tpu.pipeline_mode<synchronous>, transform_indices = @transform_6, window_bounds = array<i64: 1, 128>}, {transform_indices = @transform_7, window_bounds = array<i64: 1, 128, 128>}, {transform_indices = @transform_8, window_bounds = array<i64: 1, 128, 128>}, {transform_indices = @transform_9, window_bounds = array<i64: 1, 1, 128>}, {transform_indices = @transform_10, window_bounds = array<i64: 1, 128, 128>}, {transform_indices = @transform_11, window_bounds = array<i64: 1, 1, 128>}, {transform_indices = @transform_12, window_bounds = array<i64: 1, 8, 128>}]} {
    %c0_i32 = arith.constant 0 : i32
    %0 = arith.cmpi eq, %arg0, %c0_i32 : i32
    %1 = arith.extui %0 : i1 to i32
    %c0_i32_0 = arith.constant 0 : i32
    %2 = arith.cmpi ne, %1, %c0_i32_0 : i32
    scf.if %2 {
      %c0_26 = arith.constant 0 : index
      %c0_27 = arith.constant 0 : index
      %37 = vector.load %arg1[%c0_26, %c0_27] : memref<2048x8xbf16, #tpu.memory_space<vmem>>, vector<2048x8xbf16>
      %c0_28 = arith.constant 0 : index
      %c0_29 = arith.constant 0 : index
      %38 = vector.load %arg2[%c0_28, %c0_29] : memref<8x128xbf16, #tpu.memory_space<vmem>>, vector<8x128xbf16>
      %cst_30 = arith.constant dense<0.000000e+00> : vector<2048x128xf32>
      %39 = tpu.matmul %37, %38, %cst_30 {dimension_numbers = #tpu.dot_dimension_numbers<[1], [0], [0], [1], [0, 0, 1, 1], [], []>} : vector<2048x8xbf16>, vector<8x128xbf16>, vector<2048x128xf32> -> vector<2048x128xf32>
      %c0_31 = arith.constant 0 : index
      %c0_32 = arith.constant 0 : index
      %40 = vector.load %arg3[%c0_31, %c0_32] : memref<1x128xf32, #tpu.memory_space<vmem>>, vector<1x128xf32>
      %41 = vector.broadcast %40 : vector<1x128xf32> to vector<2048x128xf32>
      %42 = arith.addf %39, %41 : vector<2048x128xf32>
      %cst_33 = arith.constant 0.000000e+00 : f32
      %43 = vector.broadcast %cst_33 : f32 to vector<2048x128xf32>
      %44 = arith.maximumf %42, %43 : vector<2048x128xf32>
      %45 = vector.shape_cast %44 : vector<2048x128xf32> to vector<8x256x128xf32>
      %cst_34 = arith.constant dense<0.000000e+00> : vector<8x128xf32>
      %46 = vector.multi_reduction <add>, %45, %cst_34 [1] : vector<8x256x128xf32> to vector<8x128xf32>
      %cst_35 = arith.constant 2.560000e+02 : f32
      %47 = vector.broadcast %cst_35 : f32 to vector<8x128xf32>
      %48 = arith.divf %46, %47 : vector<8x128xf32>
      %49 = arith.truncf %48 : vector<8x128xf32> to vector<8x128xbf16>
      %c0_36 = arith.constant 0 : index
      %c0_37 = arith.constant 0 : index
      %50 = vector.load %arg14[%c0_36, %c0_37] : memref<8x128xbf16, #tpu.memory_space<vmem>>, vector<8x128xbf16>
      tpu.vector_store %arg14[%c0_36, %c0_37], %49 {strides = array<i32>} : memref<8x128xbf16, #tpu.memory_space<vmem>>, vector<8x128xbf16>,
      %c0_38 = arith.constant 0 : index
      %c0_39 = arith.constant 0 : index
      %c0_40 = arith.constant 0 : index
      %51 = vector.load %arg4[%c0_38, %c0_39, %c0_40] : memref<8x8x32xf32, #tpu.memory_space<vmem>>, vector<8x8x32xf32>
      %c0_41 = arith.constant 0 : index
      %c0_42 = arith.constant 0 : index
      %52 = vector.load %arg5[%c0_41, %c0_42] : memref<8x8xf32, #tpu.memory_space<vmem>>, vector<8x8xf32>
      %53 = vector.shape_cast %52 : vector<8x8xf32> to vector<8x8x1xf32>
      %54 = vector.broadcast %53 : vector<8x8x1xf32> to vector<8x8x32xf32>
      %55 = arith.mulf %51, %54 : vector<8x8x32xf32>
      %cst_43 = arith.constant dense<0.000000e+00> : vector<8x32xf32>
      %56 = vector.multi_reduction <add>, %55, %cst_43 [1] : vector<8x8x32xf32> to vector<8x32xf32>
      %cst_44 = arith.constant dense<0.000000e+00> : vector<8xf32>
      %57 = vector.multi_reduction <add>, %52, %cst_44 [1] : vector<8x8xf32> to vector<8xf32>
      %58 = vector.shape_cast %57 : vector<8xf32> to vector<8x1xf32>
      %cst_45 = arith.constant 1.000000e+00 : f32
      %59 = vector.broadcast %cst_45 : f32 to vector<8x1xf32>
      %60 = arith.maximumf %58, %59 : vector<8x1xf32>
      %61 = vector.broadcast %60 : vector<8x1xf32> to vector<8x32xf32>
      %62 = arith.divf %56, %61 : vector<8x32xf32>
      %63 = arith.truncf %62 : vector<8x32xf32> to vector<8x32xbf16>
      %c0_46 = arith.constant 0 : index
      %c0_47 = arith.constant 0 : index
      %64 = vector.load %arg6[%c0_46, %c0_47] : memref<32x128xbf16, #tpu.memory_space<vmem>>, vector<32x128xbf16>
      %cst_48 = arith.constant dense<0.000000e+00> : vector<8x128xf32>
      %65 = tpu.matmul %63, %64, %cst_48 {dimension_numbers = #tpu.dot_dimension_numbers<[1], [0], [0], [1], [0, 0, 1, 1], [], []>} : vector<8x32xbf16>, vector<32x128xbf16>, vector<8x128xf32> -> vector<8x128xf32>
      %c0_49 = arith.constant 0 : index
      %c0_50 = arith.constant 0 : index
      %66 = vector.load %arg7[%c0_49, %c0_50] : memref<1x128xf32, #tpu.memory_space<vmem>>, vector<1x128xf32>
      %67 = vector.broadcast %66 : vector<1x128xf32> to vector<8x128xf32>
      %68 = arith.addf %65, %67 : vector<8x128xf32>
      %69 = math.tanh %68 : vector<8x128xf32>
      %70 = arith.truncf %69 : vector<8x128xf32> to vector<8x128xbf16>
      %c0_51 = arith.constant 0 : index
      %c0_52 = arith.constant 0 : index
      %71 = vector.load %arg15[%c0_51, %c0_52] : memref<8x128xbf16, #tpu.memory_space<vmem>>, vector<8x128xbf16>
      tpu.vector_store %arg15[%c0_51, %c0_52], %70 {strides = array<i32>} : memref<8x128xbf16, #tpu.memory_space<vmem>>, vector<8x128xbf16>,
    } else {
    }
    %c0 = arith.constant 0 : index
    %c0_1 = arith.constant 0 : index
    %3 = vector.load %arg14[%c0, %c0_1] : memref<8x128xbf16, #tpu.memory_space<vmem>>, vector<8x128xbf16>
    %c0_2 = arith.constant 0 : index
    %c0_3 = arith.constant 0 : index
    %c0_4 = arith.constant 0 : index
    %4 = vector.load %arg8[%c0_2, %c0_3, %c0_4] : memref<1x128x128xbf16, #tpu.memory_space<vmem>>, vector<1x128x128xbf16>
    %5 = vector.shape_cast %4 : vector<1x128x128xbf16> to vector<128x128xbf16>
    %cst = arith.constant dense<0.000000e+00> : vector<8x128xf32>
    %6 = tpu.matmul %3, %5, %cst {dimension_numbers = #tpu.dot_dimension_numbers<[1], [0], [0], [1], [0, 0, 1, 1], [], []>} : vector<8x128xbf16>, vector<128x128xbf16>, vector<8x128xf32> -> vector<8x128xf32>
    %c0_5 = arith.constant 0 : index
    %c0_6 = arith.constant 0 : index
    %7 = vector.load %arg15[%c0_5, %c0_6] : memref<8x128xbf16, #tpu.memory_space<vmem>>, vector<8x128xbf16>
    %c0_7 = arith.constant 0 : index
    %c0_8 = arith.constant 0 : index
    %c0_9 = arith.constant 0 : index
    %8 = vector.load %arg9[%c0_7, %c0_8, %c0_9] : memref<1x128x128xbf16, #tpu.memory_space<vmem>>, vector<1x128x128xbf16>
    %9 = vector.shape_cast %8 : vector<1x128x128xbf16> to vector<128x128xbf16>
    %cst_10 = arith.constant dense<0.000000e+00> : vector<8x128xf32>
    %10 = tpu.matmul %7, %9, %cst_10 {dimension_numbers = #tpu.dot_dimension_numbers<[1], [0], [0], [1], [0, 0, 1, 1], [], []>} : vector<8x128xbf16>, vector<128x128xbf16>, vector<8x128xf32> -> vector<8x128xf32>
    %11 = arith.addf %6, %10 : vector<8x128xf32>
    %c0_11 = arith.constant 0 : index
    %c0_12 = arith.constant 0 : index
    %c0_13 = arith.constant 0 : index
    %12 = vector.load %arg10[%c0_11, %c0_12, %c0_13] : memref<1x1x128xf32, #tpu.memory_space<vmem>>, vector<1x1x128xf32>
    %13 = vector.shape_cast %12 : vector<1x1x128xf32> to vector<1x128xf32>
    %14 = vector.broadcast %13 : vector<1x128xf32> to vector<8x128xf32>
    %15 = arith.addf %11, %14 : vector<8x128xf32>
    %16 = arith.truncf %15 : vector<8x128xf32> to vector<8x128xbf16>
    %c0_14 = arith.constant 0 : index
    %c0_15 = arith.constant 0 : index
    %c0_16 = arith.constant 0 : index
    %17 = vector.load %arg11[%c0_14, %c0_15, %c0_16] : memref<1x128x128xbf16, #tpu.memory_space<vmem>>, vector<1x128x128xbf16>
    %18 = vector.shape_cast %17 : vector<1x128x128xbf16> to vector<128x128xbf16>
    %cst_17 = arith.constant dense<0.000000e+00> : vector<8x128xf32>
    %19 = tpu.matmul %16, %18, %cst_17 {dimension_numbers = #tpu.dot_dimension_numbers<[1], [0], [0], [1], [0, 0, 1, 1], [], []>} : vector<8x128xbf16>, vector<128x128xbf16>, vector<8x128xf32> -> vector<8x128xf32>
    %c0_18 = arith.constant 0 : index
    %c0_19 = arith.constant 0 : index
    %c0_20 = arith.constant 0 : index
    %20 = vector.load %arg12[%c0_18, %c0_19, %c0_20] : memref<1x1x128xf32, #tpu.memory_space<vmem>>, vector<1x1x128xf32>
    %21 = vector.shape_cast %20 : vector<1x1x128xf32> to vector<1x128xf32>
    %22 = vector.broadcast %21 : vector<1x128xf32> to vector<8x128xf32>
    %23 = arith.addf %19, %22 : vector<8x128xf32>
    %24 = arith.addf %23, %15 : vector<8x128xf32>
    %25 = arith.mulf %24, %24 : vector<8x128xf32>
    %cst_21 = arith.constant dense<0.000000e+00> : vector<8xf32>
    %26 = vector.multi_reduction <add>, %25, %cst_21 [1] : vector<8x128xf32> to vector<8xf32>
    %27 = vector.shape_cast %26 : vector<8xf32> to vector<8x1xf32>
    %28 = math.sqrt %27 : vector<8x1xf32>
    %cst_22 = arith.constant 9.99999996E-13 : f32
    %29 = vector.broadcast %cst_22 : f32 to vector<8x1xf32>
    %30 = arith.maximumf %28, %29 : vector<8x1xf32>
    %31 = vector.broadcast %30 : vector<8x1xf32> to vector<8x128xf32>
    %32 = arith.divf %24, %31 : vector<8x128xf32>
    %33 = arith.truncf %32 : vector<8x128xf32> to vector<8x128xbf16>
    %c0_23 = arith.constant 0 : index
    %c0_24 = arith.constant 0 : index
    %c0_25 = arith.constant 0 : index
    %34 = vector.load %arg13[%c0_23, %c0_24, %c0_25] : memref<1x8x128xbf16, #tpu.memory_space<vmem>>, vector<1x8x128xbf16>
    %35 = vector.shape_cast %34 : vector<1x8x128xbf16> to vector<8x128xbf16>
    %36 = vector.shape_cast %33 : vector<8x128xbf16> to vector<1x8x128xbf16>
    tpu.vector_store %arg13[%c0_23, %c0_24, %c0_25], %36 {strides = array<i32>} : memref<1x8x128xbf16, #tpu.memory_space<vmem>>, vector<1x8x128xbf16>,
    return
  }
  func.func @transform_0(%arg0: i32) -> (i32, i32) {
    %c0_i32 = arith.constant 0 : i32
    %c0_i32_0 = arith.constant 0 : i32
    %c0_i32_1 = arith.constant 0 : i32
    return %c0_i32, %c0_i32_0 : i32, i32
  }
  func.func @transform_1(%arg0: i32) -> (i32, i32) {
    %c0_i32 = arith.constant 0 : i32
    %c0_i32_0 = arith.constant 0 : i32
    %c0_i32_1 = arith.constant 0 : i32
    return %c0_i32, %c0_i32_0 : i32, i32
  }
  func.func @transform_2(%arg0: i32) -> (i32, i32) {
    %c0_i32 = arith.constant 0 : i32
    %c0_i32_0 = arith.constant 0 : i32
    %c0_i32_1 = arith.constant 0 : i32
    return %c0_i32, %c0_i32_0 : i32, i32
  }
  func.func @transform_3(%arg0: i32) -> (i32, i32, i32) {
    %c0_i32 = arith.constant 0 : i32
    %c0_i32_0 = arith.constant 0 : i32
    %c0_i32_1 = arith.constant 0 : i32
    %c0_i32_2 = arith.constant 0 : i32
    return %c0_i32, %c0_i32_0, %c0_i32_1 : i32, i32, i32
  }
  func.func @transform_4(%arg0: i32) -> (i32, i32) {
    %c0_i32 = arith.constant 0 : i32
    %c0_i32_0 = arith.constant 0 : i32
    %c0_i32_1 = arith.constant 0 : i32
    return %c0_i32, %c0_i32_0 : i32, i32
  }
  func.func @transform_5(%arg0: i32) -> (i32, i32) {
    %c0_i32 = arith.constant 0 : i32
    %c0_i32_0 = arith.constant 0 : i32
    %c0_i32_1 = arith.constant 0 : i32
    return %c0_i32, %c0_i32_0 : i32, i32
  }
  func.func @transform_6(%arg0: i32) -> (i32, i32) {
    %c0_i32 = arith.constant 0 : i32
    %c0_i32_0 = arith.constant 0 : i32
    %c0_i32_1 = arith.constant 0 : i32
    return %c0_i32, %c0_i32_0 : i32, i32
  }
  func.func @transform_7(%arg0: i32) -> (i32, i32, i32) {
    %c0_i32 = arith.constant 0 : i32
    %c0_i32_0 = arith.constant 0 : i32
    %c0_i32_1 = arith.constant 0 : i32
    return %arg0, %c0_i32, %c0_i32_0 : i32, i32, i32
  }
  func.func @transform_8(%arg0: i32) -> (i32, i32, i32) {
    %c0_i32 = arith.constant 0 : i32
    %c0_i32_0 = arith.constant 0 : i32
    %c0_i32_1 = arith.constant 0 : i32
    return %arg0, %c0_i32, %c0_i32_0 : i32, i32, i32
  }
  func.func @transform_9(%arg0: i32) -> (i32, i32, i32) {
    %c0_i32 = arith.constant 0 : i32
    %c0_i32_0 = arith.constant 0 : i32
    %c0_i32_1 = arith.constant 0 : i32
    return %arg0, %c0_i32, %c0_i32_0 : i32, i32, i32
  }
  func.func @transform_10(%arg0: i32) -> (i32, i32, i32) {
    %c0_i32 = arith.constant 0 : i32
    %c0_i32_0 = arith.constant 0 : i32
    %c0_i32_1 = arith.constant 0 : i32
    return %arg0, %c0_i32, %c0_i32_0 : i32, i32, i32
  }
  func.func @transform_11(%arg0: i32) -> (i32, i32, i32) {
    %c0_i32 = arith.constant 0 : i32
    %c0_i32_0 = arith.constant 0 : i32
    %c0_i32_1 = arith.constant 0 : i32
    return %arg0, %c0_i32, %c0_i32_0 : i32, i32, i32
  }
  func.func @transform_12(%arg0: i32) -> (i32, i32, i32) {
    %c0_i32 = arith.constant 0 : i32
    %c0_i32_0 = arith.constant 0 : i32
    %c0_i32_1 = arith.constant 0 : i32
    return %arg0, %c0_i32, %c0_i32_0 : i32, i32, i32
  }
}

</mosaic_0001>

<bundles_post_ra>
// kernel: bert_efficientnet_forward.3
= control target key start
LH: loop header
LB: loop body
LE: loop exit
PB: predicated region body
PF: predicated region fallthrough
CT: control target
= control target key end

     0   :  { %s730_s12 = smov 0   ;;  %s732_s13 = smov 0   ;;  %s850_s0 = inlined_call_operand.vmem [shape: s32[8,1], index: 0, kind: input, shape index: {}]   ;;  %s851_s1 = inlined_call_operand.vmem [shape: bf16[3,8,128], index: 1, kind: input, shape index: {}]   ;;  %s852_s2 = inlined_call_operand.vmem [shape: bf16[3,128,256], index: 2, kind: input, shape index: {}]   ;;  %s853_s3 = inlined_call_operand.vmem [shape: f32[3,8,256], index: 3, kind: output, shape index: {}]  }
   0x1   :  { %s734_s14 = smov 0   ;;  %s736_s15 = smov 0  }
   0x2   :  { %s738_s16 = smov 0   ;;  %s740_s17 = smov 0  }
   0x3   :  { %s742_s18 = smov 0  }
   0x4 LB: > { %s22_s19 = sadd.s32 1, %s698_s16  ;;  %s25_s20 = sadd.s32 1, %s702_s17  ;;  %s706_s18 = sphi %s742_s18, %s13_s18   ;;  %s702_s17 = sphi %s740_s17, %s859_s17   ;;  %s698_s16 = sphi %s738_s16, %s858_s16   ;;  %s694_s15 = sphi %s736_s15, %s857_s15   ;;  %s690_s14 = sphi %s734_s14, %s856_s14   ;;  %s686_s13 = sphi %s732_s13, %s855_s13   ;;  %s682_s12 = sphi %s730_s12, %s854_s12  }
   0x5   : > { %p23_p0 = scmp.ge.s32.totalorder %s22_s19, 2  ;;  %p88_p1 = scmp.ne.s32.totalorder %s686_s13, %s682_s12 }
   0x6   : > { %p89_p2 = scmp.eq.s32.totalorder %s706_s18, 0  ;;  %s81_s24 = sadd.s32 1, %s686_s13 }
   0x7   : > { %s861_s19 = smov (%p23_p0, %s22_s19), 0  ;;  %s863_s20 = smov (!%p23_p0, %s25_s20), %s702_s17 }
   0x8   : > { %p90_p3 = por %p89_p2, %p88_p1  ;;  %p27_p4 = scmp.ge.s32.totalorder %s863_s20, 3 }
   0x9   : > { %s77_s21 = ssub.s32 %s698_s16, %s861_s19  ;;  %p537_p6 = scmp.ge.s32.totalorder %s706_s18, 6 }
   0xa   : > { %s865_s20 = smov (%p27_p4, %s863_s20), 0 }
   0xb   : > { %s76_s22 = ssub.s32 %s702_s17, %s865_s20  ;;  %145 = sbr.rel (%p537_p6) target bundleno = 38 (0x26), region = 20 }
   0xc   : > { %s78_s23 = sor.u32 %s77_s21, %s76_s22 }
   0xd   : > { %p79_p5 = scmp.eq.s32.totalorder %s78_s23, 0 }
   0xf   : > { %s781_s25 = scalar_select %p79_p5, %s686_s13, %s81_s24  }
  0x10   : > { %155 = sbr.rel (!%p90_p3) target bundleno = 38 (0x26), region = 28  ;;  %s157_s26 = sand.u32 (%p90_p3), 1, %s686_s13  }
  0x11   : > { %s539_s27 = sshll.u32 (%p90_p3), %s702_s17, 5  ;;  %s538_s28 = sshll.u32 (%p90_p3), %s157_s26, 6 }
  0x12   : > { %s161_s29 = sadd.s32 (%p90_p3), %s698_s16, %s539_s27  ;;  %s159_s7 = scalar_lea.vmem (%p90_p3), [#allocation2], %s538_s28 }
  0x13   : > { %s540_s30 = sshll.u32 (%p90_p3), %s161_s29, 2 }
  0x14   : > { %s790_s6 = scalar_lea.vmem (%p90_p3), %s852_s2, %s540_s30 }
  0x15   : > { %v180_v0 = vld [vmem:[%s790_s6] sm:$0xf]  ;;  %v182_v1 = vld [vmem:[%s790_s6 + $0x8] sm:$0xf]  ;;  %v184_v2 = vld [vmem:[%s790_s6 + $0x10] sm:$0xf] }
  0x16   : > { %181 = vst [vmem:[%s159_s7] sm:$0xf] %v180_v0  ;;  %v186_v3 = vld [vmem:[%s790_s6 + $0x18] sm:$0xf]  ;;  %v188_v4 = vld [vmem:[%s790_s6 + $0x20] sm:$0xf] }
  0x17   : > { %183 = vst [vmem:[%s159_s7 + $0x4] sm:$0xf] %v182_v1  ;;  %v190_v5 = vld [vmem:[%s790_s6 + $0x28] sm:$0xf]  ;;  %v192_v6 = vld [vmem:[%s790_s6 + $0x30] sm:$0xf] }
  0x18   : > { %185 = vst [vmem:[%s159_s7 + $0x8] sm:$0xf] %v184_v2  ;;  %v194_v7 = vld [vmem:[%s790_s6 + $0x38] sm:$0xf]  ;;  %v196_v8 = vld [vmem:[%s790_s6 + $0x40] sm:$0xf] }
  0x19   : > { %187 = vst [vmem:[%s159_s7 + $0xc] sm:$0xf] %v186_v3  ;;  %v198_v9 = vld [vmem:[%s790_s6 + $0x48] sm:$0xf]  ;;  %v200_v10 = vld [vmem:[%s790_s6 + $0x50] sm:$0xf] }
  0x1a   : > { %189 = vst [vmem:[%s159_s7 + $0x10] sm:$0xf] %v188_v4  ;;  %v202_v11 = vld [vmem:[%s790_s6 + $0x58] sm:$0xf]  ;;  %v204_v12 = vld [vmem:[%s790_s6 + $0x60] sm:$0xf] }
  0x1b   : > { %191 = vst [vmem:[%s159_s7 + $0x14] sm:$0xf] %v190_v5  ;;  %v206_v13 = vld [vmem:[%s790_s6 + $0x68] sm:$0xf]  ;;  %v208_v14 = vld [vmem:[%s790_s6 + $0x70] sm:$0xf] }
  0x1c   : > { %193 = vst [vmem:[%s159_s7 + $0x18] sm:$0xf] %v192_v6  ;;  %v210_v15 = vld [vmem:[%s790_s6 + $0x78] sm:$0xf] }
  0x1d   : > { %195 = vst [vmem:[%s159_s7 + $0x1c] sm:$0xf] %v194_v7 }
  0x1e   : > { %197 = vst [vmem:[%s159_s7 + $0x20] sm:$0xf] %v196_v8 }
  0x1f   : > { %199 = vst [vmem:[%s159_s7 + $0x24] sm:$0xf] %v198_v9 }
  0x20   : > { %201 = vst [vmem:[%s159_s7 + $0x28] sm:$0xf] %v200_v10 }
  0x21   : > { %203 = vst [vmem:[%s159_s7 + $0x2c] sm:$0xf] %v202_v11 }
  0x22   : > { %205 = vst [vmem:[%s159_s7 + $0x30] sm:$0xf] %v204_v12 }
  0x23   : > { %207 = vst [vmem:[%s159_s7 + $0x34] sm:$0xf] %v206_v13 }
  0x24   : > { %209 = vst [vmem:[%s159_s7 + $0x38] sm:$0xf] %v208_v14 }
  0x25   : > { %211 = vst [vmem:[%s159_s7 + $0x3c] sm:$0xf] %v210_v15 }
  0x26 PF: > { %p541_p7 = scmp.ge.s32.totalorder %s706_s18, 1  ;;  %p266_p8 = scmp.lt.s32.totalorder %s706_s18, 7 }
  0x28   : > { %p267_p9 = pnand %p541_p7, %p266_p8 }
  0x29   : > { %s273_s8 = sand.u32 (!%p267_p9), 1, %s682_s12   ;;  %p303_p10 = scmp.lt.s32.totalorder (!%p267_p9), %s694_s15, 2 }
  0x2a   : > { %270 = sbr.rel (%p267_p9) target bundleno = 364 (0x16c), region = 69  ;;  %s542_s9 = sshll.u32 (!%p267_p9), %s273_s8, 6 }
  0x2b   : > { %s275_s10 = scalar_lea.vmem (!%p267_p9), [#allocation2], %s542_s9  ;;  %s546_s26 = sshll.u32 (!%p267_p9), %s690_s14, 7 }
  0x2c   : > { %p309_p11 = scmp.lt.s32.totalorder (!%p267_p9), %s690_s14, 1 }
  0x2f   : > { %v590_v16 = vld [vmem:[%s275_s10 + $0x38] sm:$0xff]  ;;  %v589_v17 = vld [vmem:[%s275_s10 + $0x30] sm:$0xff]  ;;  %v708_v18 = vmov 0   ;;  %v320_v19 = vld [vmem:[%s850_s0] sm:$0xff]  ;;  %s867_s15 = smov (!%p303_p10, %s694_s15), 2  ;;  %v316_v27 = vlaneseq  ;;  %v318_v29 = vstv %s546_s26  ;;  %v709_v32 = vmov 0.0  }
  0x30   : > { %392 = vmatpush.bf16.msra.mxu0 %v590_v16  ;;  %649 = vset.pattern.permute.xlu0 %v708_v18  ;;  %v588_v20 = vld [vmem:[%s275_s10 + $0x28] sm:$0xff]  ;;  %v587_v21 = vld [vmem:[%s275_s10 + $0x20] sm:$0xff]  ;;  %v586_v22 = vld [vmem:[%s275_s10 + $0x18] sm:$0xff]  ;;  %s543_s12 = sshll.u32 %s867_s15, 2  ;;  %s869_s14 = smov (!%p309_p11, %s690_s14), 1 }
  0x31   : > { %322 = vperm.xlu0 %649, %v320_v19   ;;  %v585_v23 = vld [vmem:[%s275_s10 + $0x10] sm:$0xff]  ;;  %v584_v24 = vld [vmem:[%s275_s10 + $0x8] sm:$0xff]  ;;  %v583_v25 = vld [vmem:[%s275_s10] sm:$0xff]  ;;  %s306_s24 = scalar_lea.vmem %s851_s1, %s543_s12  ;;  %v317_v28 = vand.u32 127, %v316_v27  ;;  %s544_s27 = sshll.u32 %s867_s15, 1 }
  0x32   : > { %v327_v26 = vld [vmem:[%s306_s24] sm:$0xf]  ;;  %s312_s28 = sadd.s32 %s544_s27, %s869_s14 }
  0x33   : > { %v319_v30 = vadd.s32 %v318_v29, %v317_v28  ;;  %s545_s29 = sshll.u32 %s312_s28, 3 }
  0x34   : > { %393 = vmatpush.bf16.msra.mxu0 %v589_v17  ;;  %s314_s5 = scalar_lea.vmem %s853_s3, %s545_s29 }
  0x38   : > { %394 = vmatpush.bf16.msra.mxu0 %v588_v20 }
  0x3c   : > { %395 = vmatpush.bf16.msra.mxu0 %v587_v21 }
  0x40   : > { %396 = vmatpush.bf16.msra.mxu0 %v586_v22 }
  0x44   : > { %397 = vmatpush.bf16.msra.mxu0 %v585_v23 }
  0x48   : > { %398 = vmatpush.bf16.msra.mxu0 %v584_v24 }
  0x4c   : > { %399 = vmatpush.bf16.msra.mxu0 %v583_v25 }
  0x4f   : > { %400 = vmatmul.bf16.vlgmr.msra.gmra.mxu0 %v327_v26 }
  0xa3   : > { %v323_v31 = vpop.permute.xlu0 %322 }
  0xa4   : > { %vm324_vm0 = vcmp.eq.s32.totalorder %v319_v30, %v323_v31 }
  0xa5   : > { %v547_v33 = vsel %vm324_vm0, 1.0, %v709_v32 }
  0xcc   : > { %v401_v34 = vpop.f32.mrf.mxu0 }
  0xcd   : > { %v405_v35 = vmul.f32 %v547_v33, %v401_v34 }
  0xcf   : > { %406 = vadd.xlane.f32.xlu0 %v405_v35 }
  0xd4   : > { %v403_v36 = vpop.f32.mrf.mxu0 }
 0x142   : > { %v407_v37 = vpop.xlane.xlu0 %406 }
 0x143   : > { %v408_v38 = vmul.f32 %v407_v37, %v407_v37  ;;  %v423_v51 = vmul.f32 0.87758255, %v407_v37  ;;  %v580_v54 = vadd.f32 -0.23971277, %v407_v37  ;;  %vm426_vm3 = vcmp.gt.f32.partialorder %v407_v37, -0.87758255 }
 0x145   : > { %v409_v39 = vsub.f32 1.0, %v408_v38 }
 0x147   : > { %v410_v40 = vmax.f32 %v409_v39, 0.0 }
 0x149   : > { %650 = vrsqrt.f32 %v410_v40  ;;  %vm418_vm1 = vcmp.eq.f32.partialorder %v410_v40, inf  ;;  %v421_v48 = vand.u32 2147483648, %v410_v40  ;;  %vm420_vm2 = vcmp.eq.f32.partialorder %v410_v40, 0.0 }
 0x14f   : > { %v651_v41 = vpop.eup %650 }
 0x150   : > { %v412_v42 = vmul.f32 %v651_v41, %v410_v40 }
 0x152   : > { %v413_v43 = vmul.f32 %v651_v41, %v412_v42 }
 0x154   : > { %v414_v44 = vmul.f32 0.5, %v413_v43 }
 0x156   : > { %v415_v45 = vsub.f32 1.5, %v414_v44 }
 0x158   : > { %v416_v46 = vmul.f32 %v651_v41, %v415_v45 }
 0x15a   : > { %v417_v47 = vmul.f32 %v416_v46, %v410_v40 }
 0x15c   : > { %v419_v49 = vsel %vm418_vm1, %v410_v40, %v417_v47 }
 0x15d   : > { %v422_v50 = vsel %vm420_vm2, %v421_v48, %v419_v49 }
 0x15e   : > { %v424_v52 = vmul.f32 0.47942555, %v422_v50 }
 0x160   : > { %v425_v53 = vsub.f32 %v423_v51, %v424_v52 }
 0x162   : > { %v428_v55 = vsel %vm426_vm3, %v425_v53, %v580_v54 }
 0x163   : > { %v429_v56 = vsub.f32 %v428_v55, %v407_v37 }
 0x165   : > { %v430_v57 = vmul.f32 %v547_v33, %v429_v56 }
 0x167   : > { %v431_v58 = vadd.f32 %v430_v57, %v401_v34 }
 0x169   : > { %v432_v59 = vmul.f32 30.0, %v431_v58 }
 0x16b   : > { %433 = vst [vmem:[%s314_s5] sm:$0xff] %v432_v59 }
 0x16c PF: > { %s13_s18 = sadd.s32 1, %s706_s18   ;;  %s854_s12 = smov %s686_s13 }
 0x16d   : > { %p10_p12 = scmp.ge.s32.totalorder %s13_s18, 8   ;;  %s855_s13 = smov %s781_s25 }
 0x16e   : > { %s856_s14 = smov %s698_s16  ;;  %s857_s15 = smov %s702_s17 }
 0x16f   : > { %s858_s16 = smov %s861_s19  ;;  %s859_s17 = smov %s865_s20 }
 0x170   :  { %12 = sbr.rel (!%p10_p12) target bundleno = 4 (0x4), region = 111 }

// kernel: bert_efficientnet_forward.2
= control target key start
LH: loop header
LB: loop body
LE: loop exit
PB: predicated region body
PF: predicated region fallthrough
CT: control target
= control target key end

     0   :  { %s4788_s21 = smov 0   ;;  %s6154_s0 = inlined_call_operand.vmem [shape: bf16[2048,8], index: 0, kind: input, shape index: {}]   ;;  %s6155_s1 = inlined_call_operand.vmem [shape: bf16[8,128], index: 1, kind: input, shape index: {}]   ;;  %s6156_s2 = inlined_call_operand.vmem [shape: f32[1,128], index: 2, kind: input, shape index: {}]   ;;  %s6157_s3 = inlined_call_operand.vmem [shape: f32[8,8,32], index: 3, kind: input, shape index: {}]   ;;  %s6158_s4 = inlined_call_operand.vmem [shape: f32[8,8], index: 4, kind: input, shape index: {}]   ;;  %s6159_s5 = inlined_call_operand.vmem [shape: bf16[32,128], index: 5, kind: input, shape index: {}]   ;;  %s6160_s6 = inlined_call_operand.vmem [shape: f32[1,128], index: 6, kind: input, shape index: {}]   ;;  %s6161_s7 = inlined_call_operand.vmem [shape: bf16[3,128,128], index: 7, kind: input, shape index: {}]   ;;  %s6162_s8 = inlined_call_operand.vmem [shape: bf16[3,128,128], index: 8, kind: input, shape index: {}]   ;;  %s6163_s9 = inlined_call_operand.vmem [shape: f32[3,1,128], index: 9, kind: input, shape index: {}]   ;;  %s6164_s10 = inlined_call_operand.vmem [shape: bf16[3,128,128], index: 10, kind: input, shape index: {}]   ;;  %s6165_s11 = inlined_call_operand.vmem [shape: f32[3,1,128], index: 11, kind: input, shape index: {}]   ;;  %s6166_s12 = inlined_call_operand.vmem [shape: bf16[3,8,128], index: 12, kind: output, shape index: {}]  }
   0x1 LB: > { %6170 = sst [smem:[#allocation4_spill]] %s4720_s21  ;;  %s3752_s22 = sadd.s32 4294967295, %s4720_s21   ;;  %s4720_s21 = sphi %s4788_s21, %s22_s21  }
   0x2   : > { %p3756_p0 = scmp.ge.s32.totalorder %s4720_s21, 1  ;;  %p398_p1 = scmp.lt.s32.totalorder %s4720_s21, 4 }
   0x4   : > { %p399_p2 = pnand %p3756_p0, %p398_p1 }
   0x5   : > { %p455_p3 = scmp.lt.s32.totalorder (!%p399_p2), %s3752_s22, 2  ;;  %p3764_p4 = scmp.ne.s32.totalorder (!%p399_p2), %s3752_s22, 0 }
   0x6   : > { %402 = sbr.rel (%p399_p2) target bundleno = 1225 (0x4c9), region = 68 }
   0xb   : > { %s4796_s23 = scalar_select %p455_p3, %s3752_s22, 2 }
   0xc   : > { %484 = sbr.rel (%p3764_p4) target bundleno = 761 (0x2f9), region = 72 }
   0xd   : > { %s4512_s24 = sshll.u32 %s4796_s23, 6  ;;  %s475_s25 = scalar_lea.vmem %s6165_s11, %s4796_s23 }
   0xe   : > { %s4806_s30 = scalar_lea.vmem %s6161_s7, %s4512_s24  ;;  %s4811_s15 = scalar_lea.vmem %s6162_s8, %s4512_s24 }
   0xf   : > { %s4816_s18 = scalar_lea.vmem %s6164_s10, %s4512_s24  ;;  %s3763_s26 = sshll.u32 %s4796_s23, 2 }
  0x10   : > { %s4826_s28 = scalar_lea.vmem %s6166_s12, %s3763_s26 }
  0x11   : > { %v741_v0 = vld [vmem:[%s6155_s1] sm:$0xf]  ;;  %vm1771_vm0 = vcmask 1043456   ;;  %v4548_v3 = vld [vmem:[%s6154_s0 + $0x108] sm:$0xff]  ;;  %vm1386_vm1 = vcmask 64512   ;;  %v4577_v4 = vld [vmem:[%s6154_s0 + $0x1f0] sm:$0xff] }
  0x12   : > { %v1773_v1 = vsel %vm1771_vm0, %v741_v0, 0  ;;  %v4515_v2 = vld [vmem:[%s6154_s0] sm:$0xff]  ;;  %v4610_v5 = vld [vmem:[%s6154_s0 + $0x2f8] sm:$0xff]  ;;  %v4516_v6 = vld [vmem:[%s6154_s0 + $0x8] sm:$0xff]  ;;  %vm3105_vm2 = vcmask 261120  }
  0x13   : > { %1782 = vmatpush.bf16.msra.mxu0 %v1773_v1  ;;  %4669 = vmatpush.bf16.msra.mxu1 %v1773_v1  ;;  %v4549_v7 = vld [vmem:[%s6154_s0 + $0x110] sm:$0xff]  ;;  %v4578_v8 = vld [vmem:[%s6154_s0 + $0x1f8] sm:$0xff]  ;;  %v4611_v9 = vld [vmem:[%s6154_s0 + $0x300] sm:$0xff] }
  0x14   : > { %4670 = vmatpush.bf16.msra.mxu2 %v1773_v1  ;;  %4671 = vmatpush.bf16.msra.mxu3 %v1773_v1  ;;  %v4517_v10 = vld [vmem:[%s6154_s0 + $0x10] sm:$0xff]  ;;  %v4550_v11 = vld [vmem:[%s6154_s0 + $0x118] sm:$0xff]  ;;  %v4579_v12 = vld [vmem:[%s6154_s0 + $0x200] sm:$0xff] }
  0x15   : > { %v4612_v13 = vld [vmem:[%s6154_s0 + $0x308] sm:$0xff]  ;;  %v4518_v14 = vld [vmem:[%s6154_s0 + $0x18] sm:$0xff]  ;;  %v4551_v15 = vld [vmem:[%s6154_s0 + $0x120] sm:$0xff] }
  0x16   : > { %4277 = vmatmul.msk.bf16.vlgmr.msra.gmra.mxu0 %vm1386_vm1, %v4515_v2  ;;  %4310 = vmatmul.msk.bf16.vlgmr.msra.gmra.mxu1 %vm1386_vm1, %v4548_v3  ;;  %v4580_v16 = vld [vmem:[%s6154_s0 + $0x208] sm:$0xff]  ;;  %v4613_v17 = vld [vmem:[%s6154_s0 + $0x310] sm:$0xff]  ;;  %v4519_v18 = vld [vmem:[%s6154_s0 + $0x20] sm:$0xff] }
  0x17   : > { %4339 = vmatmul.msk.bf16.vlgmr.msra.gmra.mxu2 %vm1386_vm1, %v4577_v4  ;;  %4372 = vmatmul.msk.bf16.vlgmr.msra.gmra.mxu3 %vm1386_vm1, %v4610_v5  ;;  %v4552_v19 = vld [vmem:[%s6154_s0 + $0x128] sm:$0xff]  ;;  %v4581_v20 = vld [vmem:[%s6154_s0 + $0x210] sm:$0xff]  ;;  %v4614_v21 = vld [vmem:[%s6154_s0 + $0x318] sm:$0xff] }
  0x18   : > { %v4520_v22 = vld [vmem:[%s6154_s0 + $0x28] sm:$0xff]  ;;  %v4553_v23 = vld [vmem:[%s6154_s0 + $0x130] sm:$0xff]  ;;  %v4582_v24 = vld [vmem:[%s6154_s0 + $0x218] sm:$0xff] }
  0x19   : > { %v4615_v25 = vld [vmem:[%s6154_s0 + $0x320] sm:$0xff]  ;;  %v4521_v26 = vld [vmem:[%s6154_s0 + $0x30] sm:$0xff]  ;;  %v4554_v27 = vld [vmem:[%s6154_s0 + $0x138] sm:$0xff] }
  0x1a   : > { %v4583_v28 = vld [vmem:[%s6154_s0 + $0x220] sm:$0xff]  ;;  %v4616_v29 = vld [vmem:[%s6154_s0 + $0x328] sm:$0xff]  ;;  %v4522_v31 = vld [vmem:[%s6154_s0 + $0x38] sm:$0xff] }
  0x1b   : > { %v4644_v30 = vld [vmem:[%s6159_s5 + $0x8] sm:$0xff]  ;;  %v4555_v32 = vld [vmem:[%s6154_s0 + $0x140] sm:$0xff]  ;;  %v4617_v34 = vld [vmem:[%s6154_s0 + $0x330] sm:$0xff] }
  0x1c   : > { %3370 = vmatpush.bf16.msrb.mxu1 %v4644_v30  ;;  %v4584_v33 = vld [vmem:[%s6154_s0 + $0x228] sm:$0xff]  ;;  %v4523_v35 = vld [vmem:[%s6154_s0 + $0x40] sm:$0xff]  ;;  %v4585_v39 = vld [vmem:[%s6154_s0 + $0x230] sm:$0xff] }
  0x1d   : > { %v4556_v36 = vld [vmem:[%s6154_s0 + $0x148] sm:$0xff]  ;;  %v4618_v40 = vld [vmem:[%s6154_s0 + $0x338] sm:$0xff]  ;;  %v4979_v41 = vld [vmem:[%s6156_s2] ss:$0 sm:$0xff] }
  0x1e   : > { %v4524_v53 = vld [vmem:[%s6154_s0 + $0x48] sm:$0xff]  ;;  %v4557_v54 = vld [vmem:[%s6154_s0 + $0x150] sm:$0xff]  ;;  %v4586_v57 = vld [vmem:[%s6154_s0 + $0x238] sm:$0xff] }
  0x1f   : > { %v4619_v58 = vld [vmem:[%s6154_s0 + $0x340] sm:$0xff] }
  0x26   : > { %4278 = vmatmul.msk.bf16.gmra.mxu0 %vm1386_vm1, %v4516_v6  ;;  %4311 = vmatmul.msk.bf16.gmra.mxu1 %vm1386_vm1, %v4549_v7 }
  0x27   : > { %4340 = vmatmul.msk.bf16.gmra.mxu2 %vm1386_vm1, %v4578_v8  ;;  %4373 = vmatmul.msk.bf16.gmra.mxu3 %vm1386_vm1, %v4611_v9  ;;  %v4525_v8 = vld [vmem:[%s6154_s0 + $0x50] sm:$0xff]  ;;  %v4558_v9 = vld [vmem:[%s6154_s0 + $0x158] sm:$0xff] }
  0x36   : > { %4279 = vmatmul.msk.bf16.gmra.mxu0 %vm1386_vm1, %v4517_v10  ;;  %4312 = vmatmul.msk.bf16.gmra.mxu1 %vm1386_vm1, %v4550_v11 }
  0x37   : > { %4341 = vmatmul.msk.bf16.gmra.mxu2 %vm1386_vm1, %v4579_v12  ;;  %4374 = vmatmul.msk.bf16.gmra.mxu3 %vm1386_vm1, %v4612_v13 }
  0x46   : > { %4280 = vmatmul.msk.bf16.gmra.mxu0 %vm1386_vm1, %v4518_v14  ;;  %4313 = vmatmul.msk.bf16.gmra.mxu1 %vm1386_vm1, %v4551_v15  ;;  %v4587_v14 = vld [vmem:[%s6154_s0 + $0x240] sm:$0xff]  ;;  %v4620_v15 = vld [vmem:[%s6154_s0 + $0x348] sm:$0xff] }
  0x47   : > { %4342 = vmatmul.msk.bf16.gmra.mxu2 %vm1386_vm1, %v4580_v16  ;;  %4375 = vmatmul.msk.bf16.gmra.mxu3 %vm1386_vm1, %v4613_v17 }
  0x56   : > { %4281 = vmatmul.msk.bf16.gmra.mxu0 %vm1386_vm1, %v4519_v18  ;;  %4314 = vmatmul.msk.bf16.gmra.mxu1 %vm1386_vm1, %v4552_v19 }
  0x57   : > { %4343 = vmatmul.msk.bf16.gmra.mxu2 %vm1386_vm1, %v4581_v20  ;;  %4376 = vmatmul.msk.bf16.gmra.mxu3 %vm1386_vm1, %v4614_v21 }
  0x66   : > { %4282 = vmatmul.msk.bf16.gmra.mxu0 %vm1386_vm1, %v4520_v22  ;;  %4315 = vmatmul.msk.bf16.gmra.mxu1 %vm1386_vm1, %v4553_v23 }
  0x67   : > { %4344 = vmatmul.msk.bf16.gmra.mxu2 %vm1386_vm1, %v4582_v24  ;;  %4377 = vmatmul.msk.bf16.gmra.mxu3 %vm1386_vm1, %v4615_v25 }
  0x76   : > { %4283 = vmatmul.msk.bf16.gmra.mxu0 %vm1386_vm1, %v4521_v26  ;;  %4316 = vmatmul.msk.bf16.gmra.mxu1 %vm1386_vm1, %v4554_v27 }
  0x77   : > { %4345 = vmatmul.msk.bf16.gmra.mxu2 %vm1386_vm1, %v4583_v28  ;;  %4378 = vmatmul.msk.bf16.gmra.mxu3 %vm1386_vm1, %v4616_v29 }
  0x86   : > { %4284 = vmatmul.msk.bf16.gmra.mxu0 %vm1386_vm1, %v4522_v31  ;;  %4317 = vmatmul.msk.bf16.gmra.mxu1 %vm1386_vm1, %v4555_v32 }
  0x87   : > { %4346 = vmatmul.msk.bf16.gmra.mxu2 %vm1386_vm1, %v4584_v33  ;;  %4379 = vmatmul.msk.bf16.gmra.mxu3 %vm1386_vm1, %v4617_v34  ;;  %v4526_v34 = vld [vmem:[%s6154_s0 + $0x58] sm:$0xff] }
  0x93   : > { %v1784_v37 = vpop.f32.mrf.mxu0  ;;  %v4968_v38 = vpop.f32.mrf.mxu1 }
  0x94   : > { %v1785_v42 = vadd.f32 %v4979_v41, %v1784_v37 }
  0x96   : > { %4285 = vmatmul.msk.bf16.gmra.mxu0 %vm1386_vm1, %v4523_v35  ;;  %4318 = vmatmul.msk.bf16.gmra.mxu1 %vm1386_vm1, %v4556_v36  ;;  %v2424_v48 = vmax.f32 %v1785_v42, 0.0  ;;  %v4559_v35 = vld [vmem:[%s6154_s0 + $0x160] sm:$0xff] }
  0x97   : > { %4347 = vmatmul.msk.bf16.gmra.mxu2 %vm1386_vm1, %v4585_v39  ;;  %4380 = vmatmul.msk.bf16.gmra.mxu3 %vm1386_vm1, %v4618_v40 }
  0x9a   : > { %v4986_v43 = vpop.f32.mrf.mxu2  ;;  %v4988_v44 = vpop.f32.mrf.mxu3 }
  0x9b   : > { %v1786_v45 = vpop.f32.mrf.mxu0  ;;  %v4990_v46 = vpop.f32.mrf.mxu1 }
  0x9c   : > { %v1787_v47 = vadd.f32 %v4979_v41, %v1786_v45  ;;  %v4588_v45 = vld [vmem:[%s6154_s0 + $0x248] sm:$0xff] }
  0x9e   : > { %v2425_v49 = vmax.f32 %v1787_v47, 0.0  ;;  %v4621_v47 = vld [vmem:[%s6154_s0 + $0x350] sm:$0xff] }
  0xa0   : > { %v2680_v50 = vadd.f32 %v2425_v49, %v2424_v48 }
  0xa2   : > { %v4993_v51 = vpop.f32.mrf.mxu2  ;;  %v4995_v52 = vpop.f32.mrf.mxu3 }
  0xa3   : > { %v1789_v55 = vpop.f32.mrf.mxu0  ;;  %v5003_v56 = vpop.f32.mrf.mxu1 }
  0xa4   : > { %v1790_v59 = vadd.f32 %v4979_v41, %v1789_v55 }
  0xa6   : > { %v2426_v60 = vmax.f32 %v1790_v59, 0.0  ;;  %4286 = vmatmul.msk.bf16.gmra.mxu0 %vm1386_vm1, %v4524_v53  ;;  %4319 = vmatmul.msk.bf16.gmra.mxu1 %vm1386_vm1, %v4557_v54 }
  0xa7   : > { %4348 = vmatmul.msk.bf16.gmra.mxu2 %vm1386_vm1, %v4586_v57  ;;  %4381 = vmatmul.msk.bf16.gmra.mxu3 %vm1386_vm1, %v4619_v58 }
  0xa8   : > { %v2681_v61 = vadd.f32 %v2680_v50, %v2426_v60 }
  0xaa   : > { %v5016_v62 = vpop.f32.mrf.mxu2  ;;  %v2264_v63 = vpop.f32.mrf.mxu3 }
  0xab   : > { %v1791_v0 = vpop.f32.mrf.mxu0  ;;  %v5018_v1 = vpop.f32.mrf.mxu1  ;;  %v2265_v4 = vadd.f32 %v4979_v41, %v2264_v63 }
  0xac   : > { %v1792_v2 = vadd.f32 %v4979_v41, %v1791_v0 }
  0xad   : > { %v2616_v10 = vmax.f32 %v2265_v4, 0.0 }
  0xae   : > { %v2427_v3 = vmax.f32 %v1792_v2, 0.0 }
  0xb0   : > { %v2682_v5 = vadd.f32 %v2681_v61, %v2427_v3 }
  0xb2   : > { %v5022_v6 = vpop.f32.mrf.mxu2  ;;  %v2266_v7 = vpop.f32.mrf.mxu3 }
  0xb3   : > { %v2267_v11 = vadd.f32 %v4979_v41, %v2266_v7  ;;  %v1794_v12 = vpop.f32.mrf.mxu0  ;;  %v5031_v13 = vpop.f32.mrf.mxu1 }
  0xb4   : > { %v1795_v16 = vadd.f32 %v4979_v41, %v1794_v12  ;;  %v4527_v12 = vld [vmem:[%s6154_s0 + $0x60] sm:$0xff] }
  0xb5   : > { %v2617_v17 = vmax.f32 %v2267_v11, 0.0 }
  0xb6   : > { %v2428_v18 = vmax.f32 %v1795_v16, 0.0  ;;  %4287 = vmatmul.msk.bf16.gmra.mxu0 %vm1386_vm1, %v4525_v8  ;;  %4320 = vmatmul.msk.bf16.gmra.mxu1 %vm1386_vm1, %v4558_v9 }
  0xb7   : > { %v2902_v19 = vadd.f32 %v2617_v17, %v2616_v10  ;;  %4349 = vmatmul.msk.bf16.gmra.mxu2 %vm1386_vm1, %v4587_v14  ;;  %4382 = vmatmul.msk.bf16.gmra.mxu3 %vm1386_vm1, %v4620_v15  ;;  %v4560_v14 = vld [vmem:[%s6154_s0 + $0x168] sm:$0xff] }
  0xb8   : > { %v2683_v20 = vadd.f32 %v2682_v5, %v2428_v18 }
  0xba   : > { %v2104_v21 = vpop.f32.mrf.mxu2  ;;  %v2269_v22 = vpop.f32.mrf.mxu3 }
  0xbb   : > { %v2270_v23 = vadd.f32 %v4979_v41, %v2269_v22  ;;  %v1796_v24 = vpop.f32.mrf.mxu0  ;;  %v5045_v25 = vpop.f32.mrf.mxu1  ;;  %v2105_v29 = vadd.f32 %v4979_v41, %v2104_v21 }
  0xbc   : > { %v1797_v26 = vadd.f32 %v4979_v41, %v1796_v24 }
  0xbd   : > { %v2618_v27 = vmax.f32 %v2270_v23, 0.0  ;;  %v2552_v36 = vmax.f32 %v2105_v29, 0.0 }
  0xbe   : > { %v2429_v28 = vmax.f32 %v1797_v26, 0.0 }
  0xbf   : > { %v2903_v30 = vadd.f32 %v2902_v19, %v2618_v27  ;;  %v4589_v19 = vld [vmem:[%s6154_s0 + $0x250] sm:$0xff] }
  0xc0   : > { %v2684_v31 = vadd.f32 %v2683_v20, %v2429_v28  ;;  %v4622_v20 = vld [vmem:[%s6154_s0 + $0x358] sm:$0xff] }
  0xc2   : > { %v2106_v32 = vpop.f32.mrf.mxu2  ;;  %v2271_v33 = vpop.f32.mrf.mxu3 }
  0xc3   : > { %v2107_v37 = vadd.f32 %v4979_v41, %v2106_v32  ;;  %v2272_v39 = vadd.f32 %v4979_v41, %v2271_v33  ;;  %v1799_v40 = vpop.f32.mrf.mxu0  ;;  %v5057_v42 = vpop.f32.mrf.mxu1 }
  0xc4   : > { %v1800_v48 = vadd.f32 %v4979_v41, %v1799_v40 }
  0xc5   : > { %v2553_v49 = vmax.f32 %v2107_v37, 0.0  ;;  %v2619_v50 = vmax.f32 %v2272_v39, 0.0 }
  0xc6   : > { %v2430_v53 = vmax.f32 %v1800_v48, 0.0  ;;  %4288 = vmatmul.msk.bf16.gmra.mxu0 %vm1386_vm1, %v4526_v34  ;;  %4321 = vmatmul.msk.bf16.gmra.mxu1 %vm1386_vm1, %v4559_v35 }
  0xc7   : > { %v2828_v54 = vadd.f32 %v2553_v49, %v2552_v36  ;;  %v2904_v55 = vadd.f32 %v2903_v30, %v2619_v50  ;;  %4350 = vmatmul.msk.bf16.gmra.mxu2 %vm1386_vm1, %v4588_v45  ;;  %4383 = vmatmul.msk.bf16.gmra.mxu3 %vm1386_vm1, %v4621_v47  ;;  %v4528_v50 = vld [vmem:[%s6154_s0 + $0x68] sm:$0xff] }
  0xc8   : > { %v2685_v57 = vadd.f32 %v2684_v31, %v2430_v53  ;;  %v4561_v53 = vld [vmem:[%s6154_s0 + $0x170] sm:$0xff] }
  0xca   : > { %v2109_v58 = vpop.f32.mrf.mxu2  ;;  %v2274_v59 = vpop.f32.mrf.mxu3 }
  0xcb   : > { %v2110_v60 = vadd.f32 %v4979_v41, %v2109_v58  ;;  %v2275_v61 = vadd.f32 %v4979_v41, %v2274_v59  ;;  %v1801_v63 = vpop.f32.mrf.mxu0  ;;  %v5072_v0 = vpop.f32.mrf.mxu1  ;;  %v4590_v59 = vld [vmem:[%s6154_s0 + $0x258] sm:$0xff] }
  0xcc   : > { %v1802_v2 = vadd.f32 %v4979_v41, %v1801_v63 }
  0xcd   : > { %v2554_v3 = vmax.f32 %v2110_v60, 0.0  ;;  %v2620_v4 = vmax.f32 %v2275_v61, 0.0  ;;  %v4623_v60 = vld [vmem:[%s6154_s0 + $0x360] sm:$0xff] }
  0xce   : > { %v2431_v5 = vmax.f32 %v1802_v2, 0.0 }
  0xcf   : > { %v2829_v7 = vadd.f32 %v2828_v54, %v2554_v3  ;;  %v2905_v8 = vadd.f32 %v2904_v55, %v2620_v4 }
  0xd0   : > { %v2686_v9 = vadd.f32 %v2685_v57, %v2431_v5 }
  0xd2   : > { %v2111_v10 = vpop.f32.mrf.mxu2  ;;  %v2276_v11 = vpop.f32.mrf.mxu3 }
  0xd3   : > { %v2112_v15 = vadd.f32 %v4979_v41, %v2111_v10  ;;  %v2277_v16 = vadd.f32 %v4979_v41, %v2276_v11  ;;  %v1804_v17 = vpop.f32.mrf.mxu0  ;;  %v5083_v18 = vpop.f32.mrf.mxu1 }
  0xd4   : > { %v1805_v21 = vadd.f32 %v4979_v41, %v1804_v17 }
  0xd5   : > { %v2555_v22 = vmax.f32 %v2112_v15, 0.0  ;;  %v2621_v23 = vmax.f32 %v2277_v16, 0.0 }
  0xd6   : > { %v2432_v24 = vmax.f32 %v1805_v21, 0.0  ;;  %4289 = vmatmul.msk.bf16.gmra.mxu0 %vm1386_vm1, %v4527_v12  ;;  %4322 = vmatmul.msk.bf16.gmra.mxu1 %vm1386_vm1, %v4560_v14 }
  0xd7   : > { %v2830_v26 = vadd.f32 %v2829_v7, %v2555_v22  ;;  %v2906_v27 = vadd.f32 %v2905_v8, %v2621_v23  ;;  %4351 = vmatmul.msk.bf16.gmra.mxu2 %vm1386_vm1, %v4589_v19  ;;  %4384 = vmatmul.msk.bf16.gmra.mxu3 %vm1386_vm1, %v4622_v20 }
  0xd8   : > { %v2687_v28 = vadd.f32 %v2686_v9, %v2432_v24 }
  0xda   : > { %v2114_v29 = vpop.f32.mrf.mxu2  ;;  %v2279_v30 = vpop.f32.mrf.mxu3 }
  0xdb   : > { %v2115_v31 = vadd.f32 %v4979_v41, %v2114_v29  ;;  %v2280_v32 = vadd.f32 %v4979_v41, %v2279_v30  ;;  %v1806_v33 = vpop.f32.mrf.mxu0  ;;  %v5098_v34 = vpop.f32.mrf.mxu1 }
  0xdc   : > { %v1807_v35 = vadd.f32 %v4979_v41, %v1806_v33  ;;  %v4624_v33 = vld [vmem:[%s6154_s0 + $0x368] sm:$0xff] }
  0xdd   : > { %v2556_v36 = vmax.f32 %v2115_v31, 0.0  ;;  %v2622_v37 = vmax.f32 %v2280_v32, 0.0  ;;  %v4591_v32 = vld [vmem:[%s6154_s0 + $0x260] sm:$0xff] }
  0xde   : > { %v2433_v39 = vmax.f32 %v1807_v35, 0.0 }
  0xdf   : > { %v2831_v40 = vadd.f32 %v2830_v26, %v2556_v36  ;;  %v2907_v45 = vadd.f32 %v2906_v27, %v2622_v37  ;;  %v4529_v26 = vld [vmem:[%s6154_s0 + $0x70] sm:$0xff]  ;;  %v4562_v27 = vld [vmem:[%s6154_s0 + $0x178] sm:$0xff] }
  0xe0   : > { %v2688_v47 = vadd.f32 %v2687_v28, %v2433_v39 }
  0xe2   : > { %v2116_v48 = vpop.f32.mrf.mxu2  ;;  %v2281_v49 = vpop.f32.mrf.mxu3 }
  0xe3   : > { %v2117_v54 = vadd.f32 %v4979_v41, %v2116_v48  ;;  %v2282_v55 = vadd.f32 %v4979_v41, %v2281_v49  ;;  %v1809_v57 = vpop.f32.mrf.mxu0  ;;  %v5109_v58 = vpop.f32.mrf.mxu1 }
  0xe4   : > { %v1810_v61 = vadd.f32 %v4979_v41, %v1809_v57 }
  0xe5   : > { %v2557_v63 = vmax.f32 %v2117_v54, 0.0  ;;  %v2623_v2 = vmax.f32 %v2282_v55, 0.0 }
  0xe6   : > { %v2434_v3 = vmax.f32 %v1810_v61, 0.0  ;;  %4290 = vmatmul.msk.bf16.gmra.mxu0 %vm1386_vm1, %v4528_v50  ;;  %4323 = vmatmul.msk.bf16.gmra.mxu1 %vm1386_vm1, %v4561_v53 }
  0xe7   : > { %v2832_v4 = vadd.f32 %v2831_v40, %v2557_v63  ;;  %v2908_v5 = vadd.f32 %v2907_v45, %v2623_v2  ;;  %4352 = vmatmul.msk.bf16.gmra.mxu2 %vm1386_vm1, %v4590_v59  ;;  %4385 = vmatmul.msk.bf16.gmra.mxu3 %vm1386_vm1, %v4623_v60 }
  0xe8   : > { %v2689_v7 = vadd.f32 %v2688_v47, %v2434_v3 }
  0xea   : > { %v2119_v8 = vpop.f32.mrf.mxu2  ;;  %v2284_v9 = vpop.f32.mrf.mxu3 }
  0xeb   : > { %v2120_v10 = vadd.f32 %v4979_v41, %v2119_v8  ;;  %v2285_v11 = vadd.f32 %v4979_v41, %v2284_v9  ;;  %v1811_v12 = vpop.f32.mrf.mxu0  ;;  %v5124_v14 = vpop.f32.mrf.mxu1  ;;  %v4563_v8 = vld [vmem:[%s6154_s0 + $0x180] sm:$0xff] }
  0xec   : > { %6171 = vst [vmem:[#allocation5_spill] sm:$0xff] %v5124_v14  ;;  %v1812_v15 = vadd.f32 %v4979_v41, %v1811_v12 }
  0xed   : > { %v2558_v16 = vmax.f32 %v2120_v10, 0.0  ;;  %v2624_v17 = vmax.f32 %v2285_v11, 0.0 }
  0xee   : > { %v2435_v19 = vmax.f32 %v1812_v15, 0.0  ;;  %v4592_v15 = vld [vmem:[%s6154_s0 + $0x268] sm:$0xff] }
  0xef   : > { %v2833_v20 = vadd.f32 %v2832_v4, %v2558_v16  ;;  %v2909_v21 = vadd.f32 %v2908_v5, %v2624_v17  ;;  %v4625_v16 = vld [vmem:[%s6154_s0 + $0x370] sm:$0xff] }
  0xf0   : > { %v2690_v22 = vadd.f32 %v2689_v7, %v2435_v19  ;;  %v4530_v7 = vld [vmem:[%s6154_s0 + $0x78] sm:$0xff] }
  0xf2   : > { %v2121_v23 = vpop.f32.mrf.mxu2  ;;  %v2286_v24 = vpop.f32.mrf.mxu3 }
  0xf3   : > { %v2122_v28 = vadd.f32 %v4979_v41, %v2121_v23  ;;  %v2287_v29 = vadd.f32 %v4979_v41, %v2286_v24  ;;  %v1814_v30 = vpop.f32.mrf.mxu0  ;;  %v5135_v31 = vpop.f32.mrf.mxu1 }
  0xf4   : > { %6172 = vst [vmem:[#allocation6_spill] sm:$0xff] %v5135_v31  ;;  %v1815_v35 = vadd.f32 %v4979_v41, %v1814_v30 }
  0xf5   : > { %v2559_v36 = vmax.f32 %v2122_v28, 0.0  ;;  %v2625_v37 = vmax.f32 %v2287_v29, 0.0 }
  0xf6   : > { %v2436_v39 = vmax.f32 %v1815_v35, 0.0  ;;  %4291 = vmatmul.msk.bf16.gmra.mxu0 %vm1386_vm1, %v4529_v26  ;;  %4324 = vmatmul.msk.bf16.gmra.mxu1 %vm1386_vm1, %v4562_v27 }
  0xf7   : > { %v2834_v40 = vadd.f32 %v2833_v20, %v2559_v36  ;;  %v2910_v45 = vadd.f32 %v2909_v21, %v2625_v37  ;;  %4353 = vmatmul.msk.bf16.gmra.mxu2 %vm1386_vm1, %v4591_v32  ;;  %4386 = vmatmul.msk.bf16.gmra.mxu3 %vm1386_vm1, %v4624_v33 }
  0xf8   : > { %v2691_v47 = vadd.f32 %v2690_v22, %v2436_v39 }
  0xfa   : > { %v2124_v48 = vpop.f32.mrf.mxu2  ;;  %v2289_v49 = vpop.f32.mrf.mxu3 }
  0xfb   : > { %v2125_v50 = vadd.f32 %v4979_v41, %v2124_v48  ;;  %v2290_v53 = vadd.f32 %v4979_v41, %v2289_v49  ;;  %v1816_v54 = vpop.f32.mrf.mxu0  ;;  %v5150_v55 = vpop.f32.mrf.mxu1  ;;  %v4531_v49 = vld [vmem:[%s6154_s0 + $0x80] sm:$0xff] }
  0xfc   : > { %6173 = vst [vmem:[#allocation7_spill] sm:$0xff] %v5150_v55  ;;  %v1817_v57 = vadd.f32 %v4979_v41, %v1816_v54 }
  0xfd   : > { %v2560_v59 = vmax.f32 %v2125_v50, 0.0  ;;  %v2626_v60 = vmax.f32 %v2290_v53, 0.0  ;;  %v4564_v50 = vld [vmem:[%s6154_s0 + $0x188] sm:$0xff] }
  0xfe   : > { %v2437_v61 = vmax.f32 %v1817_v57, 0.0 }
  0xff   : > { %v2835_v63 = vadd.f32 %v2834_v40, %v2560_v59  ;;  %v2911_v2 = vadd.f32 %v2910_v45, %v2626_v60  ;;  %v4593_v60 = vld [vmem:[%s6154_s0 + $0x270] sm:$0xff] }
 0x100   : > { %v2692_v3 = vadd.f32 %v2691_v47, %v2437_v61  ;;  %v4626_v61 = vld [vmem:[%s6154_s0 + $0x378] sm:$0xff] }
 0x102   : > { %v2126_v4 = vpop.f32.mrf.mxu2  ;;  %v2291_v5 = vpop.f32.mrf.mxu3 }
 0x103   : > { %v2127_v9 = vadd.f32 %v4979_v41, %v2126_v4  ;;  %v2292_v10 = vadd.f32 %v4979_v41, %v2291_v5  ;;  %v1819_v11 = vpop.f32.mrf.mxu0  ;;  %v5161_v12 = vpop.f32.mrf.mxu1 }
 0x104   : > { %6174 = vst [vmem:[#allocation8_spill] sm:$0xff] %v5161_v12  ;;  %v1820_v17 = vadd.f32 %v4979_v41, %v1819_v11 }
 0x105   : > { %v2561_v19 = vmax.f32 %v2127_v9, 0.0  ;;  %v2627_v20 = vmax.f32 %v2292_v10, 0.0 }
 0x106   : > { %v2438_v21 = vmax.f32 %v1820_v17, 0.0  ;;  %4292 = vmatmul.msk.bf16.gmra.mxu0 %vm1386_vm1, %v4530_v7  ;;  %4325 = vmatmul.msk.bf16.gmra.mxu1 %vm1386_vm1, %v4563_v8 }
 0x107   : > { %v2836_v22 = vadd.f32 %v2835_v63, %v2561_v19  ;;  %v2912_v23 = vadd.f32 %v2911_v2, %v2627_v20  ;;  %4354 = vmatmul.msk.bf16.gmra.mxu2 %vm1386_vm1, %v4592_v15  ;;  %4387 = vmatmul.msk.bf16.gmra.mxu3 %vm1386_vm1, %v4625_v16 }
 0x108   : > { %v2693_v24 = vadd.f32 %v2692_v3, %v2438_v21 }
 0x10a   : > { %v2129_v26 = vpop.f32.mrf.mxu2  ;;  %v2294_v27 = vpop.f32.mrf.mxu3 }
 0x10b   : > { %v2130_v28 = vadd.f32 %v4979_v41, %v2129_v26  ;;  %v2295_v29 = vadd.f32 %v4979_v41, %v2294_v27  ;;  %v1821_v30 = vpop.f32.mrf.mxu0  ;;  %v5176_v32 = vpop.f32.mrf.mxu1 }
 0x10c   : > { %6175 = vst [vmem:[#allocation9_spill] sm:$0xff] %v5176_v32  ;;  %v1822_v33 = vadd.f32 %v4979_v41, %v1821_v30  ;;  %v4565_v30 = vld [vmem:[%s6154_s0 + $0x190] sm:$0xff] }
 0x10d   : > { %v2562_v35 = vmax.f32 %v2130_v28, 0.0  ;;  %v2628_v36 = vmax.f32 %v2295_v29, 0.0  ;;  %v4532_v29 = vld [vmem:[%s6154_s0 + $0x88] sm:$0xff] }
 0x10e   : > { %v2439_v37 = vmax.f32 %v1822_v33, 0.0 }
 0x10f   : > { %v2837_v39 = vadd.f32 %v2836_v22, %v2562_v35  ;;  %v2913_v40 = vadd.f32 %v2912_v23, %v2628_v36 }
 0x110   : > { %v2694_v45 = vadd.f32 %v2693_v24, %v2439_v37 }
 0x112   : > { %v2131_v47 = vpop.f32.mrf.mxu2  ;;  %v2296_v48 = vpop.f32.mrf.mxu3 }
 0x113   : > { %v2132_v53 = vadd.f32 %v4979_v41, %v2131_v47  ;;  %v2297_v54 = vadd.f32 %v4979_v41, %v2296_v48  ;;  %v1824_v57 = vpop.f32.mrf.mxu0  ;;  %v5187_v59 = vpop.f32.mrf.mxu1 }
 0x114   : > { %6176 = vst [vmem:[#allocation10_spill] sm:$0xff] %v5187_v59  ;;  %v1825_v63 = vadd.f32 %v4979_v41, %v1824_v57 }
 0x115   : > { %v2563_v2 = vmax.f32 %v2132_v53, 0.0  ;;  %v2629_v3 = vmax.f32 %v2297_v54, 0.0 }
 0x116   : > { %v2440_v4 = vmax.f32 %v1825_v63, 0.0  ;;  %4293 = vmatmul.msk.bf16.gmra.mxu0 %vm1386_vm1, %v4531_v49  ;;  %4326 = vmatmul.msk.bf16.gmra.mxu1 %vm1386_vm1, %v4564_v50 }
 0x117   : > { %v2838_v5 = vadd.f32 %v2837_v39, %v2563_v2  ;;  %v2914_v7 = vadd.f32 %v2913_v40, %v2629_v3  ;;  %4355 = vmatmul.msk.bf16.gmra.mxu2 %vm1386_vm1, %v4593_v60  ;;  %4388 = vmatmul.msk.bf16.gmra.mxu3 %vm1386_vm1, %v4626_v61  ;;  %v4594_v39 = vld [vmem:[%s6154_s0 + $0x278] sm:$0xff]  ;;  %v4627_v40 = vld [vmem:[%s6154_s0 + $0x380] sm:$0xff] }
 0x118   : > { %v2695_v8 = vadd.f32 %v2694_v45, %v2440_v4 }
 0x11a   : > { %v2134_v9 = vpop.f32.mrf.mxu2  ;;  %v2299_v10 = vpop.f32.mrf.mxu3 }
 0x11b   : > { %v2135_v11 = vadd.f32 %v4979_v41, %v2134_v9  ;;  %v2300_v15 = vadd.f32 %v4979_v41, %v2299_v10  ;;  %v1826_v16 = vpop.f32.mrf.mxu0  ;;  %v5202_v17 = vpop.f32.mrf.mxu1 }
 0x11c   : > { %6177 = vst [vmem:[#allocation11_spill] sm:$0xff] %v5202_v17  ;;  %v1827_v19 = vadd.f32 %v4979_v41, %v1826_v16 }
 0x11d   : > { %v2564_v20 = vmax.f32 %v2135_v11, 0.0  ;;  %v2630_v21 = vmax.f32 %v2300_v15, 0.0 }
 0x11e   : > { %v2441_v22 = vmax.f32 %v1827_v19, 0.0  ;;  %v4533_v19 = vld [vmem:[%s6154_s0 + $0x90] sm:$0xff] }
 0x11f   : > { %v2839_v23 = vadd.f32 %v2838_v5, %v2564_v20  ;;  %v2915_v24 = vadd.f32 %v2914_v7, %v2630_v21  ;;  %v4566_v20 = vld [vmem:[%s6154_s0 + $0x198] sm:$0xff] }
 0x120   : > { %v2696_v26 = vadd.f32 %v2695_v8, %v2441_v22 }
 0x122   : > { %v2136_v27 = vpop.f32.mrf.mxu2  ;;  %v2301_v28 = vpop.f32.mrf.mxu3 }
 0x123   : > { %v2137_v33 = vadd.f32 %v4979_v41, %v2136_v27  ;;  %v2302_v35 = vadd.f32 %v4979_v41, %v2301_v28  ;;  %v1829_v36 = vpop.f32.mrf.mxu0  ;;  %v5213_v37 = vpop.f32.mrf.mxu1  ;;  %v4628_v27 = vld [vmem:[%s6154_s0 + $0x388] sm:$0xff] }
 0x124   : > { %6178 = vst [vmem:[#allocation12_spill] sm:$0xff] %v5213_v37  ;;  %v1830_v45 = vadd.f32 %v4979_v41, %v1829_v36 }
 0x125   : > { %v2565_v47 = vmax.f32 %v2137_v33, 0.0  ;;  %v2631_v48 = vmax.f32 %v2302_v35, 0.0 }
 0x126   : > { %v2442_v49 = vmax.f32 %v1830_v45, 0.0  ;;  %4294 = vmatmul.msk.bf16.gmra.mxu0 %vm1386_vm1, %v4532_v29  ;;  %4327 = vmatmul.msk.bf16.gmra.mxu1 %vm1386_vm1, %v4565_v30 }
 0x127   : > { %v2840_v50 = vadd.f32 %v2839_v23, %v2565_v47  ;;  %v2916_v53 = vadd.f32 %v2915_v24, %v2631_v48  ;;  %4356 = vmatmul.msk.bf16.gmra.mxu2 %vm1386_vm1, %v4594_v39  ;;  %4389 = vmatmul.msk.bf16.gmra.mxu3 %vm1386_vm1, %v4627_v40 }
 0x128   : > { %v2697_v54 = vadd.f32 %v2696_v26, %v2442_v49  ;;  %v4595_v26 = vld [vmem:[%s6154_s0 + $0x280] sm:$0xff] }
 0x12a   : > { %v2139_v57 = vpop.f32.mrf.mxu2  ;;  %v2304_v60 = vpop.f32.mrf.mxu3 }
 0x12b   : > { %v2140_v61 = vadd.f32 %v4979_v41, %v2139_v57  ;;  %v2305_v63 = vadd.f32 %v4979_v41, %v2304_v60  ;;  %v1831_v2 = vpop.f32.mrf.mxu0  ;;  %v5228_v3 = vpop.f32.mrf.mxu1 }
 0x12c   : > { %6179 = vst [vmem:[#allocation13_spill] sm:$0xff] %v5228_v3  ;;  %v1832_v4 = vadd.f32 %v4979_v41, %v1831_v2 }
 0x12d   : > { %v2566_v5 = vmax.f32 %v2140_v61, 0.0  ;;  %v2632_v7 = vmax.f32 %v2305_v63, 0.0 }
 0x12e   : > { %v2443_v8 = vmax.f32 %v1832_v4, 0.0 }
 0x12f   : > { %v2841_v9 = vadd.f32 %v2840_v50, %v2566_v5  ;;  %v2917_v10 = vadd.f32 %v2916_v53, %v2632_v7  ;;  %v4534_v7 = vld [vmem:[%s6154_s0 + $0x98] sm:$0xff] }
 0x130   : > { %v2698_v11 = vadd.f32 %v2697_v54, %v2443_v8  ;;  %v4567_v8 = vld [vmem:[%s6154_s0 + $0x1a0] sm:$0xff] }
 0x132   : > { %v2141_v15 = vpop.f32.mrf.mxu2  ;;  %v2306_v16 = vpop.f32.mrf.mxu3 }
 0x133   : > { %v2142_v21 = vadd.f32 %v4979_v41, %v2141_v15  ;;  %v2307_v22 = vadd.f32 %v4979_v41, %v2306_v16  ;;  %v1834_v23 = vpop.f32.mrf.mxu0  ;;  %v5239_v24 = vpop.f32.mrf.mxu1  ;;  %v4596_v16 = vld [vmem:[%s6154_s0 + $0x288] sm:$0xff] }
 0x134   : > { %6180 = vst [vmem:[#allocation14_spill] sm:$0xff] %v5239_v24  ;;  %v1835_v28 = vadd.f32 %v4979_v41, %v1834_v23 }
 0x135   : > { %v2567_v29 = vmax.f32 %v2142_v21, 0.0  ;;  %v2633_v30 = vmax.f32 %v2307_v22, 0.0 }
 0x136   : > { %v2444_v33 = vmax.f32 %v1835_v28, 0.0  ;;  %4295 = vmatmul.msk.bf16.gmra.mxu0 %vm1386_vm1, %v4533_v19  ;;  %4328 = vmatmul.msk.bf16.gmra.mxu1 %vm1386_vm1, %v4566_v20  ;;  %v4629_v19 = vld [vmem:[%s6154_s0 + $0x390] sm:$0xff] }
 0x137   : > { %v2842_v35 = vadd.f32 %v2841_v9, %v2567_v29  ;;  %v2918_v36 = vadd.f32 %v2917_v10, %v2633_v30  ;;  %4357 = vmatmul.msk.bf16.gmra.mxu2 %vm1386_vm1, %v4595_v26  ;;  %4390 = vmatmul.msk.bf16.gmra.mxu3 %vm1386_vm1, %v4628_v27 }
 0x138   : > { %v2699_v39 = vadd.f32 %v2698_v11, %v2444_v33 }
 0x13a   : > { %v2144_v40 = vpop.f32.mrf.mxu2  ;;  %v2309_v45 = vpop.f32.mrf.mxu3 }
 0x13b   : > { %v2145_v47 = vadd.f32 %v4979_v41, %v2144_v40  ;;  %v2310_v48 = vadd.f32 %v4979_v41, %v2309_v45  ;;  %v1836_v49 = vpop.f32.mrf.mxu0  ;;  %v5254_v50 = vpop.f32.mrf.mxu1 }
 0x13c   : > { %6181 = vst [vmem:[#allocation15_spill] sm:$0xff] %v5254_v50  ;;  %v1837_v53 = vadd.f32 %v4979_v41, %v1836_v49 }
 0x13d   : > { %v2568_v54 = vmax.f32 %v2145_v47, 0.0  ;;  %v2634_v57 = vmax.f32 %v2310_v48, 0.0 }
 0x13e   : > { %v2445_v60 = vmax.f32 %v1837_v53, 0.0 }
 0x13f   : > { %v2843_v61 = vadd.f32 %v2842_v35, %v2568_v54  ;;  %v2919_v63 = vadd.f32 %v2918_v36, %v2634_v57 }
 0x140   : > { %v2700_v2 = vadd.f32 %v2699_v39, %v2445_v60 }
 0x142   : > { %v2146_v4 = vpop.f32.mrf.mxu2  ;;  %v2311_v5 = vpop.f32.mrf.mxu3 }
 0x143   : > { %v2147_v9 = vadd.f32 %v4979_v41, %v2146_v4  ;;  %v2312_v10 = vadd.f32 %v4979_v41, %v2311_v5  ;;  %v1839_v11 = vpop.f32.mrf.mxu0  ;;  %v5265_v15 = vpop.f32.mrf.mxu1 }
 0x144   : > { %6182 = vst [vmem:[#allocation16_spill] sm:$0xff] %v5265_v15  ;;  %v1840_v20 = vadd.f32 %v4979_v41, %v1839_v11 }
 0x145   : > { %v2569_v21 = vmax.f32 %v2147_v9, 0.0  ;;  %v2635_v22 = vmax.f32 %v2312_v10, 0.0  ;;  %v4630_v9 = vld [vmem:[%s6154_s0 + $0x398] sm:$0xff] }
 0x146   : > { %v2446_v23 = vmax.f32 %v1840_v20, 0.0  ;;  %4296 = vmatmul.msk.bf16.gmra.mxu0 %vm1386_vm1, %v4534_v7  ;;  %4329 = vmatmul.msk.bf16.gmra.mxu1 %vm1386_vm1, %v4567_v8  ;;  %v4597_v8 = vld [vmem:[%s6154_s0 + $0x290] sm:$0xff] }
 0x147   : > { %v2844_v26 = vadd.f32 %v2843_v61, %v2569_v21  ;;  %v2920_v27 = vadd.f32 %v2919_v63, %v2635_v22  ;;  %4358 = vmatmul.msk.bf16.gmra.mxu2 %vm1386_vm1, %v4596_v16  ;;  %4391 = vmatmul.msk.bf16.gmra.mxu3 %vm1386_vm1, %v4629_v19  ;;  %v4535_v61 = vld [vmem:[%s6154_s0 + $0xa0] sm:$0xff]  ;;  %v4568_v63 = vld [vmem:[%s6154_s0 + $0x1a8] sm:$0xff] }
 0x148   : > { %v2701_v28 = vadd.f32 %v2700_v2, %v2446_v23 }
 0x14a   : > { %v2149_v29 = vpop.f32.mrf.mxu2  ;;  %v2314_v30 = vpop.f32.mrf.mxu3 }
 0x14b   : > { %v2150_v33 = vadd.f32 %v4979_v41, %v2149_v29  ;;  %v2315_v35 = vadd.f32 %v4979_v41, %v2314_v30  ;;  %v1841_v36 = vpop.f32.mrf.mxu0  ;;  %v5280_v39 = vpop.f32.mrf.mxu1 }
 0x14c   : > { %6183 = vst [vmem:[#allocation17_spill] sm:$0xff] %v5280_v39  ;;  %v1842_v40 = vadd.f32 %v4979_v41, %v1841_v36 }
 0x14d   : > { %v2570_v45 = vmax.f32 %v2150_v33, 0.0  ;;  %v2636_v47 = vmax.f32 %v2315_v35, 0.0 }
 0x14e   : > { %v2447_v48 = vmax.f32 %v1842_v40, 0.0 }
 0x14f   : > { %v2845_v49 = vadd.f32 %v2844_v26, %v2570_v45  ;;  %v2921_v53 = vadd.f32 %v2920_v27, %v2636_v47 }
 0x150   : > { %v2702_v54 = vadd.f32 %v2701_v28, %v2447_v48 }
 0x152   : > { %v2151_v57 = vpop.f32.mrf.mxu2  ;;  %v2316_v60 = vpop.f32.mrf.mxu3 }
 0x153   : > { %v2152_v2 = vadd.f32 %v4979_v41, %v2151_v57  ;;  %v2317_v4 = vadd.f32 %v4979_v41, %v2316_v60  ;;  %v1844_v5 = vpop.f32.mrf.mxu0  ;;  %v5291_v7 = vpop.f32.mrf.mxu1  ;;  %v4569_v57 = vld [vmem:[%s6154_s0 + $0x1b0] sm:$0xff] }
 0x154   : > { %6184 = vst [vmem:[#allocation18_spill] sm:$0xff] %v5291_v7  ;;  %v1845_v10 = vadd.f32 %v4979_v41, %v1844_v5  ;;  %v4631_v5 = vld [vmem:[%s6154_s0 + $0x3a0] sm:$0xff] }
 0x155   : > { %v2571_v11 = vmax.f32 %v2152_v2, 0.0  ;;  %v2637_v16 = vmax.f32 %v2317_v4, 0.0  ;;  %v4598_v4 = vld [vmem:[%s6154_s0 + $0x298] sm:$0xff] }
 0x156   : > { %v2448_v19 = vmax.f32 %v1845_v10, 0.0  ;;  %4297 = vmatmul.msk.bf16.gmra.mxu0 %vm1386_vm1, %v4535_v61  ;;  %4330 = vmatmul.msk.bf16.gmra.mxu1 %vm1386_vm1, %v4568_v63 }
 0x157   : > { %v2846_v20 = vadd.f32 %v2845_v49, %v2571_v11  ;;  %v2922_v21 = vadd.f32 %v2921_v53, %v2637_v16  ;;  %4359 = vmatmul.msk.bf16.gmra.mxu2 %vm1386_vm1, %v4597_v8  ;;  %4392 = vmatmul.msk.bf16.gmra.mxu3 %vm1386_vm1, %v4630_v9 }
 0x158   : > { %v2703_v22 = vadd.f32 %v2702_v54, %v2448_v19  ;;  %v4536_v54 = vld [vmem:[%s6154_s0 + $0xa8] sm:$0xff] }
 0x15a   : > { %v2154_v23 = vpop.f32.mrf.mxu2  ;;  %v2319_v26 = vpop.f32.mrf.mxu3 }
 0x15b   : > { %v2155_v27 = vadd.f32 %v4979_v41, %v2154_v23  ;;  %v2320_v28 = vadd.f32 %v4979_v41, %v2319_v26  ;;  %v1846_v29 = vpop.f32.mrf.mxu0  ;;  %v5306_v30 = vpop.f32.mrf.mxu1 }
 0x15c   : > { %6185 = vst [vmem:[#allocation19_spill] sm:$0xff] %v5306_v30  ;;  %v1847_v33 = vadd.f32 %v4979_v41, %v1846_v29 }
 0x15d   : > { %v2572_v35 = vmax.f32 %v2155_v27, 0.0  ;;  %v2638_v36 = vmax.f32 %v2320_v28, 0.0 }
 0x15e   : > { %v2449_v40 = vmax.f32 %v1847_v33, 0.0 }
 0x15f   : > { %v2847_v45 = vadd.f32 %v2846_v20, %v2572_v35  ;;  %v2923_v47 = vadd.f32 %v2922_v21, %v2638_v36  ;;  %v4643_v21 = vld [vmem:[%s6159_s5] sm:$0xff] }
 0x160   : > { %v2704_v48 = vadd.f32 %v2703_v22, %v2449_v40  ;;  %3371 = vmatpush.bf16.msrb.mxu1 %v4643_v21  ;;  %v3042_v21 = vlaneseq }
 0x162   : > { %v2156_v49 = vpop.f32.mrf.mxu2  ;;  %v2321_v53 = vpop.f32.mrf.mxu3 }
 0x163   : > { %v2157_v60 = vadd.f32 %v4979_v41, %v2156_v49  ;;  %v2322_v61 = vadd.f32 %v4979_v41, %v2321_v53  ;;  %v1849_v63 = vpop.f32.mrf.mxu0  ;;  %v5317_v2 = vpop.f32.mrf.mxu1 }
 0x164   : > { %6186 = vst [vmem:[#allocation20_spill] sm:$0xff] %v5317_v2  ;;  %v1850_v8 = vadd.f32 %v4979_v41, %v1849_v63 }
 0x165   : > { %v2573_v9 = vmax.f32 %v2157_v60, 0.0  ;;  %v2639_v10 = vmax.f32 %v2322_v61, 0.0 }
 0x166   : > { %v2450_v11 = vmax.f32 %v1850_v8, 0.0  ;;  %4298 = vmatmul.msk.bf16.gmra.mxu0 %vm1386_vm1, %v4536_v54  ;;  %4331 = vmatmul.msk.bf16.gmra.mxu1 %vm1386_vm1, %v4569_v57  ;;  %v4537_v54 = vld [vmem:[%s6154_s0 + $0xb0] sm:$0xff]  ;;  %v4570_v57 = vld [vmem:[%s6154_s0 + $0x1b8] sm:$0xff]  ;;  %v4632_v8 = vld [vmem:[%s6154_s0 + $0x3a8] sm:$0xff] }
 0x167   : > { %v2848_v16 = vadd.f32 %v2847_v45, %v2573_v9  ;;  %v2924_v19 = vadd.f32 %v2923_v47, %v2639_v10  ;;  %4360 = vmatmul.msk.bf16.gmra.mxu2 %vm1386_vm1, %v4598_v4  ;;  %4393 = vmatmul.msk.bf16.gmra.mxu3 %vm1386_vm1, %v4631_v5  ;;  %v4599_v5 = vld [vmem:[%s6154_s0 + $0x2a0] sm:$0xff] }
 0x168   : > { %v2705_v20 = vadd.f32 %v2704_v48, %v2450_v11 }
 0x16a   : > { %v2159_v22 = vpop.f32.mrf.mxu2  ;;  %v2324_v23 = vpop.f32.mrf.mxu3 }
 0x16b   : > { %v2160_v26 = vadd.f32 %v4979_v41, %v2159_v22  ;;  %v2325_v27 = vadd.f32 %v4979_v41, %v2324_v23  ;;  %v1851_v28 = vpop.f32.mrf.mxu0  ;;  %v5335_v29 = vpop.f32.mrf.mxu1  ;;  %v3043_v23 = vshrl.u32 %v3042_v21, 7  ;;  %v4633_v21 = vld [vmem:[%s6154_s0 + $0x3b0] sm:$0xff] }
 0x16c   : > { %6187 = vst [vmem:[#allocation21_spill] sm:$0xff] %v5335_v29  ;;  %v1852_v33 = vadd.f32 %v4979_v41, %v1851_v28 }
 0x16d   : > { %v2574_v35 = vmax.f32 %v2160_v26, 0.0  ;;  %v2640_v36 = vmax.f32 %v2325_v27, 0.0  ;;  %4682 = vset.pattern.permute.xlu1 %v3043_v23  ;;  %4681 = vset.pattern.permute.xlu0 %v3043_v23 }
 0x16e   : > { %v2451_v40 = vmax.f32 %v1852_v33, 0.0  ;;  %4683 = vset.pattern.permute.xlu2 %v3043_v23 }
 0x16f   : > { %v2849_v45 = vadd.f32 %v2848_v16, %v2574_v35  ;;  %v2925_v47 = vadd.f32 %v2924_v19, %v2640_v36 }
 0x170   : > { %v2706_v48 = vadd.f32 %v2705_v20, %v2451_v40 }
 0x172   : > { %v2161_v49 = vpop.f32.mrf.mxu2  ;;  %v2326_v53 = vpop.f32.mrf.mxu3 }
 0x173   : > { %v2162_v60 = vadd.f32 %v4979_v41, %v2161_v49  ;;  %v2327_v61 = vadd.f32 %v4979_v41, %v2326_v53  ;;  %v1854_v63 = vpop.f32.mrf.mxu0  ;;  %v5346_v4 = vpop.f32.mrf.mxu1 }
 0x174   : > { %6188 = vst [vmem:[#allocation22_spill] sm:$0xff] %v5346_v4  ;;  %v1855_v9 = vadd.f32 %v4979_v41, %v1854_v63 }
 0x175   : > { %v2575_v10 = vmax.f32 %v2162_v60, 0.0  ;;  %v2641_v11 = vmax.f32 %v2327_v61, 0.0 }
 0x176   : > { %v2452_v16 = vmax.f32 %v1855_v9, 0.0  ;;  %4299 = vmatmul.msk.bf16.gmra.mxu0 %vm1386_vm1, %v4537_v54  ;;  %4332 = vmatmul.msk.bf16.gmra.mxu1 %vm1386_vm1, %v4570_v57  ;;  %v5367_v54 = vld [vmem:[%s6158_s4] sm:$0xff] }
 0x177   : > { %v2850_v19 = vadd.f32 %v2849_v45, %v2575_v10  ;;  %v2926_v20 = vadd.f32 %v2925_v47, %v2641_v11  ;;  %4361 = vmatmul.msk.bf16.gmra.mxu2 %vm1386_vm1, %v4599_v5  ;;  %4394 = vmatmul.msk.bf16.gmra.mxu3 %vm1386_vm1, %v4632_v8  ;;  %v3162_v60 = vsel %vm1386_vm1, %v5367_v54, 0.0  ;;  %v3055_v61 = vperm.slane %v5367_v54, 2  ;;  %v4538_v8 = vld [vmem:[%s6154_s0 + $0xb8] sm:$0xff]  ;;  %v4571_v9 = vld [vmem:[%s6154_s0 + $0x1c0] sm:$0xff] }
 0x178   : > { %v2707_v22 = vadd.f32 %v2706_v48, %v2452_v16  ;;  %3163 = vadd.xlane.f32.xlu0 %v3162_v60  ;;  %v5396_v60 = vld [vmem:[%s6156_s2] ss:$0 sm:$0xff] }
 0x179   : > { %3060 = vperm.xlu1 %4682, %v3055_v61  }
 0x17a   : > { %v2164_v26 = vpop.f32.mrf.mxu2  ;;  %v2329_v27 = vpop.f32.mrf.mxu3 }
 0x17b   : > { %v2165_v28 = vadd.f32 %v4979_v41, %v2164_v26  ;;  %v2330_v33 = vadd.f32 %v4979_v41, %v2329_v27  ;;  %v1856_v35 = vpop.f32.mrf.mxu0  ;;  %v5361_v36 = vpop.f32.mrf.mxu1 }
 0x17c   : > { %6189 = vst [vmem:[#allocation23_spill] sm:$0xff] %v5361_v36  ;;  %v1857_v40 = vadd.f32 %v4979_v41, %v1856_v35 }
 0x17d   : > { %v2576_v45 = vmax.f32 %v2165_v28, 0.0  ;;  %v2642_v47 = vmax.f32 %v2330_v33, 0.0 }
 0x17e   : > { %v2453_v49 = vmax.f32 %v1857_v40, 0.0 }
 0x17f   : > { %v2851_v53 = vadd.f32 %v2850_v19, %v2576_v45  ;;  %v2927_v48 = vadd.f32 %v2926_v20, %v2642_v47  ;;  %v4600_v20 = vld [vmem:[%s6154_s0 + $0x2a8] sm:$0xff]  ;;  %v3041_v45 = vperm.slane %v5367_v54, 0 }
 0x180   : > { %v2708_v57 = vadd.f32 %v2707_v22, %v2453_v49 }
 0x181   : > { %3046 = vperm.xlu1 %4682, %v3041_v45  }
 0x182   : > { %v2166_v63 = vpop.f32.mrf.mxu2  ;;  %v2331_v5 = vpop.f32.mrf.mxu3 }
 0x183   : > { %v2167_v10 = vadd.f32 %v4979_v41, %v2166_v63  ;;  %v2332_v11 = vadd.f32 %v4979_v41, %v2331_v5  ;;  %v1859_v16 = vpop.f32.mrf.mxu0  ;;  %v2024_v19 = vpop.f32.mrf.mxu1 }
 0x184   : > { %v1860_v22 = vadd.f32 %v4979_v41, %v1859_v16  ;;  %v2025_v40 = vadd.f32 %v4979_v41, %v2024_v19 }
 0x185   : > { %v2577_v23 = vmax.f32 %v2167_v10, 0.0  ;;  %v2643_v26 = vmax.f32 %v2332_v11, 0.0 }
 0x186   : > { %v2454_v27 = vmax.f32 %v1860_v22, 0.0  ;;  %4300 = vmatmul.msk.bf16.gmra.mxu0 %vm1386_vm1, %v4538_v8  ;;  %4333 = vmatmul.msk.bf16.gmra.mxu1 %vm1386_vm1, %v4571_v9  ;;  %v2520_v5 = vmax.f32 %v2025_v40, 0.0  ;;  %v3076_v22 = vperm.slane %v5367_v54, 5  ;;  %v4572_v40 = vld [vmem:[%s6154_s0 + $0x1c8] sm:$0xff] }
 0x187   : > { %v2852_v28 = vadd.f32 %v2851_v53, %v2577_v23  ;;  %v2928_v33 = vadd.f32 %v2927_v48, %v2643_v26  ;;  %4362 = vmatmul.msk.bf16.gmra.mxu2 %vm1386_vm1, %v4600_v20  ;;  %4395 = vmatmul.msk.bf16.gmra.mxu3 %vm1386_vm1, %v4633_v21 }
 0x188   : > { %v2709_v35 = vadd.f32 %v2708_v57, %v2454_v27  ;;  %v4539_v27 = vld [vmem:[%s6154_s0 + $0xc0] sm:$0xff] }
 0x189   : > { %3081 = vperm.xlu1 %4682, %v3076_v22  }
 0x18a   : > { %v2169_v47 = vpop.f32.mrf.mxu2  ;;  %v2334_v49 = vpop.f32.mrf.mxu3 }
 0x18b   : > { %v2170_v61 = vadd.f32 %v5396_v60, %v2169_v47  ;;  %v2335_v53 = vadd.f32 %v5396_v60, %v2334_v49  ;;  %v1861_v48 = vpop.f32.mrf.mxu0  ;;  %v2026_v63 = vpop.f32.mrf.mxu1  ;;  %v4601_v47 = vld [vmem:[%s6154_s0 + $0x2b0] sm:$0xff]  ;;  %v4634_v49 = vld [vmem:[%s6154_s0 + $0x3b8] sm:$0xff] }
 0x18c   : > { %v1862_v57 = vadd.f32 %v5396_v60, %v1861_v48  ;;  %v2027_v41 = vadd.f32 %v5396_v60, %v2026_v63 }
 0x18d   : > { %v2578_v8 = vmax.f32 %v2170_v61, 0.0  ;;  %v2644_v9 = vmax.f32 %v2335_v53, 0.0  ;;  %v3048_v61 = vperm.slane %v5367_v54, 1 }
 0x18e   : > { %v2455_v10 = vmax.f32 %v1862_v57, 0.0  ;;  %v2521_v11 = vmax.f32 %v2027_v41, 0.0 }
 0x18f   : > { %v2853_v16 = vadd.f32 %v2852_v28, %v2578_v8  ;;  %v2929_v19 = vadd.f32 %v2928_v33, %v2644_v9  ;;  %3053 = vperm.xlu0 %4681, %v3048_v61   ;;  %v3090_v9 = vperm.slane %v5367_v54, 7 }
 0x190   : > { %v5402_v20 = vadd.f32 %v2709_v35, %v2455_v10  ;;  %v2791_v21 = vadd.f32 %v2521_v11, %v2520_v5 }
 0x191   : > { %3095 = vperm.xlu1 %4682, %v3090_v9   ;;  %v4540_v9 = vld [vmem:[%s6154_s0 + $0xc8] sm:$0xff] }
 0x192   : > { %v2171_v23 = vpop.f32.mrf.mxu2  ;;  %v2336_v26 = vpop.f32.mrf.mxu3 }
 0x193   : > { %v2172_v45 = vadd.f32 %v5396_v60, %v2171_v23  ;;  %v2337_v28 = vadd.f32 %v5396_v60, %v2336_v26  ;;  %v1864_v33 = vpop.f32.mrf.mxu0  ;;  %v2029_v35 = vpop.f32.mrf.mxu1 }
 0x194   : > { %v2030_v53 = vadd.f32 %v5396_v60, %v2029_v35  ;;  %v1865_v10 = vadd.f32 %v5396_v60, %v1864_v33 }
 0x195   : > { %v2579_v48 = vmax.f32 %v2172_v45, 0.0  ;;  %v2645_v63 = vmax.f32 %v2337_v28, 0.0 }
 0x196   : > { %v2522_v5 = vmax.f32 %v2030_v53, 0.0  ;;  %4301 = vmatmul.msk.bf16.gmra.mxu0 %vm1386_vm1, %v4539_v27  ;;  %4334 = vmatmul.msk.bf16.gmra.mxu1 %vm1386_vm1, %v4572_v40 }
 0x197   : > { %v2854_v57 = vadd.f32 %v2853_v16, %v2579_v48  ;;  %v2930_v41 = vadd.f32 %v2929_v19, %v2645_v63  ;;  %4363 = vmatmul.msk.bf16.gmra.mxu2 %vm1386_vm1, %v4601_v47  ;;  %4396 = vmatmul.msk.bf16.gmra.mxu3 %vm1386_vm1, %v4634_v49  ;;  %v3062_v48 = vperm.slane %v5367_v54, 3 }
 0x198   : > { %v2792_v8 = vadd.f32 %v2791_v21, %v2522_v5  ;;  %v2456_v21 = vmax.f32 %v1865_v10, 0.0 }
 0x199   : > { %3067 = vperm.xlu2 %4683, %v3062_v48   ;;  %v3069_v48 = vperm.slane %v5367_v54, 4 }
 0x19a   : > { %v2174_v11 = vpop.f32.mrf.mxu2  ;;  %v2339_v22 = vpop.f32.mrf.mxu3 }
 0x19b   : > { %v2175_v23 = vadd.f32 %v5396_v60, %v2174_v11  ;;  %v2340_v26 = vadd.f32 %v5396_v60, %v2339_v22  ;;  %v1866_v27 = vpop.f32.mrf.mxu0  ;;  %v2031_v45 = vpop.f32.mrf.mxu1  ;;  %v4573_v11 = vld [vmem:[%s6154_s0 + $0x1d0] sm:$0xff] }
 0x19c   : > { %v1867_v16 = vadd.f32 %v5396_v60, %v1866_v27  ;;  %v2032_v19 = vadd.f32 %v5396_v60, %v2031_v45 }
 0x19d   : > { %v2580_v40 = vmax.f32 %v2175_v23, 0.0  ;;  %v2646_v28 = vmax.f32 %v2340_v26, 0.0  ;;  %v4635_v23 = vld [vmem:[%s6154_s0 + $0x3c0] sm:$0xff] }
 0x19e   : > { %v2457_v35 = vmax.f32 %v1867_v16, 0.0  ;;  %v2523_v47 = vmax.f32 %v2032_v19, 0.0 }
 0x19f   : > { %v2855_v49 = vadd.f32 %v2854_v57, %v2580_v40  ;;  %v2931_v33 = vadd.f32 %v2930_v41, %v2646_v28 }
 0x1a0   : > { %v2717_v61 = vadd.f32 %v2457_v35, %v2456_v21  ;;  %v2793_v53 = vadd.f32 %v2792_v8, %v2523_v47  ;;  %v4602_v8 = vld [vmem:[%s6154_s0 + $0x2b8] sm:$0xff] }
 0x1a1   : > { %3074 = vperm.xlu2 %4683, %v3069_v48  }
 0x1a2   : > { %v2176_v63 = vpop.f32.mrf.mxu2  ;;  %v2341_v5 = vpop.f32.mrf.mxu3 }
 0x1a3   : > { %v2177_v10 = vadd.f32 %v5396_v60, %v2176_v63  ;;  %v2342_v57 = vadd.f32 %v5396_v60, %v2341_v5  ;;  %v1869_v41 = vpop.f32.mrf.mxu0  ;;  %v2034_v22 = vpop.f32.mrf.mxu1 }
 0x1a4   : > { %v1870_v26 = vadd.f32 %v5396_v60, %v1869_v41  ;;  %v2035_v27 = vadd.f32 %v5396_v60, %v2034_v22 }
 0x1a5   : > { %v2581_v45 = vmax.f32 %v2177_v10, 0.0  ;;  %v2647_v16 = vmax.f32 %v2342_v57, 0.0 }
 0x1a6   : > { %v2458_v19 = vmax.f32 %v1870_v26, 0.0  ;;  %v2524_v40 = vmax.f32 %v2035_v27, 0.0  ;;  %4302 = vmatmul.msk.bf16.gmra.mxu0 %vm1386_vm1, %v4540_v9  ;;  %4335 = vmatmul.msk.bf16.gmra.mxu1 %vm1386_vm1, %v4573_v11 }
 0x1a7   : > { %v2856_v28 = vadd.f32 %v2855_v49, %v2581_v45  ;;  %v5450_v21 = vadd.f32 %v2931_v33, %v2647_v16  ;;  %4364 = vmatmul.msk.bf16.gmra.mxu2 %vm1386_vm1, %v4602_v8  ;;  %4397 = vmatmul.msk.bf16.gmra.mxu3 %vm1386_vm1, %v4635_v23  ;;  %v3083_v23 = vperm.slane %v5367_v54, 6  ;;  %v4541_v45 = vld [vmem:[%s6154_s0 + $0xd0] sm:$0xff]  ;;  %v4574_v16 = vld [vmem:[%s6154_s0 + $0x1d8] sm:$0xff]  ;;  %v4603_v54 = vld [vmem:[%s6154_s0 + $0x2c0] sm:$0xff] }
 0x1a8   : > { %v2718_v35 = vadd.f32 %v2717_v61, %v2458_v19  ;;  %v2794_v47 = vadd.f32 %v2793_v53, %v2524_v40 }
 0x1a9   : > { %6190 = vst [vmem:[#allocation24_spill] sm:$0xff] %v5450_v21  ;;  %3088 = vperm.xlu2 %4683, %v3083_v23  }
 0x1aa   : > { %v2179_v63 = vpop.f32.mrf.mxu2  ;;  %v2344_v5 = vpop.f32.mrf.mxu3 }
 0x1ab   : > { %v2180_v10 = vadd.f32 %v5396_v60, %v2179_v63  ;;  %v1871_v57 = vpop.f32.mrf.mxu0  ;;  %v2036_v9 = vpop.f32.mrf.mxu1  ;;  %v2345_v8 = vadd.f32 %v5396_v60, %v2344_v5  ;;  %v4636_v63 = vld [vmem:[%s6154_s0 + $0x3c8] sm:$0xff] }
 0x1ac   : > { %v1872_v11 = vadd.f32 %v5396_v60, %v1871_v57  ;;  %v2037_v49 = vadd.f32 %v5396_v60, %v2036_v9 }
 0x1ad   : > { %v2582_v33 = vmax.f32 %v2180_v10, 0.0  ;;  %v2648_v19 = vmax.f32 %v2345_v8, 0.0 }
 0x1ae   : > { %v2459_v41 = vmax.f32 %v1872_v11, 0.0  ;;  %v2525_v53 = vmax.f32 %v2037_v49, 0.0 }
 0x1af   : > { %v2857_v22 = vadd.f32 %v2856_v28, %v2582_v33 }
 0x1b0   : > { %v2719_v61 = vadd.f32 %v2718_v35, %v2459_v41  ;;  %v2795_v5 = vadd.f32 %v2794_v47, %v2525_v53 }
 0x1b2   : > { %v2181_v26 = vpop.f32.mrf.mxu2  ;;  %v2346_v27 = vpop.f32.mrf.mxu3 }
 0x1b3   : > { %v2182_v40 = vadd.f32 %v5396_v60, %v2181_v26  ;;  %v2347_v28 = vadd.f32 %v5396_v60, %v2346_v27  ;;  %v1874_v35 = vpop.f32.mrf.mxu0  ;;  %v2039_v48 = vpop.f32.mrf.mxu1 }
 0x1b4   : > { %v1875_v10 = vadd.f32 %v5396_v60, %v1874_v35  ;;  %v2040_v57 = vadd.f32 %v5396_v60, %v2039_v48 }
 0x1b5   : > { %v2583_v9 = vmax.f32 %v2182_v40, 0.0  ;;  %v2649_v11 = vmax.f32 %v2347_v28, 0.0 }
 0x1b6   : > { %v2460_v49 = vmax.f32 %v1875_v10, 0.0  ;;  %v2526_v33 = vmax.f32 %v2040_v57, 0.0  ;;  %4303 = vmatmul.msk.bf16.gmra.mxu0 %vm1386_vm1, %v4541_v45  ;;  %4336 = vmatmul.msk.bf16.gmra.mxu1 %vm1386_vm1, %v4574_v16  ;;  %v4542_v57 = vld [vmem:[%s6154_s0 + $0xd8] sm:$0xff] }
 0x1b7   : > { %v5478_v41 = vadd.f32 %v2857_v22, %v2583_v9  ;;  %v2939_v8 = vadd.f32 %v2649_v11, %v2648_v19  ;;  %4365 = vmatmul.msk.bf16.gmra.mxu2 %vm1386_vm1, %v4603_v54  ;;  %4398 = vmatmul.msk.bf16.gmra.mxu3 %vm1386_vm1, %v4636_v63  ;;  %v4575_v9 = vld [vmem:[%s6154_s0 + $0x1e0] sm:$0xff] }
 0x1b8   : > { %v2720_v47 = vadd.f32 %v2719_v61, %v2460_v49  ;;  %v2796_v53 = vadd.f32 %v2795_v5, %v2526_v33 }
 0x1b9   : > { %6191 = vst [vmem:[#allocation25_spill] sm:$0xff] %v5478_v41 }
 0x1ba   : > { %v2184_v23 = vpop.f32.mrf.mxu2  ;;  %v2349_v26 = vpop.f32.mrf.mxu3 }
 0x1bb   : > { %v2350_v27 = vadd.f32 %v5396_v60, %v2349_v26  ;;  %v1876_v40 = vpop.f32.mrf.mxu0  ;;  %v2041_v28 = vpop.f32.mrf.mxu1  ;;  %v2185_v19 = vadd.f32 %v5396_v60, %v2184_v23 }
 0x1bc   : > { %v1877_v35 = vadd.f32 %v5396_v60, %v1876_v40  ;;  %v2042_v45 = vadd.f32 %v5396_v60, %v2041_v28 }
 0x1bd   : > { %v2650_v16 = vmax.f32 %v2350_v27, 0.0  ;;  %v2584_v11 = vmax.f32 %v2185_v19, 0.0 }
 0x1be   : > { %v2461_v22 = vmax.f32 %v1877_v35, 0.0  ;;  %v2527_v48 = vmax.f32 %v2042_v45, 0.0 }
 0x1bf   : > { %v2940_v54 = vadd.f32 %v2939_v8, %v2650_v16  ;;  %v4604_v8 = vld [vmem:[%s6154_s0 + $0x2c8] sm:$0xff] }
 0x1c0   : > { %v2721_v10 = vadd.f32 %v2720_v47, %v2461_v22  ;;  %v2797_v63 = vadd.f32 %v2796_v53, %v2527_v48  ;;  %v4637_v47 = vld [vmem:[%s6154_s0 + $0x3d0] sm:$0xff] }
 0x1c2   : > { %v2186_v61 = vpop.f32.mrf.mxu2  ;;  %v2351_v5 = vpop.f32.mrf.mxu3 }
 0x1c3   : > { %v2187_v49 = vadd.f32 %v5396_v60, %v2186_v61  ;;  %v2352_v33 = vadd.f32 %v5396_v60, %v2351_v5  ;;  %v1879_v26 = vpop.f32.mrf.mxu0  ;;  %v2044_v23 = vpop.f32.mrf.mxu1 }
 0x1c4   : > { %v1880_v53 = vadd.f32 %v5396_v60, %v1879_v26  ;;  %v2045_v27 = vadd.f32 %v5396_v60, %v2044_v23 }
 0x1c5   : > { %v2585_v40 = vmax.f32 %v2187_v49, 0.0  ;;  %v2651_v28 = vmax.f32 %v2352_v33, 0.0 }
 0x1c6   : > { %v2462_v35 = vmax.f32 %v1880_v53, 0.0  ;;  %v2528_v45 = vmax.f32 %v2045_v27, 0.0  ;;  %4304 = vmatmul.msk.bf16.gmra.mxu0 %vm1386_vm1, %v4542_v57  ;;  %4337 = vmatmul.msk.bf16.gmra.mxu1 %vm1386_vm1, %v4575_v9 }
 0x1c7   : > { %v2865_v16 = vadd.f32 %v2585_v40, %v2584_v11  ;;  %v2941_v22 = vadd.f32 %v2940_v54, %v2651_v28  ;;  %4366 = vmatmul.msk.bf16.gmra.mxu2 %vm1386_vm1, %v4604_v8  ;;  %4399 = vmatmul.msk.bf16.gmra.mxu3 %vm1386_vm1, %v4637_v47 }
 0x1c8   : > { %v2722_v48 = vadd.f32 %v2721_v10, %v2462_v35  ;;  %v2798_v19 = vadd.f32 %v2797_v63, %v2528_v45  ;;  %v4543_v35 = vld [vmem:[%s6154_s0 + $0xe0] sm:$0xff]  ;;  %v4576_v45 = vld [vmem:[%s6154_s0 + $0x1e8] sm:$0xff] }
 0x1ca   : > { %v2189_v61 = vpop.f32.mrf.mxu2  ;;  %v2354_v5 = vpop.f32.mrf.mxu3 }
 0x1cb   : > { %v2190_v26 = vadd.f32 %v5396_v60, %v2189_v61  ;;  %v2355_v49 = vadd.f32 %v5396_v60, %v2354_v5  ;;  %v1881_v33 = vpop.f32.mrf.mxu0  ;;  %v2046_v23 = vpop.f32.mrf.mxu1 }
 0x1cc   : > { %v1882_v57 = vadd.f32 %v5396_v60, %v1881_v33  ;;  %v2047_v9 = vadd.f32 %v5396_v60, %v2046_v23 }
 0x1cd   : > { %v2586_v11 = vmax.f32 %v2190_v26, 0.0  ;;  %v2652_v54 = vmax.f32 %v2355_v49, 0.0 }
 0x1ce   : > { %v2463_v53 = vmax.f32 %v1882_v57, 0.0  ;;  %v2529_v8 = vmax.f32 %v2047_v9, 0.0 }
 0x1cf   : > { %v2866_v27 = vadd.f32 %v2865_v16, %v2586_v11  ;;  %v2942_v47 = vadd.f32 %v2941_v22, %v2652_v54  ;;  %v4605_v16 = vld [vmem:[%s6154_s0 + $0x2d0] sm:$0xff]  ;;  %v4638_v22 = vld [vmem:[%s6154_s0 + $0x3d8] sm:$0xff] }
 0x1d0   : > { %v2723_v10 = vadd.f32 %v2722_v48, %v2463_v53  ;;  %v2799_v63 = vadd.f32 %v2798_v19, %v2529_v8 }
 0x1d2   : > { %v2191_v40 = vpop.f32.mrf.mxu2  ;;  %v2356_v28 = vpop.f32.mrf.mxu3 }
 0x1d3   : > { %v2192_v61 = vadd.f32 %v5396_v60, %v2191_v40  ;;  %v2357_v5 = vadd.f32 %v5396_v60, %v2356_v28  ;;  %v1884_v26 = vpop.f32.mrf.mxu0  ;;  %v2049_v49 = vpop.f32.mrf.mxu1 }
 0x1d4   : > { %v1885_v48 = vadd.f32 %v5396_v60, %v1884_v26  ;;  %v2050_v19 = vadd.f32 %v5396_v60, %v2049_v49 }
 0x1d5   : > { %v2587_v33 = vmax.f32 %v2192_v61, 0.0  ;;  %v2653_v23 = vmax.f32 %v2357_v5, 0.0 }
 0x1d6   : > { %v2464_v57 = vmax.f32 %v1885_v48, 0.0  ;;  %v2530_v9 = vmax.f32 %v2050_v19, 0.0  ;;  %4305 = vmatmul.msk.bf16.gmra.mxu0 %vm1386_vm1, %v4543_v35  ;;  %4338 = vmatmul.msk.bf16.gmra.mxu1 %vm1386_vm1, %v4576_v45 }
 0x1d7   : > { %v2867_v11 = vadd.f32 %v2866_v27, %v2587_v33  ;;  %v2943_v54 = vadd.f32 %v2942_v47, %v2653_v23  ;;  %4367 = vmatmul.msk.bf16.gmra.mxu2 %vm1386_vm1, %v4605_v16  ;;  %4400 = vmatmul.msk.bf16.gmra.mxu3 %vm1386_vm1, %v4638_v22 }
 0x1d8   : > { %v2724_v53 = vadd.f32 %v2723_v10, %v2464_v57  ;;  %v2800_v8 = vadd.f32 %v2799_v63, %v2530_v9  ;;  %v4544_v57 = vld [vmem:[%s6154_s0 + $0xe8] sm:$0xff] }
 0x1da   : > { %v2194_v40 = vpop.f32.mrf.mxu2  ;;  %v2359_v28 = vpop.f32.mrf.mxu3 }
 0x1db   : > { %v2195_v26 = vadd.f32 %v5396_v60, %v2194_v40  ;;  %v2360_v61 = vadd.f32 %v5396_v60, %v2359_v28  ;;  %v1886_v5 = vpop.f32.mrf.mxu0  ;;  %v2051_v49 = vpop.f32.mrf.mxu1 }
 0x1dc   : > { %v1887_v35 = vadd.f32 %v5396_v60, %v1886_v5  ;;  %v2052_v45 = vadd.f32 %v5396_v60, %v2051_v49 }
 0x1dd   : > { %v2588_v27 = vmax.f32 %v2195_v26, 0.0  ;;  %v2654_v47 = vmax.f32 %v2360_v61, 0.0  ;;  %v4606_v26 = vld [vmem:[%s6154_s0 + $0x2d8] sm:$0xff] }
 0x1de   : > { %v2465_v48 = vmax.f32 %v1887_v35, 0.0  ;;  %v2531_v16 = vmax.f32 %v2052_v45, 0.0 }
 0x1df   : > { %v2868_v19 = vadd.f32 %v2867_v11, %v2588_v27  ;;  %v2944_v22 = vadd.f32 %v2943_v54, %v2654_v47  ;;  %v4639_v11 = vld [vmem:[%s6154_s0 + $0x3e0] sm:$0xff] }
 0x1e0   : > { %v2725_v10 = vadd.f32 %v2724_v53, %v2465_v48  ;;  %v2801_v63 = vadd.f32 %v2800_v8, %v2531_v16 }
 0x1e2   : > { %v2196_v33 = vpop.f32.mrf.mxu2  ;;  %v2361_v23 = vpop.f32.mrf.mxu3 }
 0x1e3   : > { %v2197_v9 = vadd.f32 %v5396_v60, %v2196_v33  ;;  %v2362_v40 = vadd.f32 %v5396_v60, %v2361_v23  ;;  %v1889_v28 = vpop.f32.mrf.mxu0  ;;  %v2054_v5 = vpop.f32.mrf.mxu1 }
 0x1e4   : > { %v1890_v54 = vadd.f32 %v5396_v60, %v1889_v28  ;;  %v2055_v53 = vadd.f32 %v5396_v60, %v2054_v5 }
 0x1e5   : > { %v2589_v8 = vmax.f32 %v2197_v9, 0.0  ;;  %v2655_v61 = vmax.f32 %v2362_v40, 0.0 }
 0x1e6   : > { %v2466_v49 = vmax.f32 %v1890_v54, 0.0  ;;  %v2532_v35 = vmax.f32 %v2055_v53, 0.0  ;;  %4306 = vmatmul.msk.bf16.gmra.mxu0 %vm1386_vm1, %v4544_v57 }
 0x1e7   : > { %v2869_v45 = vadd.f32 %v2868_v19, %v2589_v8  ;;  %v2945_v27 = vadd.f32 %v2944_v22, %v2655_v61  ;;  %4368 = vmatmul.msk.bf16.gmra.mxu2 %vm1386_vm1, %v4606_v26  ;;  %4401 = vmatmul.msk.bf16.gmra.mxu3 %vm1386_vm1, %v4639_v11 }
 0x1e8   : > { %v2726_v47 = vadd.f32 %v2725_v10, %v2466_v49  ;;  %v2802_v48 = vadd.f32 %v2801_v63, %v2532_v35  ;;  %v4545_v49 = vld [vmem:[%s6154_s0 + $0xf0] sm:$0xff] }
 0x1ea   : > { %v2199_v16 = vpop.f32.mrf.mxu2  ;;  %v2364_v33 = vpop.f32.mrf.mxu3 }
 0x1eb   : > { %v2200_v23 = vadd.f32 %v5396_v60, %v2199_v16  ;;  %v2365_v28 = vadd.f32 %v5396_v60, %v2364_v33  ;;  %v1891_v9 = vpop.f32.mrf.mxu0  ;;  %v2056_v40 = vpop.f32.mrf.mxu1 }
 0x1ec   : > { %v1892_v5 = vadd.f32 %v5396_v60, %v1891_v9  ;;  %v2057_v57 = vadd.f32 %v5396_v60, %v2056_v40  ;;  %v3061_v40 = vpop.permute.xlu1 %3060 }
 0x1ed   : > { %v2590_v19 = vmax.f32 %v2200_v23, 0.0  ;;  %v2656_v22 = vmax.f32 %v2365_v28, 0.0  ;;  %v4607_v23 = vld [vmem:[%s6154_s0 + $0x2e0] sm:$0xff] }
 0x1ee   : > { %v2467_v54 = vmax.f32 %v1892_v5, 0.0  ;;  %v2533_v26 = vmax.f32 %v2057_v57, 0.0 }
 0x1ef   : > { %v2870_v53 = vadd.f32 %v2869_v45, %v2590_v19  ;;  %v2946_v11 = vadd.f32 %v2945_v27, %v2656_v22  ;;  %v4640_v45 = vld [vmem:[%s6154_s0 + $0x3e8] sm:$0xff] }
 0x1f0   : > { %v2727_v10 = vadd.f32 %v2726_v47, %v2467_v54  ;;  %v2803_v63 = vadd.f32 %v2802_v48, %v2533_v26 }
 0x1f2   : > { %v2201_v8 = vpop.f32.mrf.mxu2  ;;  %v2366_v61 = vpop.f32.mrf.mxu3 }
 0x1f3   : > { %v2202_v35 = vadd.f32 %v5396_v60, %v2201_v8  ;;  %v2367_v16 = vadd.f32 %v5396_v60, %v2366_v61  ;;  %v1894_v33 = vpop.f32.mrf.mxu0  ;;  %v2059_v9 = vpop.f32.mrf.mxu1  ;;  %v3034_v8 = vld [vmem:[%s6157_s3 + $0x10] sm:$0xff] }
 0x1f4   : > { %v1895_v27 = vadd.f32 %v5396_v60, %v1894_v33  ;;  %v2060_v47 = vadd.f32 %v5396_v60, %v2059_v9  ;;  %v3099_v61 = vmul.f32 %v3061_v40, %v3034_v8  ;;  %v3035_v8 = vld [vmem:[%s6157_s3 + $0x18] sm:$0xff] }
 0x1f5   : > { %v2591_v48 = vmax.f32 %v2202_v35, 0.0  ;;  %v2657_v28 = vmax.f32 %v2367_v16, 0.0 }
 0x1f6   : > { %v2468_v5 = vmax.f32 %v1895_v27, 0.0  ;;  %v2534_v57 = vmax.f32 %v2060_v47, 0.0  ;;  %4307 = vmatmul.msk.bf16.gmra.mxu0 %vm1386_vm1, %v4545_v49  ;;  %v3120_v9 = vsel %vm3105_vm2, %v3099_v61, 0.0  ;;  %v3068_v47 = vpop.permute.xlu2 %3067 }
 0x1f7   : > { %v2871_v19 = vadd.f32 %v2870_v53, %v2591_v48  ;;  %v2947_v22 = vadd.f32 %v2946_v11, %v2657_v28  ;;  %4369 = vmatmul.msk.bf16.gmra.mxu2 %vm1386_vm1, %v4607_v23  ;;  %4402 = vmatmul.msk.bf16.gmra.mxu3 %vm1386_vm1, %v4640_v45 }
 0x1f8   : > { %v2728_v54 = vadd.f32 %v2727_v10, %v2468_v5  ;;  %v2804_v26 = vadd.f32 %v2803_v63, %v2534_v57  ;;  %v3121_v63 = vrot.slane %v3120_v9, 4 }
 0x1fa   : > { %v2204_v35 = vpop.f32.mrf.mxu2  ;;  %v2369_v16 = vpop.f32.mrf.mxu3  ;;  %v3122_v40 = vadd.f32 %v3121_v63, %v3120_v9  ;;  %v4608_v63 = vld [vmem:[%s6154_s0 + $0x2e8] sm:$0xff] }
 0x1fb   : > { %v2205_v33 = vadd.f32 %v5396_v60, %v2204_v35  ;;  %v2370_v49 = vadd.f32 %v5396_v60, %v2369_v16  ;;  %v1896_v53 = vpop.f32.mrf.mxu0  ;;  %v2061_v11 = vpop.f32.mrf.mxu1 }
 0x1fc   : > { %v1897_v23 = vadd.f32 %v5396_v60, %v1896_v53  ;;  %v2062_v10 = vadd.f32 %v5396_v60, %v2061_v11  ;;  %v3047_v35 = vpop.permute.xlu1 %3046  ;;  %v3123_v36 = vrot.slane %v3122_v40, 2  ;;  %v3100_v53 = vmul.f32 %v3068_v47, %v3035_v8 }
 0x1fd   : > { %v2592_v45 = vmax.f32 %v2205_v33, 0.0  ;;  %v2658_v27 = vmax.f32 %v2370_v49, 0.0  ;;  %v3032_v33 = vld [vmem:[%s6157_s3] sm:$0xff] }
 0x1fe   : > { %v2469_v48 = vmax.f32 %v1897_v23, 0.0  ;;  %v2535_v28 = vmax.f32 %v2062_v10, 0.0  ;;  %v3097_v49 = vmul.f32 %v3047_v35, %v3032_v33  ;;  %v3124_v8 = vadd.f32 %v3123_v36, %v3122_v40  ;;  %v3036_v36 = vld [vmem:[%s6157_s3 + $0x20] sm:$0xff] }
 0x1ff   : > { %v2872_v5 = vadd.f32 %v2871_v19, %v2592_v45  ;;  %v2948_v57 = vadd.f32 %v2947_v22, %v2658_v27  ;;  %v4546_v19 = vld [vmem:[%s6154_s0 + $0xf8] sm:$0xff]  ;;  %v3127_v22 = vsel %vm3105_vm2, %v3100_v53, 0.0  ;;  %v4641_v45 = vld [vmem:[%s6154_s0 + $0x3f0] sm:$0xff]  ;;  %v3164_v53 = vpop.xlane.xlu0 %3163 }
 0x200   : > { %v2729_v16 = vadd.f32 %v2728_v54, %v2469_v48  ;;  %v2805_v61 = vadd.f32 %v2804_v26, %v2535_v28  ;;  %v3128_v27 = vrot.slane %v3127_v22, 4  ;;  %v3106_v47 = vsel %vm3105_vm2, %v3097_v49, 0.0  ;;  %v3075_v49 = vpop.permute.xlu2 %3074 }
 0x201   : > { %v3107_v35 = vrot.slane %v3106_v47, 4  ;;  %v5599_v4 = vmax.f32 %v3164_v53, 1.0 }
 0x202   : > { %v2206_v11 = vpop.f32.mrf.mxu2  ;;  %v2371_v23 = vpop.f32.mrf.mxu3 }
 0x203   : > { %v2207_v9 = vadd.f32 %v5396_v60, %v2206_v11  ;;  %v2372_v54 = vadd.f32 %v5396_v60, %v2371_v23  ;;  %v1899_v26 = vpop.f32.mrf.mxu0  ;;  %v2064_v10 = vpop.f32.mrf.mxu1  ;;  %v3129_v23 = vadd.f32 %v3128_v27, %v3127_v22  ;;  %v3108_v41 = vadd.f32 %v3107_v35, %v3106_v47 }
 0x204   : > { %v1900_v48 = vadd.f32 %v5396_v60, %v1899_v26  ;;  %v2065_v28 = vadd.f32 %v5396_v60, %v2064_v10  ;;  %v5608_v40 = vrot.slane %v5599_v4, 4  ;;  %v3082_v26 = vpop.permute.xlu1 %3081  ;;  %vm3187_vm11 = vweird.f32 %v5599_v4 }
 0x205   : > { %v2593_v33 = vmax.f32 %v2207_v9, 0.0  ;;  %v2659_v11 = vmax.f32 %v2372_v54, 0.0  ;;  %v3125_v54 = vrot.slane %v3124_v8, 1 }
 0x206   : > { %v2470_v21 = vmax.f32 %v1900_v48, 0.0  ;;  %v2536_v29 = vmax.f32 %v2065_v28, 0.0  ;;  %4308 = vmatmul.msk.bf16.gmra.mxu0 %vm1386_vm1, %v4546_v19  ;;  %v3101_v19 = vmul.f32 %v3075_v49, %v3036_v36  ;;  %4686 = vrcp.f32 %v5608_v40 }
 0x207   : > { %v2873_v2 = vadd.f32 %v2872_v5, %v2593_v33  ;;  %v2949_v30 = vadd.f32 %v2948_v57, %v2659_v11  ;;  %4370 = vmatmul.msk.bf16.gmra.mxu2 %vm1386_vm1, %v4608_v63  ;;  %4403 = vmatmul.msk.bf16.gmra.mxu3 %vm1386_vm1, %v4641_v45  ;;  %v3037_v5 = vld [vmem:[%s6157_s3 + $0x28] sm:$0xff]  ;;  %v3130_v57 = vrot.slane %v3129_v23, 2  ;;  %v3109_v45 = vrot.slane %v3108_v41, 2 }
 0x208   : > { %v2730_v22 = vadd.f32 %v2729_v16, %v2470_v21  ;;  %v5610_v9 = vadd.f32 %v2805_v61, %v2536_v29  ;;  %v3134_v27 = vsel %vm3105_vm2, %v3101_v19, 0.0  ;;  %v3102_v48 = vmul.f32 %v3082_v26, %v3037_v5 }
 0x209   : > { %v3135_v61 = vrot.slane %v3134_v27, 4  ;;  %v5620_v35 = vadd.f32 %v3125_v54, %v3124_v8  ;;  %v3131_v11 = vadd.f32 %v3130_v57, %v3129_v23  ;;  %v3110_v19 = vadd.f32 %v3109_v45, %v3108_v41 }
 0x20a   : > { %v2209_v10 = vpop.f32.mrf.mxu2  ;;  %v2374_v63 = vpop.f32.mrf.mxu3  ;;  %vm3247_vm3 = vweird.f32 %v5608_v40  ;;  %v3141_v5 = vsel %vm3105_vm2, %v3102_v48, 0.0  ;;  %v3251_v54 = vand.u32 2147483647, %v5608_v40  ;;  %v3253_v23 = vand.u32 2147483648, %v5608_v40 }
 0x20b   : > { %v2210_v47 = vadd.f32 %v5396_v60, %v2209_v10  ;;  %v2375_v29 = vadd.f32 %v5396_v60, %v2374_v63  ;;  %v1901_v21 = vpop.f32.mrf.mxu0  ;;  %v2066_v16 = vpop.f32.mrf.mxu1  ;;  %v3136_v49 = vadd.f32 %v3135_v61, %v3134_v27  ;;  %v3132_v57 = vrot.slane %v3131_v11, 1 }
 0x20c   : > { %v1902_v28 = vadd.f32 %v5396_v60, %v1901_v21  ;;  %v2067_v7 = vadd.f32 %v5396_v60, %v2066_v16  ;;  %v4687_v10 = vpop.eup %4686  ;;  %v5629_v41 = vrot.slane %v5599_v4, 5  ;;  %v3254_v24 = vor.u32 1.1754944e-38, %v3253_v23 }
 0x20d   : > { %v2594_v53 = vmax.f32 %v2210_v47, 0.0  ;;  %v2660_v33 = vmax.f32 %v2375_v29, 0.0  ;;  %v3137_v15 = vrot.slane %v3136_v49, 2  ;;  %v3243_v8 = vmul.f32 %v4687_v10, %v5608_v40 }
 0x20e   : > { %v2471_v36 = vmax.f32 %v1902_v28, 0.0  ;;  %v3142_v47 = vrot.slane %v3141_v5, 4  ;;  %v2537_v45 = vmax.f32 %v2067_v7, 0.0  ;;  %vm3248_vm4 = vweird.f32 %v4687_v10  ;;  %v4609_v28 = vld [vmem:[%s6154_s0 + $0x2f0] sm:$0xff]  ;;  %v4642_v7 = vld [vmem:[%s6154_s0 + $0x3f8] sm:$0xff] }
 0x20f   : > { %v2874_v63 = vadd.f32 %v2873_v2, %v2594_v53  ;;  %v2950_v39 = vadd.f32 %v2949_v30, %v2660_v33  ;;  %v3138_v27 = vadd.f32 %v3137_v15, %v3136_v49  ;;  %v4547_v30 = vld [vmem:[%s6154_s0 + $0x100] sm:$0xff]  ;;  %v3244_v21 = vsub.f32 1.0, %v3243_v8  ;;  %vm5648_vm5 = vmor %vm3247_vm3, %vm3248_vm4 }
 0x210   : > { %v2731_v26 = vadd.f32 %v2730_v22, %v2471_v36  ;;  %v3111_v22 = vrot.slane %v3110_v19, 1  ;;  %v3143_v33 = vadd.f32 %v3142_v47, %v3141_v5  ;;  %4688 = vrcp.f32 %v5629_v41 }
 0x211   : > { %v3139_v53 = vrot.slane %v3138_v27, 1  ;;  %v3245_v8 = vmul.f32 %v4687_v10, %v3244_v21  ;;  %vm3252_vm6 = vcmp.eq.f32.partialorder %v3251_v54, 8.507059e+37  ;;  %v2807_v21 = vadd.f32 %v5610_v9, %v2537_v45 }
 0x212   : > { %v2211_v29 = vpop.f32.mrf.mxu2  ;;  %v2376_v2 = vpop.f32.mrf.mxu3  ;;  %v3144_v3 = vrot.slane %v3143_v33, 2  ;;  %v5657_v40 = vrot.slane %v5599_v4, 1  ;;  %v5663_v54 = vadd.f32 %v3111_v22, %v3110_v19  ;;  %vm3262_vm7 = vweird.f32 %v5629_v41 }
 0x213   : > { %v2212_v16 = vadd.f32 %v5396_v60, %v2211_v29  ;;  %v2377_v61 = vadd.f32 %v5396_v60, %v2376_v2  ;;  %v1904_v48 = vpop.f32.mrf.mxu0  ;;  %v2069_v15 = vpop.f32.mrf.mxu1  ;;  %v3140_v5 = vadd.f32 %v3139_v53, %v3138_v27  ;;  %v3246_v47 = vadd.f32 %v4687_v10, %v3245_v8 }
 0x214   : > { %v1905_v49 = vadd.f32 %v5396_v60, %v1904_v48  ;;  %v2070_v36 = vadd.f32 %v5396_v60, %v2069_v15  ;;  %v5661_v27 = vadd.f32 %v3132_v57, %v3131_v11  ;;  %4690 = vrcp.f32 %v5599_v4 }
 0x215   : > { %v2595_v29 = vmax.f32 %v2212_v16, 0.0  ;;  %v2661_v2 = vmax.f32 %v2377_v61, 0.0  ;;  %v3250_v15 = vsel %vm5648_vm5, %v4687_v10, %v3246_v47  ;;  %v3268_v10 = vand.u32 2147483648, %v5629_v41 }
 0x216   : > { %v2472_v37 = vmax.f32 %v1905_v49, 0.0  ;;  %4309 = vmatmul.msk.bf16.gmra.mxu0 %vm1386_vm1, %v4547_v30  ;;  %v2538_v23 = vmax.f32 %v2070_v36, 0.0  ;;  %v3145_v30 = vadd.f32 %v3144_v3, %v3143_v33  ;;  %v3255_v9 = vsel %vm3252_vm6, %v3254_v24, %v3250_v15 }
 0x217   : > { %v2875_v48 = vadd.f32 %v2874_v63, %v2595_v29  ;;  %v2951_v16 = vadd.f32 %v2950_v39, %v2661_v2  ;;  %4371 = vmatmul.msk.bf16.gmra.mxu2 %vm1386_vm1, %v4609_v28  ;;  %4404 = vmatmul.msk.bf16.gmra.mxu3 %vm1386_vm1, %v4642_v7  ;;  %v5666_v39 = vrot.slane %v5599_v4, 2  ;;  %v4689_v63 = vpop.eup %4688  ;;  %v3256_v7 = vmul.f32 %v3255_v9, %v3140_v5 }
 0x218   : > { %v2732_v61 = vadd.f32 %v2731_v26, %v2472_v37  ;;  %v3266_v37 = vand.u32 2147483647, %v5629_v41  ;;  %v3258_v24 = vmul.f32 %v4689_v63, %v5629_v41  ;;  %v2808_v26 = vadd.f32 %v2807_v21, %v2538_v23 }
 0x219   : > { %v3146_v53 = vrot.slane %v3145_v30, 1  ;;  %vm3263_vm8 = vweird.f32 %v4689_v63  ;;  %v3306_v29 = vpack.c.bf16 %v3256_v7, %v3256_v7  ;;  %v5682_v5 = vrot.slane %v5599_v4, 3 }
 0x21a   : > { %v2214_v45 = vpop.f32.mrf.mxu2  ;;  %v2379_v28 = vpop.f32.mrf.mxu3  ;;  %v3259_v36 = vsub.f32 1.0, %v3258_v24  ;;  %vm5677_vm9 = vcmp.eq.f32.partialorder %v3266_v37, 8.507059e+37  ;;  %v3269_v15 = vor.u32 1.1754944e-38, %v3268_v10  ;;  %vm5686_vm10 = vmor %vm3262_vm7, %vm3263_vm8  ;;  %v3191_v7 = vand.u32 2147483647, %v5599_v4 }
 0x21b   : > { %v2215_v3 = vadd.f32 %v5396_v60, %v2214_v45  ;;  %v2380_v50 = vadd.f32 %v5396_v60, %v2379_v28  ;;  %v1906_v11 = vpop.f32.mrf.mxu0  ;;  %v2071_v19 = vpop.f32.mrf.mxu1  ;;  %v3147_v28 = vadd.f32 %v3146_v53, %v3145_v30  ;;  %4692 = vrcp.f32 %v5657_v40 }
 0x21c   : > { %v1907_v57 = vadd.f32 %v5396_v60, %v1906_v11  ;;  %v2072_v22 = vadd.f32 %v5396_v60, %v2071_v19  ;;  %v3260_v23 = vmul.f32 %v4689_v63, %v3259_v36  ;;  %v4691_v9 = vpop.eup %4690  ;;  %v3193_v41 = vand.u32 2147483648, %v5599_v4 }
 0x21d   : > { %v2596_v33 = vmax.f32 %v2215_v3, 0.0  ;;  %v2662_v49 = vmax.f32 %v2380_v50, 0.0  ;;  %vm3188_vm12 = vweird.f32 %v4691_v9  ;;  %4694 = vrcp.f32 %v5666_v39 }
 0x21e   : > { %v2473_v8 = vmax.f32 %v1907_v57, 0.0  ;;  %v2539_v37 = vmax.f32 %v2072_v22, 0.0  ;;  %v3261_v50 = vadd.f32 %v4689_v63, %v3260_v23  ;;  %vm5706_vm13 = vcmp.eq.f32.partialorder %v3191_v7, 8.507059e+37  ;;  %vm5714_vm14 = vmor %vm3187_vm11, %vm3188_vm12 }
 0x21f   : > { %v2876_v47 = vadd.f32 %v2875_v48, %v2596_v33  ;;  %v2952_v21 = vadd.f32 %v2951_v16, %v2662_v49  ;;  %v3183_v48 = vmul.f32 %v4691_v9, %v5599_v4  ;;  %v3194_v2 = vor.u32 1.1754944e-38, %v3193_v41 }
 0x220   : > { %v2733_v45 = vadd.f32 %v2732_v61, %v2473_v8  ;;  %v5694_v61 = vunpack.c.l.b16 %v3306_v29  ;;  %v3265_v57 = vsel %vm5686_vm10, %v4689_v63, %v3261_v50  ;;  %vm3202_vm15 = vweird.f32 %v5657_v40 }
 0x221   : > { %v3184_v22 = vsub.f32 1.0, %v3183_v48  ;;  %v3270_v49 = vsel %vm5677_vm9, %v3269_v15, %v3265_v57  ;;  %v5718_v15 = vpop.eup %4692  ;;  %vm3217_vm0 = vweird.f32 %v5666_v39  ;;  %4696 = vrcp.f32 %v5682_v5 }
 0x222   : > { %v2216_v16 = vpop.f32.mrf.mxu2  ;;  %v2381_v11 = vpop.f32.mrf.mxu3  ;;  %v3271_v23 = vmul.f32 %v3270_v49, %v3147_v28  ;;  %vm3203_vm3 = vweird.f32 %v5718_v15  ;;  %vm3232_vm7 = vweird.f32 %v5682_v5 }
 0x223   : > { %v2217_v30 = vadd.f32 %v5396_v60, %v2216_v16  ;;  %v2382_v19 = vadd.f32 %v5396_v60, %v2381_v11  ;;  %v1909_v24 = vpop.f32.mrf.mxu0  ;;  %v2074_v10 = vpop.f32.mrf.mxu1  ;;  %v3185_v16 = vmul.f32 %v4691_v9, %v3184_v22  ;;  %v2809_v11 = vadd.f32 %v2808_v26, %v2539_v37  ;;  %vm5783_vm8 = vmor %vm3202_vm15, %vm3203_vm3 }
 0x224   : > { %v1910_v53 = vadd.f32 %v5396_v60, %v1909_v24  ;;  %v2075_v33 = vadd.f32 %v5396_v60, %v2074_v10  ;;  %v4695_v26 = vpop.eup %4694  ;;  %v3307_v24 = vpack.c.bf16 %v3271_v23, %v3271_v23  ;;  %v3054_v10 = vpop.permute.xlu0 %3053  ;;  %v3221_v22 = vand.u32 2147483647, %v5666_v39 }
 0x225   : > { %v2597_v8 = vmax.f32 %v2217_v30, 0.0  ;;  %v2663_v29 = vmax.f32 %v2382_v19, 0.0  ;;  %v3186_v48 = vadd.f32 %v4691_v9, %v3185_v16  ;;  %v3198_v30 = vmul.f32 %v5718_v15, %v5657_v40 }
 0x226   : > { %v2474_v63 = vmax.f32 %v1910_v53, 0.0  ;;  %v2540_v37 = vmax.f32 %v2075_v33, 0.0  ;;  %v3208_v19 = vand.u32 2147483648, %v5657_v40  ;;  %v3223_v53 = vand.u32 2147483648, %v5666_v39 }
 0x227   : > { %v2877_v7 = vadd.f32 %v2876_v47, %v2597_v8  ;;  %v5720_v50 = vadd.f32 %v2952_v21, %v2663_v29  ;;  %v3190_v41 = vsel %vm5714_vm14, %v4691_v9, %v3186_v48  ;;  %v3206_v47 = vand.u32 2147483647, %v5657_v40  ;;  %v3033_v8 = vld [vmem:[%s6157_s3 + $0x8] sm:$0xff] }
 0x228   : > { %v5723_v28 = vadd.f32 %v2733_v45, %v2474_v63  ;;  %v3213_v21 = vmul.f32 %v4695_v26, %v5666_v39  ;;  %v3195_v57 = vsel %vm5706_vm13, %v3194_v2, %v3190_v41  ;;  %v3199_v45 = vsub.f32 1.0, %v3198_v30 }
 0x229   : > { %vm3218_vm1 = vweird.f32 %v4695_v26  ;;  %v5743_v23 = vadd.f32 %v2809_v11, %v2540_v37  ;;  %v3196_v16 = vmul.f32 %v3195_v57, %v5663_v54  ;;  %v3209_v63 = vor.u32 1.1754944e-38, %v3208_v19  ;;  %v5765_v19 = vld [vmem:[%s6156_s2] ss:$0 sm:$0xff] }
 0x22a   : > { %v2219_v33 = vpop.f32.mrf.mxu2  ;;  %v2384_v49 = vpop.f32.mrf.mxu3  ;;  %v3214_v9 = vsub.f32 1.0, %v3213_v21  ;;  %v5747_v60 = vunpack.c.l.b16 %v3307_v24  ;;  %v3200_v2 = vmul.f32 %v5718_v15, %v3199_v45  ;;  %vm5750_vm4 = vcmp.eq.f32.partialorder %v3206_v47, 8.507059e+37  ;;  %vm5758_vm6 = vmor %vm3217_vm0, %vm3218_vm1  ;;  %v3038_v21 = vld [vmem:[%s6157_s3 + $0x30] sm:$0xff] }
 0x22b   : > { %v1911_v29 = vpop.f32.mrf.mxu0  ;;  %v5741_v36 = vpop.f32.mrf.mxu1  ;;  %vm5754_vm5 = vcmp.eq.f32.partialorder %v3221_v22, 8.507059e+37  ;;  %v3224_v54 = vor.u32 1.1754944e-38, %v3223_v53  ;;  %v3098_v37 = vmul.f32 %v3054_v10, %v3033_v8  ;;  %v2220_v24 = vadd.f32 %v5765_v19, %v2219_v33 }
 0x22c   : > { %v3215_v39 = vmul.f32 %v4695_v26, %v3214_v9  ;;  %v2385_v41 = vadd.f32 %v5765_v19, %v2384_v49  ;;  %v3089_v47 = vpop.permute.xlu2 %3088  ;;  %v3236_v45 = vand.u32 2147483647, %v5682_v5  ;;  %v3238_v10 = vand.u32 2147483648, %v5682_v5  ;;  %v4697_v33 = vpop.eup %4696 }
 0x22d   : > { %v3302_v22 = vpack.c.bf16 %v3196_v16, %v3196_v16  ;;  %v3113_v53 = vsel %vm3105_vm2, %v3098_v37, 0.0  ;;  %v2598_v8 = vmax.f32 %v2220_v24, 0.0  ;;  %v3201_v49 = vadd.f32 %v5718_v15, %v3200_v2 }
 0x22e   : > { %v3216_v57 = vadd.f32 %v4695_v26, %v3215_v39  ;;  %v2664_v9 = vmax.f32 %v2385_v41, 0.0  ;;  %v3114_v17 = vrot.slane %v3113_v53, 4  ;;  %v3103_v59 = vmul.f32 %v3089_v47, %v3038_v21 }
 0x22f   : > { %v3228_v37 = vmul.f32 %v4697_v33, %v5682_v5  ;;  %vm3233_vm9 = vweird.f32 %v4697_v33  ;;  %v5790_v2 = vadd.f32 %v2877_v7, %v2598_v8  ;;  %v5804_v7 = vrot.slane %v5599_v4, 6  ;;  %v3096_v8 = vpop.permute.xlu1 %3095 }
 0x230   : > { %v3220_v3 = vsel %vm5758_vm6, %v4695_v26, %v3216_v57  ;;  %v3115_v41 = vadd.f32 %v3114_v17, %v3113_v53  ;;  %v5796_v40 = vadd.f32 %v5720_v50, %v2664_v9  ;;  %v3148_v47 = vsel %vm3105_vm2, %v3103_v59, 0.0  ;;  %v3039_v17 = vld [vmem:[%s6157_s3 + $0x38] sm:$0xff]  ;;  %vm5822_vm11 = vmor %vm3232_vm7, %vm3233_vm9 }
 0x231   : > { %v3225_v16 = vsel %vm5754_vm5, %v3224_v54, %v3220_v3  ;;  %v3229_v3 = vsub.f32 1.0, %v3228_v37  ;;  %v3149_v54 = vrot.slane %v3148_v47, 4  ;;  %v1912_v57 = vadd.f32 %v5765_v19, %v1911_v29 }
 0x232   : > { %v2221_v11 = vpop.f32.mrf.mxu2  ;;  %v5792_v26 = vpop.f32.mrf.mxu3  ;;  %v3226_v24 = vmul.f32 %v3225_v16, %v5620_v35  ;;  %v3205_v59 = vsel %vm5783_vm8, %v5718_v15, %v3201_v49  ;;  %v3116_v53 = vrot.slane %v3115_v41, 2  ;;  %vm5814_vm10 = vcmp.eq.f32.partialorder %v3236_v45, 8.507059e+37 }
 0x233   : > { %v5799_v21 = vpop.f32.mrf.mxu0  ;;  %v5801_v30 = vpop.f32.mrf.mxu1  ;;  %v3230_v9 = vmul.f32 %v4697_v33, %v3229_v3  ;;  %v3150_v37 = vadd.f32 %v3149_v54, %v3148_v47  ;;  %4698 = vrcp.f32 %v5804_v7  ;;  %v3239_v35 = vor.u32 1.1754944e-38, %v3238_v10 }
 0x234   : > { %v3304_v50 = vpack.c.bf16 %v3226_v24, %v3226_v24  ;;  %v5826_v39 = vunpack.c.l.b16 %v3302_v22  ;;  %v3117_v15 = vadd.f32 %v3116_v53, %v3115_v41  ;;  %v3104_v49 = vmul.f32 %v3096_v8, %v3039_v17 }
 0x235   : > { %v3210_v45 = vsel %vm5750_vm4, %v3209_v63, %v3205_v59  ;;  %v3231_v24 = vadd.f32 %v4697_v33, %v3230_v9  ;;  %v3151_v3 = vrot.slane %v3150_v37, 2  ;;  %v2475_v47 = vmax.f32 %v1912_v57, 0.0 }
 0x236   : > { %v5830_v54 = vunpack.c.l.b16 %v3304_v50  ;;  %v3118_v32 = vrot.slane %v3117_v15, 1  ;;  %vm3277_vm12 = vweird.f32 %v5804_v7  ;;  %v5835_v5 = vadd.f32 %v5765_v19, %v5741_v36 }
 0x237   : > { %vm3015_vm13 = vcmask 1041409   ;;  %v3235_v10 = vsel %vm5822_vm11, %v4697_v33, %v3231_v24  ;;  %v3152_v22 = vadd.f32 %v3151_v3, %v3150_v37  ;;  %v3281_v48 = vand.u32 2147483647, %v5804_v7 }
 0x238   : > { %v5841_v63 = vadd.f32 %v5723_v28, %v2475_v47  ;;  %v3240_v8 = vsel %vm5814_vm10, %v3239_v35, %v3235_v10  ;;  %v3119_v17 = vadd.f32 %v3118_v32, %v3117_v15  ;;  %v3155_v36 = vsel %vm3105_vm2, %v3104_v49, 0.0 }
 0x239   : > { %v5851_v59 = vrot.slane %v5599_v4, 7  ;;  %v4699_v53 = vpop.eup %4698  ;;  %vm3017_vm14 = vcmask 1042434   ;;  %v3241_v28 = vmul.f32 %v3240_v8, %v5661_v27  ;;  %v3283_v9 = vand.u32 2147483648, %v5804_v7 }
 0x23a   : > { %v5843_v41 = vpop.f32.mrf.mxu2  ;;  %v5845_v57 = vpop.f32.mrf.mxu3  ;;  %v3156_v37 = vrot.slane %v3155_v36, 4  ;;  %v2222_v29 = vadd.f32 %v5765_v19, %v2221_v11  ;;  %v3211_v16 = vmul.f32 %v3210_v45, %v3119_v17  ;;  %v3153_v35 = vrot.slane %v3152_v22, 1 }
 0x23b   : > { %v1916_v33 = vpop.f32.mrf.mxu0  ;;  %v5853_v50 = vpop.f32.mrf.mxu1  ;;  %v3273_v32 = vmul.f32 %v4699_v53, %v5804_v7  ;;  %4700 = vrcp.f32 %v5851_v59  ;;  %v3336_v4 = vrot.slane %v5830_v54, 6  ;;  %vm5861_vm15 = vcmp.eq.f32.partialorder %v3281_v48, 8.507059e+37 }
 0x23c   : > { %v3157_v27 = vadd.f32 %v3156_v37, %v3155_v36  ;;  %v3305_v24 = vpack.c.bf16 %v3241_v28, %v3241_v28  ;;  %v3303_v3 = vpack.c.bf16 %v3211_v16, %v3211_v16  ;;  %vm3278_vm0 = vweird.f32 %v4699_v53 }
 0x23d   : > { %v3274_v47 = vsub.f32 1.0, %v3273_v32  ;;  %v3296_v45 = vand.u32 2147483647, %v5851_v59  ;;  %v2599_v10 = vmax.f32 %v2222_v29, 0.0  ;;  %v2387_v8 = vadd.f32 %v5765_v19, %v5792_v26  ;;  %vm5871_vm3 = vmor %vm3277_vm12, %vm3278_vm0 }
 0x23e   : > { %v3158_v11 = vrot.slane %v3157_v27, 2  ;;  %v3327_v17 = vunpack.c.l.b16 %v3303_v3  ;;  %v3154_v54 = vadd.f32 %v3153_v35, %v3152_v22  ;;  %v3284_v12 = vor.u32 1.1754944e-38, %v3283_v9 }
 0x23f   : > { %v3275_v48 = vmul.f32 %v4699_v53, %v3274_v47  ;;  %vm3019_vm1 = vcmask 1043459   ;;  %v3298_v37 = vand.u32 2147483648, %v5851_v59  ;;  %v2879_v16 = vadd.f32 %v5790_v2, %v2599_v10 }
 0x240   : > { %v3159_v28 = vadd.f32 %v3158_v11, %v3157_v27  ;;  %v2665_v29 = vmax.f32 %v2387_v8, 0.0  ;;  %v3329_v26 = vunpack.c.l.b16 %v3305_v24  ;;  %v3334_v3 = vrot.slane %v3327_v17, 7 }
 0x241   : > { %v4701_v49 = vpop.eup %4700  ;;  %v3276_v22 = vadd.f32 %v4699_v53, %v3275_v48  ;;  %v1915_v9 = vadd.f32 %v5765_v19, %v5799_v21  ;;  %vm3292_vm4 = vweird.f32 %v5851_v59  ;;  %vm5883_vm5 = vcmp.eq.f32.partialorder %v3296_v45, 8.507059e+37 }
 0x242   : > { %v2226_v32 = vpop.f32.mrf.mxu2  ;;  %v3288_v47 = vmul.f32 %v4701_v49, %v5851_v59  ;;  %v2955_v2 = vadd.f32 %v5796_v40, %v2665_v29  ;;  %v2391_v11 = vpop.f32.mrf.mxu3  ;;  %v3335_v24 = vsel %vm3015_vm13, %v3334_v3, %v5826_v39  ;;  %v3160_v10 = vrot.slane %v3159_v28, 1 }
 0x243   : > { %v1919_v35 = vpop.f32.mrf.mxu0  ;;  %v5879_v7 = vpop.f32.mrf.mxu1  ;;  %v3280_v21 = vsel %vm5871_vm3, %v4699_v53, %v3276_v22  ;;  %v2476_v8 = vmax.f32 %v1915_v9, 0.0  ;;  %vm3293_vm6 = vweird.f32 %v4701_v49  ;;  %v3299_v45 = vor.u32 1.1754944e-38, %v3298_v37 }
 0x244   : > { %v3285_v17 = vsel %vm5861_vm15, %v3284_v12, %v3280_v21  ;;  %v3289_v48 = vsub.f32 1.0, %v3288_v47  ;;  %v3338_v55 = vrot.slane %v3329_v26, 5  ;;  %v3337_v31 = vsel %vm3017_vm14, %v3336_v4, %v3335_v24  ;;  %vm5903_vm7 = vmor %vm3292_vm4, %vm3293_vm6 }
 0x245   : > { %v3286_v14 = vmul.f32 %v3285_v17, %v3154_v54  ;;  %v2736_v40 = vadd.f32 %v5841_v63, %v2476_v8  ;;  %v2225_v39 = vadd.f32 %v5765_v19, %v5843_v41  ;;  %v2390_v53 = vadd.f32 %v5765_v19, %v5845_v57 }
 0x246   : > { %v3290_v29 = vmul.f32 %v4701_v49, %v3289_v48  ;;  %v1917_v36 = vadd.f32 %v5765_v19, %v1916_v33  ;;  %v3161_v12 = vadd.f32 %v3160_v10, %v3159_v28  ;;  %v2227_v4 = vadd.f32 %v5765_v19, %v2226_v32 }
 0x247   : > { %v3308_v15 = vpack.c.bf16 %v3286_v14, %v3286_v14  ;;  %v2392_v63 = vadd.f32 %v5765_v19, %v2391_v11  ;;  %v2600_v26 = vmax.f32 %v2225_v39, 0.0  ;;  %v2666_v41 = vmax.f32 %v2390_v53, 0.0 }
 0x248   : > { %v3291_v54 = vadd.f32 %v4701_v49, %v3290_v29  ;;  %v2477_v3 = vmax.f32 %v1917_v36, 0.0  ;;  %v2080_v14 = vadd.f32 %v5765_v19, %v5801_v30  ;;  %v2601_v33 = vmax.f32 %v2227_v4, 0.0 }
 0x249   : > { %v3332_v57 = vunpack.c.l.b16 %v3308_v15  ;;  %v2667_v28 = vmax.f32 %v2392_v63, 0.0  ;;  %v2880_v24 = vadd.f32 %v2879_v16, %v2600_v26  ;;  %v2956_v32 = vadd.f32 %v2955_v2, %v2666_v41 }
 0x24a   : > { %v2229_v22 = vpop.f32.mrf.mxu2  ;;  %v3295_v47 = vsel %vm5903_vm7, %v4701_v49, %v3291_v54  ;;  %v2737_v21 = vadd.f32 %v2736_v40, %v2477_v3  ;;  %v3339_v11 = vsel %vm3019_vm1, %v3338_v55, %v3337_v31  ;;  %v6222_v10 = vmax.f32 %v5835_v5, 0.0  ;;  %v2394_v16 = vpop.f32.mrf.mxu3 }
 0x24b   : > { %v1921_v59 = vpop.f32.mrf.mxu0  ;;  %v2086_v9 = vpop.f32.mrf.mxu1  ;;  %v3300_v17 = vsel %vm5883_vm5, %v3299_v45, %v3295_v47  ;;  %v1920_v30 = vadd.f32 %v5765_v19, %v1919_v35  ;;  %v2082_v29 = vadd.f32 %v5765_v19, %v5853_v50  ;;  %v2881_v39 = vadd.f32 %v2880_v24, %v2601_v33 }
 0x24c   : > { %v2811_v8 = vadd.f32 %v5743_v23, %v6222_v10  ;;  %v3301_v48 = vmul.f32 %v3300_v17, %v3161_v12  ;;  %v2957_v49 = vadd.f32 %v2956_v32, %v2667_v28  ;;  %v3344_v2 = vrot.slane %v3332_v57, 2 }
 0x24d   : > { %v2478_v40 = vmax.f32 %v1920_v30, 0.0  ;;  %vm3021_vm8 = vcmask 1044484   ;;  %vm3023_vm9 = vcmask 1045509   ;;  %v2542_v55 = vmax.f32 %v2080_v14, 0.0 }
 0x24e   : > { %v3309_v31 = vpack.c.bf16 %v3301_v48, %v3301_v48  ;;  %vm3025_vm10 = vcmask 1046534   ;;  %v6223_v23 = vrot.slane %v5694_v61, 4  ;;  %v6224_v35 = vrot.slane %v5747_v60, 3 }
 0x24f   : > { %v2738_v27 = vadd.f32 %v2737_v21, %v2478_v40  ;;  %v2230_v50 = vadd.f32 %v5765_v19, %v2229_v22  ;;  %v2395_v53 = vadd.f32 %v5765_v19, %v2394_v16  ;;  %v2543_v15 = vmax.f32 %v2082_v29, 0.0 }
 0x250   : > { %v3341_v5 = vsel %vm3021_vm8, %v6223_v23, %v3339_v11  ;;  %v3333_v36 = vunpack.c.l.b16 %v3309_v31  ;;  %v2085_v12 = vadd.f32 %v5765_v19, %v5879_v7  ;;  %v1922_v37 = vadd.f32 %v5765_v19, %v1921_v59 }
 0x251   : > { %v3343_v45 = vsel %vm3023_vm9, %v6224_v35, %v3341_v5  ;;  %vm3027_vm11 = vcmask 1047559   ;;  %v2602_v63 = vmax.f32 %v2230_v50, 0.0  ;;  %v2668_v60 = vmax.f32 %v2395_v53, 0.0 }
 0x252   : > { %v5933_v4 = vpop.f32.mrf.mxu2  ;;  %v3345_v61 = vsel %vm3025_vm10, %v3344_v2, %v3343_v45  ;;  %v3346_v41 = vrot.slane %v3333_v36, 1  ;;  %v2479_v3 = vmax.f32 %v1922_v37, 0.0  ;;  %v2087_v22 = vadd.f32 %v5765_v19, %v2086_v9  ;;  %v5955_v35 = vpop.f32.mrf.mxu3 }
 0x253   : > { %v1924_v54 = vpop.f32.mrf.mxu0  ;;  %v2089_v26 = vpop.f32.mrf.mxu1  ;;  %v2812_v14 = vadd.f32 %v2811_v8, %v2542_v55  ;;  %v5938_v33 = vadd.f32 %v2881_v39, %v2602_v63  ;;  %v5940_v7 = vadd.f32 %v2957_v49, %v2668_v60  ;;  %v2544_v28 = vmax.f32 %v2085_v12, 0.0 }
 0x254   : > { %v1925_v57 = vadd.f32 %v5765_v19, %v1924_v54  ;;  %v3347_v59 = vsel %vm3027_vm11, %v3346_v41, %v3345_v61  ;;  %v2739_v47 = vadd.f32 %v2738_v27, %v2479_v3  ;;  %v2090_v21 = vadd.f32 %v5765_v19, %v2089_v26 }
 0x255   : > { %v3348_v32 = vpack.c.b16 %v3347_v59, %v3347_v59  ;;  %v2813_v11 = vadd.f32 %v2812_v14, %v2543_v15  ;;  %v2545_v10 = vmax.f32 %v2087_v22, 0.0  ;;  %v2095_v39 = vadd.f32 %v5765_v19, %v4986_v43 }
 0x256   : > { %v2480_v24 = vmax.f32 %v1925_v57, 0.0  ;;  %v2546_v30 = vmax.f32 %v2090_v21, 0.0  ;;  %v2097_v40 = vadd.f32 %v5765_v19, %v4993_v51  ;;  %v2100_v27 = vadd.f32 %v5765_v19, %v5016_v62 }
 0x257   : > { %4413 = vmatmul.msk.bf16.vlgmr.msrb.gmra.mxu1 %vm3105_vm2, %v3348_v32  ;;  %v2814_v9 = vadd.f32 %v2813_v11, %v2544_v28  ;;  %v2548_v5 = vmax.f32 %v2095_v39, 0.0  ;;  %v2102_v53 = vadd.f32 %v5765_v19, %v5022_v6  ;;  %v2711_v39 = vrot.slane %v5402_v20, 4 }
 0x258   : > { %v2740_v17 = vadd.f32 %v2739_v47, %v2480_v24  ;;  %v2549_v43 = vmax.f32 %v2097_v40, 0.0  ;;  %v2550_v37 = vmax.f32 %v2100_v27, 0.0 }
 0x259   : > { %v2815_v49 = vadd.f32 %v2814_v9, %v2545_v10  ;;  %v2551_v63 = vmax.f32 %v2102_v53, 0.0  ;;  %v4722_v9 = vmov 256.0   ;;  %v2232_v53 = vadd.f32 %v5765_v19, %v5933_v4 }
 0x25a   : > { %v5945_v8 = vpop.f32.mrf.mxu2  ;;  %v5962_v41 = vpop.f32.mrf.mxu3  ;;  %4702 = vrcp.f32 %v4722_v9 }
 0x25b   : > { %v1926_v48 = vpop.f32.mrf.mxu0  ;;  %v2091_v29 = vpop.f32.mrf.mxu1  ;;  %v2816_v31 = vadd.f32 %v2815_v49, %v2546_v30 }
 0x25c   : > { %v1927_v16 = vadd.f32 %v5765_v19, %v1926_v48  ;;  %v2092_v2 = vadd.f32 %v5765_v19, %v2091_v29 }
 0x25e   : > { %v2481_v55 = vmax.f32 %v1927_v16, 0.0  ;;  %v2547_v23 = vmax.f32 %v2092_v2, 0.0 }
 0x260   : > { %v2741_v45 = vadd.f32 %v2740_v17, %v2481_v55  ;;  %v2817_v50 = vadd.f32 %v2816_v31, %v2547_v23  ;;  %v4703_v2 = vpop.eup %4702  ;;  %v2712_v31 = vadd.f32 %v2711_v39, %v5402_v20 }
 0x261   : > { %v2977_v23 = vmul.f32 256.0, %v4703_v2  ;;  %vm2981_vm2 = vweird.f32 %v4703_v2 }
 0x262   : > { %v2818_v36 = vadd.f32 %v2817_v50, %v2548_v5  ;;  %v2236_v15 = vpop.f32.mrf.mxu2  ;;  %v5965_v47 = vpop.f32.mrf.mxu3 }
 0x263   : > { %v1929_v12 = vpop.f32.mrf.mxu0 }
 0x264   : > { %v2819_v51 = vadd.f32 %v2818_v36, %v2549_v43  ;;  %v1930_v61 = vadd.f32 %v5765_v19, %v1929_v12  ;;  %v2978_v43 = vsub.f32 1.0, %v2977_v23 }
 0x266   : > { %v2820_v60 = vadd.f32 %v2819_v51, %v2550_v37  ;;  %v2482_v54 = vmax.f32 %v1930_v61, 0.0  ;;  %v2235_v37 = vadd.f32 %v5765_v19, %v5945_v8  ;;  %v2979_v20 = vmul.f32 %v4703_v2, %v2978_v43 }
 0x268   : > { %v5960_v26 = vadd.f32 %v2820_v60, %v2551_v63  ;;  %v2742_v62 = vadd.f32 %v2741_v45, %v2482_v54  ;;  %v2713_v45 = vrot.slane %v2712_v31, 2  ;;  %v2603_v63 = vmax.f32 %v2232_v53, 0.0 }
 0x269   : > { %v2237_v60 = vadd.f32 %v5765_v19, %v2236_v15 }
 0x26a   : > { %v2239_v3 = vpop.f32.mrf.mxu2  ;;  %v5969_v30 = vpop.f32.mrf.mxu3  ;;  %v2714_v51 = vadd.f32 %v2713_v45, %v2712_v31 }
 0x26b   : > { %v1931_v22 = vpop.f32.mrf.mxu0 }
 0x26c   : > { %v1932_v57 = vadd.f32 %v5765_v19, %v1931_v22  ;;  %v2240_v22 = vadd.f32 %v5765_v19, %v2239_v3 }
 0x26e   : > { %v2483_v6 = vmax.f32 %v1932_v57, 0.0  ;;  %v2715_v57 = vrot.slane %v2714_v51, 1  ;;  %v2606_v15 = vmax.f32 %v2240_v22, 0.0 }
 0x270   : > { %v2743_v14 = vadd.f32 %v2742_v62, %v2483_v6  ;;  %v2604_v62 = vmax.f32 %v2235_v37, 0.0 }
 0x272   : > { %v2241_v28 = vpop.f32.mrf.mxu2  ;;  %v5974_v5 = vpop.f32.mrf.mxu3 }
 0x273   : > { %v1934_v59 = vpop.f32.mrf.mxu0  ;;  %v2242_v8 = vadd.f32 %v5765_v19, %v2241_v28 }
 0x274   : > { %v1935_v24 = vadd.f32 %v5765_v19, %v1934_v59  ;;  %v2980_v59 = vadd.f32 %v4703_v2, %v2979_v20 }
 0x276   : > { %v2484_v32 = vmax.f32 %v1935_v24, 0.0  ;;  %v2883_v24 = vadd.f32 %v5938_v33, %v2603_v63 }
 0x278   : > { %v2744_v21 = vadd.f32 %v2743_v14, %v2484_v32  ;;  %v2605_v32 = vmax.f32 %v2237_v60, 0.0 }
 0x27a   : > { %v2244_v11 = vpop.f32.mrf.mxu2  ;;  %v5983_v6 = vpop.f32.mrf.mxu3 }
 0x27b   : > { %v1936_v10 = vpop.f32.mrf.mxu0  ;;  %v2245_v9 = vadd.f32 %v5765_v19, %v2244_v11 }
 0x27c   : > { %v1937_v17 = vadd.f32 %v5765_v19, %v1936_v10 }
 0x27e   : > { %v2485_v48 = vmax.f32 %v1937_v17, 0.0  ;;  %v2884_v17 = vadd.f32 %v2883_v24, %v2604_v62 }
 0x280   : > { %v2745_v29 = vadd.f32 %v2744_v21, %v2485_v48  ;;  %v2716_v48 = vadd.f32 %v2715_v57, %v2714_v51  ;;  %v2885_v39 = vadd.f32 %v2884_v17, %v2605_v32 }
 0x282   : > { %v2246_v49 = vpop.f32.mrf.mxu2  ;;  %v2886_v33 = vadd.f32 %v2885_v39, %v2606_v15 }
 0x283   : > { %v1939_v16 = vpop.f32.mrf.mxu0 }
 0x284   : > { %v1940_v40 = vadd.f32 %v5765_v19, %v1939_v16  ;;  %v2607_v16 = vmax.f32 %v2242_v8, 0.0 }
 0x286   : > { %v2486_v55 = vmax.f32 %v1940_v40, 0.0  ;;  %v2247_v40 = vadd.f32 %v5765_v19, %v2246_v49  ;;  %v2887_v11 = vadd.f32 %v2886_v33, %v2607_v16  ;;  %v5997_v49 = vpop.f32.mrf.mxu3 }
 0x288   : > { %v2746_v27 = vadd.f32 %v2745_v29, %v2486_v55  ;;  %v5988_v29 = vsel %vm2981_vm2, %v4703_v2, %v2980_v59  ;;  %v2608_v55 = vmax.f32 %v2245_v9, 0.0  ;;  %v2609_v53 = vmax.f32 %v2247_v40, 0.0 }
 0x289   : > { %v2983_v23 = vmul.f32 %v5988_v29, %v2716_v48  ;;  %v2260_v48 = vadd.f32 %v5765_v19, %v4988_v44  ;;  %v1962_v44 = vadd.f32 %v5765_v19, %v5045_v25 }
 0x28a   : > { %v2249_v50 = vpop.f32.mrf.mxu2 }
 0x28b   : > { %v1941_v36 = vpop.f32.mrf.mxu0  ;;  %v2250_v28 = vadd.f32 %v5765_v19, %v2249_v50  ;;  %v1952_v50 = vadd.f32 %v5765_v19, %v4990_v46  ;;  %v2991_v60 = vpack.c.bf16 %v2983_v23, %v2983_v23 }
 0x28c   : > { %v1942_v12 = vadd.f32 %v5765_v19, %v1941_v36 }
 0x28d   : > { %v2610_v20 = vmax.f32 %v2250_v28, 0.0  ;;  %v2491_v32 = vmax.f32 %v1952_v50, 0.0  ;;  %v1970_v50 = vadd.f32 %v5765_v19, %v5083_v18  ;;  %v2397_v18 = vadd.f32 %v5765_v19, %v5955_v35 }
 0x28e   : > { %v2487_v61 = vmax.f32 %v1942_v12, 0.0  ;;  %v1950_v12 = vadd.f32 %v5765_v19, %v4968_v38  ;;  %v6020_v23 = vpop.f32.mrf.mxu3 }
 0x290   : > { %v2747_v54 = vadd.f32 %v2746_v27, %v2487_v61  ;;  %v2888_v61 = vadd.f32 %v2887_v11, %v2608_v55  ;;  %v2490_v38 = vmax.f32 %v1950_v12, 0.0  ;;  %v2495_v12 = vmax.f32 %v1962_v44, 0.0  ;;  %v6230_v44 = vld [vmem:[#allocation10_spill] sm:$0xff] }
 0x292   : > { %v2748_v4 = vrot.slane %v2747_v54, 4  ;;  %v2251_v14 = vpop.f32.mrf.mxu2  ;;  %v2889_v57 = vadd.f32 %v2888_v61, %v2609_v53 }
 0x293   : > { %v1944_v21 = vpop.f32.mrf.mxu0  ;;  %v2252_v2 = vadd.f32 %v5765_v19, %v2251_v14  ;;  %v1955_v14 = vadd.f32 %v5765_v19, %v5003_v56  ;;  %v1960_v56 = vadd.f32 %v5765_v19, %v5031_v13  ;;  %v1965_v13 = vadd.f32 %v5765_v19, %v5057_v42 }
 0x294   : > { %v2749_v10 = vadd.f32 %v2748_v4, %v2747_v54  ;;  %v1945_v45 = vadd.f32 %v5765_v19, %v1944_v21  ;;  %v2890_v8 = vadd.f32 %v2889_v57, %v2610_v20  ;;  %v1957_v21 = vadd.f32 %v5765_v19, %v5018_v1  ;;  %v6225_v57 = vld [vmem:[#allocation5_spill] sm:$0xff] }
 0x295   : > { %v2611_v4 = vmax.f32 %v2252_v2, 0.0  ;;  %v2492_v16 = vmax.f32 %v1955_v14, 0.0  ;;  %v2262_v1 = vadd.f32 %v5765_v19, %v4995_v52  ;;  %v2494_v11 = vmax.f32 %v1960_v56, 0.0 }
 0x296   : > { %v2750_v3 = vrot.slane %v2749_v10, 2  ;;  %v2488_v62 = vmax.f32 %v1945_v45, 0.0  ;;  %v2493_v28 = vmax.f32 %v1957_v21, 0.0  ;;  %v2614_v45 = vmax.f32 %v2260_v48, 0.0 }
 0x297   : > { %v2615_v2 = vmax.f32 %v2262_v1, 0.0  ;;  %v1967_v52 = vadd.f32 %v5765_v19, %v5072_v0  ;;  %v2496_v25 = vmax.f32 %v1965_v13, 0.0 }
 0x298   : > { %v2751_v31 = vadd.f32 %v2750_v3, %v2749_v10  ;;  %v3007_v10 = vunpack.c.l.b16 %v2991_v60  ;;  %v2891_v3 = vadd.f32 %v2890_v8, %v2611_v4  ;;  %v2498_v60 = vmax.f32 %v1970_v50, 0.0 }
 0x299   : > { %v2497_v20 = vmax.f32 %v1967_v52, 0.0  ;;  %v1977_v4 = vadd.f32 %v5765_v19, %v6225_v57 }
 0x29a   : > { %v2752_v27 = vrot.slane %v2751_v31, 1  ;;  %v2254_v43 = vpop.f32.mrf.mxu2 }
 0x29b   : > { %v1946_v36 = vpop.f32.mrf.mxu0  ;;  %v2255_v63 = vadd.f32 %v5765_v19, %v2254_v43  ;;  %v2501_v8 = vmax.f32 %v1977_v4, 0.0  ;;  %v6234_v4 = vld [vmem:[#allocation14_spill] sm:$0xff] }
 0x29c   : > { %v2753_v37 = vadd.f32 %v2752_v27, %v2751_v31  ;;  %v1947_v51 = vadd.f32 %v5765_v19, %v1946_v36 }
 0x29d   : > { %v2612_v46 = vmax.f32 %v2255_v63, 0.0  ;;  %v1972_v63 = vadd.f32 %v5765_v19, %v5098_v34 }
 0x29e   : > { %v2984_v54 = vmul.f32 %v5988_v29, %v2753_v37  ;;  %v2489_v22 = vmax.f32 %v1947_v51, 0.0 }
 0x29f   : > { %v2892_v33 = vadd.f32 %v2891_v3, %v2612_v46  ;;  %v2499_v0 = vmax.f32 %v1972_v63, 0.0 }
 0x2a0   : > { %v2992_v59 = vpack.c.bf16 %v2984_v54, %v2984_v54  ;;  %v2754_v24 = vadd.f32 %v2489_v22, %v2488_v62  ;;  %v1975_v54 = vadd.f32 %v5765_v19, %v5109_v58  ;;  %v2416_v62 = vpop.f32.mrf.mxu3  ;;  %v6227_v58 = vld [vmem:[#allocation7_spill] sm:$0xff] }
 0x2a1   : > { %v1982_v46 = vadd.f32 %v5765_v19, %v6227_v58  ;;  %v2417_v57 = vadd.f32 %v5765_v19, %v2416_v62 }
 0x2a2   : > { %v3008_v17 = vunpack.c.l.b16 %v2992_v59  ;;  %v2755_v15 = vadd.f32 %v2754_v24, %v2490_v38  ;;  %v2256_v9 = vpop.f32.mrf.mxu2  ;;  %v2500_v14 = vmax.f32 %v1975_v54, 0.0  ;;  %v6226_v59 = vld [vmem:[#allocation6_spill] sm:$0xff] }
 0x2a3   : > { %v2257_v39 = vadd.f32 %v5765_v19, %v2256_v9  ;;  %v1980_v24 = vadd.f32 %v5765_v19, %v6226_v59  ;;  %v6228_v9 = vld [vmem:[#allocation8_spill] sm:$0xff] }
 0x2a4   : > { %v6014_v40 = vsel %vm3015_vm13, %v3008_v17, %v3007_v10  ;;  %v2756_v31 = vadd.f32 %v2755_v15, %v2491_v32  ;;  %v2400_v32 = vadd.f32 %v5765_v19, %v5962_v41  ;;  %v2669_v10 = vmax.f32 %v2397_v18, 0.0  ;;  %v6229_v41 = vld [vmem:[#allocation9_spill] sm:$0xff] }
 0x2a5   : > { %v2613_v55 = vmax.f32 %v2257_v39, 0.0  ;;  %v2402_v17 = vadd.f32 %v5765_v19, %v5965_v47  ;;  %v2502_v15 = vmax.f32 %v1980_v24, 0.0  ;;  %v1985_v35 = vadd.f32 %v5765_v19, %v6228_v9 }
 0x2a6   : > { %v2757_v27 = vadd.f32 %v2756_v31, %v2492_v16  ;;  %v2670_v3 = vmax.f32 %v2400_v32, 0.0  ;;  %v2405_v39 = vadd.f32 %v5765_v19, %v5969_v30  ;;  %v2503_v16 = vmax.f32 %v1982_v46, 0.0  ;;  %v6235_v32 = vld [vmem:[#allocation15_spill] sm:$0xff] }
 0x2a7   : > { %v2893_v43 = vadd.f32 %v2892_v33, %v2613_v55  ;;  %v1987_v56 = vadd.f32 %v5765_v19, %v6229_v41  ;;  %v2959_v33 = vadd.f32 %v5940_v7, %v2669_v10  ;;  %v2671_v55 = vmax.f32 %v2402_v17, 0.0  ;;  %v6236_v17 = vld [vmem:[#allocation16_spill] sm:$0xff] }
 0x2a8   : > { %v2758_v53 = vadd.f32 %v2757_v27, %v2493_v28  ;;  %v2419_v31 = vpop.f32.mrf.mxu3  ;;  %v2407_v47 = vadd.f32 %v5765_v19, %v5974_v5  ;;  %v2504_v28 = vmax.f32 %v1985_v35, 0.0  ;;  %v1990_v27 = vadd.f32 %v5765_v19, %v6230_v44 }
 0x2a9   : > { %v2894_v36 = vadd.f32 %v2893_v43, %v2614_v45  ;;  %v2960_v43 = vadd.f32 %v2959_v33, %v2670_v3  ;;  %v2410_v30 = vadd.f32 %v5765_v19, %v5983_v6  ;;  %v2505_v13 = vmax.f32 %v1987_v56, 0.0  ;;  %v6238_v33 = vld [vmem:[#allocation18_spill] sm:$0xff] }
 0x2aa   : > { %v2759_v37 = vadd.f32 %v2758_v53, %v2494_v11  ;;  %v2672_v11 = vmax.f32 %v2405_v39, 0.0  ;;  %v6231_v53 = vld [vmem:[#allocation11_spill] sm:$0xff]  ;;  %v2412_v5 = vadd.f32 %v5765_v19, %v5997_v49  ;;  %v2506_v52 = vmax.f32 %v1990_v27, 0.0  ;;  %v6237_v39 = vld [vmem:[#allocation17_spill] sm:$0xff] }
 0x2ab   : > { %v6026_v51 = vadd.f32 %v2894_v36, %v2615_v2  ;;  %v1992_v2 = vadd.f32 %v5765_v19, %v6231_v53  ;;  %v2961_v7 = vadd.f32 %v2960_v43, %v2671_v55  ;;  %v2415_v6 = vadd.f32 %v5765_v19, %v6020_v23  ;;  %v6239_v27 = vld [vmem:[#allocation19_spill] sm:$0xff]  ;;  %v6240_v53 = vld [vmem:[#allocation20_spill] sm:$0xff] }
 0x2ac   : > { %v2760_v61 = vadd.f32 %v2759_v37, %v2495_v12  ;;  %v2673_v12 = vmax.f32 %v2407_v47, 0.0  ;;  %v6232_v37 = vld [vmem:[#allocation12_spill] sm:$0xff]  ;;  %v2010_v55 = vadd.f32 %v5765_v19, %v6238_v33 }
 0x2ad   : > { %v2507_v63 = vmax.f32 %v1992_v2, 0.0  ;;  %v2676_v24 = vmax.f32 %v2415_v6, 0.0  ;;  %v2015_v2 = vadd.f32 %v5765_v19, %v6240_v53 }
 0x2ae   : > { %v2761_v42 = vadd.f32 %v2760_v61, %v2496_v25  ;;  %v1995_v25 = vadd.f32 %v5765_v19, %v6232_v37  ;;  %v2962_v61 = vadd.f32 %v2961_v7, %v2672_v11  ;;  %v2822_v11 = vrot.slane %v5960_v26, 4  ;;  %v6242_v37 = vld [vmem:[#allocation21_spill] sm:$0xff] }
 0x2b0   : > { %v2762_v22 = vadd.f32 %v2761_v42, %v2497_v20  ;;  %v2674_v20 = vmax.f32 %v2410_v30, 0.0  ;;  %v6233_v42 = vld [vmem:[#allocation13_spill] sm:$0xff]  ;;  %v2508_v49 = vmax.f32 %v1995_v25, 0.0  ;;  %v2017_v25 = vadd.f32 %v5765_v19, %v6242_v37 }
 0x2b1   : > { %v2823_v6 = vadd.f32 %v2822_v11, %v5960_v26 }
 0x2b2   : > { %v2763_v38 = vadd.f32 %v2762_v22, %v2498_v60  ;;  %v1997_v60 = vadd.f32 %v5765_v19, %v6233_v42  ;;  %v2963_v22 = vadd.f32 %v2962_v61, %v2673_v12  ;;  %v4685_v42 = vld [vmem:[%s6160_s6] ss:$0 sm:$0xff] }
 0x2b4   : > { %v2764_v34 = vadd.f32 %v2763_v38, %v2499_v0  ;;  %v2675_v0 = vmax.f32 %v2412_v5, 0.0  ;;  %v2000_v38 = vadd.f32 %v5765_v19, %v6234_v4  ;;  %v2964_v59 = vadd.f32 %v2963_v22, %v2674_v20 }
 0x2b5   : > { %v2509_v23 = vmax.f32 %v1997_v60, 0.0  ;;  %v2896_v5 = vrot.slane %v6026_v51, 4  ;;  %v2516_v60 = vmax.f32 %v2015_v2, 0.0  ;;  %v2517_v4 = vmax.f32 %v2017_v25, 0.0 }
 0x2b6   : > { %v2765_v21 = vadd.f32 %v2764_v34, %v2500_v14  ;;  %v2421_v14 = vpop.f32.mrf.mxu3  ;;  %v2420_v34 = vadd.f32 %v5765_v19, %v2419_v31  ;;  %v2965_v46 = vadd.f32 %v2964_v59, %v2675_v0  ;;  %v2510_v62 = vmax.f32 %v2000_v38, 0.0  ;;  %v6245_v38 = vld [vmem:[#allocation23_spill] sm:$0xff] }
 0x2b7   : > { %v2422_v10 = vadd.f32 %v5765_v19, %v2421_v14 }
 0x2b8   : > { %v2766_v48 = vadd.f32 %v2765_v21, %v2501_v8  ;;  %v2002_v8 = vadd.f32 %v5765_v19, %v6235_v32  ;;  %v2677_v21 = vmax.f32 %v2417_v57, 0.0  ;;  %v2966_v35 = vadd.f32 %v2965_v46, %v2676_v24 }
 0x2b9   : > { %v2679_v31 = vmax.f32 %v2422_v10, 0.0  ;;  %v2824_v24 = vrot.slane %v2823_v6, 2 }
 0x2ba   : > { %v2767_v1 = vadd.f32 %v2766_v48, %v2502_v15  ;;  %v2005_v15 = vadd.f32 %v5765_v19, %v6236_v17  ;;  %v2678_v48 = vmax.f32 %v2420_v34, 0.0  ;;  %v2511_v3 = vmax.f32 %v2002_v8, 0.0 }
 0x2bb   : > { %v2967_v56 = vadd.f32 %v2966_v35, %v2677_v21 }
 0x2bc   : > { %v2768_v45 = vadd.f32 %v2767_v1, %v2503_v16  ;;  %v2007_v16 = vadd.f32 %v5765_v19, %v6237_v39  ;;  %v2512_v1 = vmax.f32 %v2005_v15, 0.0 }
 0x2be   : > { %v2769_v36 = vadd.f32 %v2768_v45, %v2504_v28  ;;  %v2968_v28 = vadd.f32 %v2967_v56, %v2678_v48  ;;  %v2513_v44 = vmax.f32 %v2007_v16, 0.0  ;;  %v2012_v45 = vadd.f32 %v5765_v19, %v6239_v27 }
 0x2c0   : > { %v2770_v50 = vadd.f32 %v2769_v36, %v2505_v13  ;;  %v2969_v30 = vadd.f32 %v2968_v28, %v2679_v31  ;;  %v2514_v13 = vmax.f32 %v2010_v55, 0.0  ;;  %v6241_v36 = vld [vmem:[#allocation25_spill] sm:$0xff] }
 0x2c1   : > { %v2859_v7 = vrot.slane %v6241_v36, 4 }
 0x2c2   : > { %v2771_v54 = vadd.f32 %v2770_v50, %v2506_v52  ;;  %v2515_v52 = vmax.f32 %v2012_v45, 0.0  ;;  %v6243_v50 = vld [vmem:[#allocation24_spill] sm:$0xff] }
 0x2c3   : > { %v2933_v61 = vrot.slane %v6243_v50, 4  ;;  %v2860_v0 = vadd.f32 %v2859_v7, %v6241_v36 }
 0x2c4   : > { %v2772_v18 = vadd.f32 %v2771_v54, %v2507_v63  ;;  %v2970_v63 = vrot.slane %v2969_v30, 4  ;;  %v6244_v54 = vld [vmem:[#allocation22_spill] sm:$0xff] }
 0x2c5   : > { %v2020_v22 = vadd.f32 %v5765_v19, %v6244_v54  ;;  %v2934_v26 = vadd.f32 %v2933_v61, %v6243_v50  ;;  %v2861_v8 = vrot.slane %v2860_v0, 2 }
 0x2c6   : > { %v2773_v58 = vadd.f32 %v2772_v18, %v2508_v49  ;;  %v2897_v49 = vadd.f32 %v2896_v5, %v6026_v51  ;;  %v2022_v18 = vadd.f32 %v5765_v19, %v6245_v38  ;;  %v2971_v34 = vadd.f32 %v2970_v63, %v2969_v30 }
 0x2c7   : > { %v2518_v32 = vmax.f32 %v2020_v22, 0.0  ;;  %v2935_v10 = vrot.slane %v2934_v26, 2  ;;  %v2825_v51 = vadd.f32 %v2824_v24, %v2823_v6  ;;  %v2862_v15 = vadd.f32 %v2861_v8, %v2860_v0 }
 0x2c8   : > { %v2774_v9 = vadd.f32 %v2773_v58, %v2509_v23  ;;  %v2898_v46 = vrot.slane %v2897_v49, 2  ;;  %v2519_v21 = vmax.f32 %v2022_v18, 0.0  ;;  %v2972_v17 = vrot.slane %v2971_v34, 2 }
 0x2c9   : > { %v2936_v35 = vadd.f32 %v2935_v10, %v2934_v26  ;;  %v2826_v16 = vrot.slane %v2825_v51, 1  ;;  %v2863_v56 = vrot.slane %v2862_v15, 1 }
 0x2ca   : > { %v2775_v41 = vadd.f32 %v2774_v9, %v2510_v62  ;;  %v2899_v19 = vadd.f32 %v2898_v46, %v2897_v49 }
 0x2cb   : > { %v2937_v55 = vrot.slane %v2936_v35, 1  ;;  %v2827_v28 = vadd.f32 %v2826_v16, %v2825_v51  ;;  %v2864_v27 = vadd.f32 %v2863_v56, %v2862_v15 }
 0x2cc   : > { %v2776_v47 = vadd.f32 %v2775_v41, %v2511_v3  ;;  %v2973_v41 = vadd.f32 %v2972_v17, %v2971_v34  ;;  %v2900_v33 = vrot.slane %v2899_v19, 1 }
 0x2cd   : > { %v2938_v11 = vadd.f32 %v2937_v55, %v2936_v35  ;;  %v2987_v2 = vmul.f32 %v5988_v29, %v2864_v27 }
 0x2ce   : > { %v2777_v43 = vadd.f32 %v2776_v47, %v2512_v1 }
 0x2cf   : > { %v2995_v25 = vpack.c.bf16 %v2987_v2, %v2987_v2 }
 0x2d0   : > { %v2778_v12 = vadd.f32 %v2777_v43, %v2513_v44  ;;  %v2974_v44 = vrot.slane %v2973_v41, 1  ;;  %v2901_v43 = vadd.f32 %v2900_v33, %v2899_v19 }
 0x2d2   : > { %v2779_v20 = vadd.f32 %v2778_v12, %v2514_v13  ;;  %v2986_v13 = vmul.f32 %v5988_v29, %v2827_v28  ;;  %v2975_v53 = vadd.f32 %v2974_v44, %v2973_v41  ;;  %v2988_v7 = vmul.f32 %v5988_v29, %v2901_v43 }
 0x2d3   : > { %v2989_v12 = vmul.f32 %v5988_v29, %v2938_v11 }
 0x2d4   : > { %v2780_v57 = vadd.f32 %v2779_v20, %v2515_v52  ;;  %v3373_v59 = vpop.f32.mrf.mxu1  ;;  %v2994_v52 = vpack.c.bf16 %v2986_v13, %v2986_v13  ;;  %v2990_v37 = vmul.f32 %v5988_v29, %v2975_v53  ;;  %v2996_v61 = vpack.c.bf16 %v2988_v7, %v2988_v7 }
 0x2d5   : > { %v3374_v23 = vadd.f32 %v4685_v42, %v3373_v59  ;;  %v2997_v20 = vpack.c.bf16 %v2989_v12, %v2989_v12 }
 0x2d6   : > { %v2781_v14 = vadd.f32 %v2780_v57, %v2516_v60  ;;  %v3010_v63 = vunpack.c.l.b16 %v2994_v52  ;;  %v2998_v42 = vpack.c.bf16 %v2990_v37, %v2990_v37  ;;  %v3011_v60 = vunpack.c.l.b16 %v2995_v25 }
 0x2d7   : > { %4704 = vtanh.f32 %v3374_v23  ;;  %v3012_v22 = vunpack.c.l.b16 %v2996_v61  ;;  %v3013_v57 = vunpack.c.l.b16 %v2997_v20 }
 0x2d8   : > { %v2782_v58 = vadd.f32 %v2781_v14, %v2517_v4 }
 0x2da   : > { %v2783_v62 = vadd.f32 %v2782_v58, %v2518_v32 }
 0x2dc   : > { %v2784_v9 = vadd.f32 %v2783_v62, %v2519_v21  ;;  %v3375_v3 = vpop.f32.mrf.mxu1 }
 0x2dd   : > { %v4705_v39 = vpop.eup %4704 }
 0x2de   : > { %v2785_v48 = vrot.slane %v2784_v9, 4  ;;  %v3378_v1 = vpack.c.bf16 %v4705_v39, %v4705_v39 }
 0x2e0   : > { %v2786_v31 = vadd.f32 %v2785_v48, %v2784_v9  ;;  %3379 = vst [vmem:[#allocation3] sm:$0xf] %v3378_v1 }
 0x2e2   : > { %v2787_v47 = vrot.slane %v2786_v31, 2 }
 0x2e4   : > { %v2788_v45 = vadd.f32 %v2787_v47, %v2786_v31 }
 0x2e6   : > { %v2789_v30 = vrot.slane %v2788_v45, 1 }
 0x2e8   : > { %v2790_v36 = vadd.f32 %v2789_v30, %v2788_v45 }
 0x2ea   : > { %v2985_v5 = vmul.f32 %v5988_v29, %v2790_v36  ;;  %v3014_v29 = vunpack.c.l.b16 %v2998_v42 }
 0x2ec   : > { %v2993_v50 = vpack.c.bf16 %v2985_v5, %v2985_v5 }
 0x2ee   : > { %v3009_v6 = vunpack.c.l.b16 %v2993_v50 }
 0x2f0   : > { %v3018_v54 = vsel %vm3017_vm14, %v3009_v6, %v6014_v40 }
 0x2f1   : > { %v3020_v0 = vsel %vm3019_vm1, %v3010_v63, %v3018_v54 }
 0x2f2   : > { %v3022_v49 = vsel %vm3021_vm8, %v3011_v60, %v3020_v0 }
 0x2f3   : > { %v3024_v4 = vsel %vm3023_vm9, %v3012_v22, %v3022_v49 }
 0x2f4   : > { %v3026_v38 = vsel %vm3025_vm10, %v3013_v57, %v3024_v4 }
 0x2f5   : > { %v3028_v18 = vsel %vm3027_vm11, %v3014_v29, %v3026_v38 }
 0x2f6   : > { %v3029_v26 = vpack.c.b16 %v3028_v18, %v3028_v18 }
 0x2f8   : > { %3031 = vst [vmem:[#allocation2] sm:$0xf] %v3029_v26 }
 0x2f9 PF: > { %v4660_v40 = vld [vmem:[%s4811_s15 + $0x38] sm:$0xff]  ;;  %v4659_v59 = vld [vmem:[%s4811_s15 + $0x30] sm:$0xff]  ;;  %v4658_v34 = vld [vmem:[%s4811_s15 + $0x28] sm:$0xff]  ;;  %s6246_s24 = scalar_lea.vmem %s6163_s9, %s4796_s23 }
 0x2fa   : > { %v4652_v14 = vld [vmem:[%s4806_s30 + $0x38] sm:$0xff]  ;;  %3462 = vmatpush.bf16.msra.mxu0 %v4660_v40  ;;  %v4651_v24 = vld [vmem:[%s4806_s30 + $0x30] sm:$0xff]  ;;  %v4650_v23 = vld [vmem:[%s4806_s30 + $0x28] sm:$0xff] }
 0x2fb   : > { %3523 = vmatpush.bf16.msra.mxu1 %v4652_v14  ;;  %v4668_v32 = vld [vmem:[%s4816_s18 + $0x38] sm:$0xff]  ;;  %v4667_v8 = vld [vmem:[%s4816_s18 + $0x30] sm:$0xff]  ;;  %v4657_v58 = vld [vmem:[%s4811_s15 + $0x20] sm:$0xff] }
 0x2fc   : > { %3610 = vmatpush.bf16.msra.mxu2 %v4668_v32  ;;  %v4649_v46 = vld [vmem:[%s4806_s30 + $0x20] sm:$0xff]  ;;  %v4666_v21 = vld [vmem:[%s4816_s18 + $0x28] sm:$0xff]  ;;  %v4656_v10 = vld [vmem:[%s4811_s15 + $0x18] sm:$0xff] }
 0x2fd   : > { %v4648_v62 = vld [vmem:[%s4806_s30 + $0x18] sm:$0xff]  ;;  %v4665_v51 = vld [vmem:[%s4816_s18 + $0x20] sm:$0xff]  ;;  %v4655_v17 = vld [vmem:[%s4811_s15 + $0x10] sm:$0xff] }
 0x2fe   : > { %3463 = vmatpush.bf16.msra.mxu0 %v4659_v59  ;;  %v4647_v15 = vld [vmem:[%s4806_s30 + $0x10] sm:$0xff]  ;;  %v4664_v9 = vld [vmem:[%s4816_s18 + $0x18] sm:$0xff]  ;;  %v4654_v19 = vld [vmem:[%s4811_s15 + $0x8] sm:$0xff] }
 0x2ff   : > { %3524 = vmatpush.bf16.msra.mxu1 %v4651_v24  ;;  %v4646_v35 = vld [vmem:[%s4806_s30 + $0x8] sm:$0xff]  ;;  %v4663_v48 = vld [vmem:[%s4816_s18 + $0x10] sm:$0xff]  ;;  %v4653_v3 = vld [vmem:[%s4811_s15] sm:$0xff] }
 0x300   : > { %3611 = vmatpush.bf16.msra.mxu2 %v4667_v8  ;;  %v4645_v39 = vld [vmem:[%s4806_s30] sm:$0xff]  ;;  %v4662_v56 = vld [vmem:[%s4816_s18 + $0x8] sm:$0xff] }
 0x301   : > { %v3397_v16 = vld [vmem:[#allocation3] sm:$0xf]  ;;  %v3380_v41 = vld [vmem:[#allocation2] sm:$0xf] }
 0x302   : > { %3464 = vmatpush.bf16.msra.mxu0 %v4658_v34  ;;  %v4661_v31 = vld [vmem:[%s4816_s18] sm:$0xff] }
 0x303   : > { %3525 = vmatpush.bf16.msra.mxu1 %v4650_v23  ;;  %v4708_v1 = vld [vmem:[%s6246_s24] ss:$0 sm:$0xff] }
 0x304   : > { %3612 = vmatpush.bf16.msra.mxu2 %v4666_v21  ;;  %v4709_v43 = vld [vmem:[%s475_s25] ss:$0 sm:$0xff] }
 0x306   : > { %3465 = vmatpush.bf16.msra.mxu0 %v4657_v58 }
 0x307   : > { %3526 = vmatpush.bf16.msra.mxu1 %v4649_v46 }
 0x308   : > { %3613 = vmatpush.bf16.msra.mxu2 %v4665_v51 }
 0x30a   : > { %3466 = vmatpush.bf16.msra.mxu0 %v4656_v10 }
 0x30b   : > { %3527 = vmatpush.bf16.msra.mxu1 %v4648_v62 }
 0x30c   : > { %3614 = vmatpush.bf16.msra.mxu2 %v4664_v9 }
 0x30e   : > { %3467 = vmatpush.bf16.msra.mxu0 %v4655_v17 }
 0x30f   : > { %3528 = vmatpush.bf16.msra.mxu1 %v4647_v15 }
 0x310   : > { %3615 = vmatpush.bf16.msra.mxu2 %v4663_v48 }
 0x312   : > { %3468 = vmatpush.bf16.msra.mxu0 %v4654_v19 }
 0x313   : > { %3529 = vmatpush.bf16.msra.mxu1 %v4646_v35 }
 0x314   : > { %3616 = vmatpush.bf16.msra.mxu2 %v4662_v56 }
 0x316   : > { %3469 = vmatpush.bf16.msra.mxu0 %v4653_v3 }
 0x317   : > { %3530 = vmatpush.bf16.msra.mxu1 %v4645_v39 }
 0x318   : > { %3617 = vmatpush.bf16.msra.mxu2 %v4661_v31 }
 0x319   : > { %3470 = vmatmul.bf16.vlgmr.msra.gmra.mxu0 %v3397_v16 }
 0x31a   : > { %3531 = vmatmul.bf16.vlgmr.msra.gmra.mxu1 %v3380_v41 }
 0x396   : > { %v3471_v33 = vpop.f32.mrf.mxu0 }
 0x397   : > { %v3532_v55 = vpop.f32.mrf.mxu1 }
 0x398   : > { %v3533_v47 = vadd.f32 %v3532_v55, %v3471_v33 }
 0x39a   : > { %v3540_v28 = vadd.f32 %v4708_v1, %v3533_v47 }
 0x39c   : > { %v3541_v44 = vpack.c.bf16 %v3540_v28, %v3540_v28 }
 0x39e   : > { %3618 = vmatmul.bf16.vlgmr.msra.gmra.mxu2 %v3541_v44  ;;  %v3473_v27 = vpop.f32.mrf.mxu0 }
 0x39f   : > { %v3534_v45 = vpop.f32.mrf.mxu1 }
 0x421   : > { %v3619_v11 = vpop.f32.mrf.mxu2 }
 0x422   : > { %v3620_v30 = vadd.f32 %v4709_v43, %v3619_v11 }
 0x424   : > { %v3623_v13 = vadd.f32 %v3620_v30, %v3540_v28 }
 0x426   : > { %v3624_v53 = vmul.f32 %v3623_v13, %v3623_v13 }
 0x428   : > { %3625 = vadd.xlane.f32.xlu0 %v3624_v53 }
 0x429   : > { %v3621_v2 = vpop.f32.mrf.mxu2 }
 0x49b   : > { %v3626_v36 = vpop.xlane.xlu0 %3625 }
 0x49c   : > { %4710 = vrsqrt.f32 %v3626_v36  ;;  %vm3634_vm12 = vcmp.eq.f32.partialorder %v3626_v36, inf  ;;  %v3637_v61 = vand.u32 2147483648, %v3626_v36  ;;  %vm3636_vm13 = vcmp.eq.f32.partialorder %v3626_v36, 0.0 }
 0x4a2   : > { %v4711_v7 = vpop.eup %4710 }
 0x4a3   : > { %v3628_v12 = vmul.f32 %v4711_v7, %v3626_v36 }
 0x4a5   : > { %v3629_v5 = vmul.f32 %v4711_v7, %v3628_v12 }
 0x4a7   : > { %v3630_v52 = vmul.f32 0.5, %v3629_v5 }
 0x4a9   : > { %v3631_v37 = vsub.f32 1.5, %v3630_v52 }
 0x4ab   : > { %v3632_v25 = vmul.f32 %v4711_v7, %v3631_v37 }
 0x4ad   : > { %v3633_v50 = vmul.f32 %v3632_v25, %v3626_v36 }
 0x4af   : > { %v3635_v20 = vsel %vm3634_vm12, %v3626_v36, %v3633_v50 }
 0x4b0   : > { %v3638_v6 = vsel %vm3636_vm13, %v3637_v61, %v3635_v20 }
 0x4b1   : > { %v3639_v63 = vmax.f32 %v3638_v6, 1e-12 }
 0x4b3   : > { %4712 = vrcp.f32 %v3639_v63  ;;  %v3651_v22 = vand.u32 2147483648, %v3639_v63  ;;  %v3649_v57 = vand.u32 2147483647, %v3639_v63  ;;  %vm3645_vm15 = vweird.f32 %v3639_v63 }
 0x4b5   : > { %v3652_v4 = vor.u32 1.1754944e-38, %v3651_v22  ;;  %vm3650_vm1 = vcmp.eq.f32.partialorder %v3649_v57, 8.507059e+37 }
 0x4b9   : > { %v4713_v42 = vpop.eup %4712 }
 0x4ba   : > { %v3641_v60 = vmul.f32 %v4713_v42, %v3639_v63  ;;  %vm3646_vm14 = vweird.f32 %v4713_v42 }
 0x4bb   : > { %vm3647_vm0 = vmor %vm3645_vm15, %vm3646_vm14 }
 0x4bc   : > { %v3642_v54 = vsub.f32 1.0, %v3641_v60 }
 0x4be   : > { %v3643_v0 = vmul.f32 %v4713_v42, %v3642_v54 }
 0x4c0   : > { %v3644_v49 = vadd.f32 %v4713_v42, %v3643_v0 }
 0x4c2   : > { %v3648_v29 = vsel %vm3647_vm0, %v4713_v42, %v3644_v49 }
 0x4c3   : > { %v3653_v38 = vsel %vm3650_vm1, %v3652_v4, %v3648_v29 }
 0x4c4   : > { %v3654_v18 = vmul.f32 %v3653_v38, %v3623_v13 }
 0x4c6   : > { %v3655_v26 = vpack.c.bf16 %v3654_v18, %v3654_v18 }
 0x4c8   : > { %3656 = vst [vmem:[%s4826_s28] sm:$0xf] %v3655_v26 }
 0x4c9 PF: > { %s6247_s23 = sld [smem:[#allocation4_spill]] }
 0x4cf   : > { %s22_s21 = sadd.s32 1, %s6247_s23  }
 0x4d0   : > { %p19_p5 = scmp.ge.s32.totalorder %s22_s21, 5  }
 0x4d2   :  { %21 = sbr.rel (!%p19_p5) target bundleno = 1 (0x1), region = 114 }

</bundles_post_ra>
